<compile_context>
chip_gen: v5e
topology: v5e:2x2
jax: 0.10.0
libtpu: 0.0.40
codegen_flags: <defaults>
</compile_context>

<pallas_src>
import functools

import jax
import jax.numpy as jnp
import numpy as np
from jax.experimental import pallas as pl
from jax.experimental.pallas import tpu as pltpu


def _logits_kernel(z_ref, w1_ref, b1_ref, w2_ref, w_ref):
    """Per N-tile: w = ( mean_m tanh(z_m @ w1 + b1) ) @ w2  (mean folded before 2nd matmul)."""
    M, tn, D = z_ref.shape
    H = w1_ref.shape[1]

    # One large MXU matmul over all metapaths (better MXU fill than M small ones);
    # z tile cast to bf16 once, weights already bf16 (pre-cast in the wrapper).
    z2d = z_ref[...].astype(jnp.bfloat16).reshape(M * tn, D)
    h = jnp.tanh(
        jnp.dot(z2d, w1_ref[...], preferred_element_type=jnp.float32) + b1_ref[...]
    )                                                               # (M*tn, H) f32
    # mean over metapaths commutes with the linear, bias-free second projection.
    h_mean = h.reshape(M, tn, H).sum(axis=0) * (1.0 / M)            # (tn, H) f32
    w = jnp.dot(h_mean.astype(jnp.bfloat16), w2_ref[...],
                preferred_element_type=jnp.float32)                 # (tn, O) f32
    w_ref[...] = w.astype(w_ref.dtype)


def _apply_kernel(z_ref, w_ref, mx_ref, s_ref, out_ref, att_ref):
    # Pure bandwidth pass: beta = exp(w - max) / sum ; out_emb = beta * z.
    inv_s = pl.reciprocal(s_ref[...], approx=False)                 # (1, O); exact, negligible cost
    beta = jnp.exp(w_ref[...].astype(jnp.float32) - mx_ref[...]) * inv_s   # (tn, O) f32
    att_ref[...] = beta
    out_ref[...] = beta[None, :, :] * z_ref[...]                    # (M, tn, O) lane-dense stores


def _vmem_budget_and_limit():
    """Generation-aware (working-set budget, scoped-VMEM limit) in bytes."""
    try:
        info = pltpu.get_tpu_info()
        vmem_phys = int(getattr(info, "vmem_capacity_bytes", 128 * 1024 * 1024))
    except Exception:
        vmem_phys = 128 * 1024 * 1024
    if vmem_phys <= 64 * 1024 * 1024:        # v7x-class: 64 MiB VMEM per TC, 2 TCs
        return 20 * 1024 * 1024, 32 * 1024 * 1024
    return 26 * 1024 * 1024, 48 * 1024 * 1024  # v5e / v6e: 128 MiB physical VMEM


def _choose_tile_n(M, N, D, O, budget_bytes):
    # Sized off the apply pass (the heavier stream): double-buffered z-in, out_emb-out,
    # bf16 logits-in and f32 att-out tiles.
    bytes_per_row = 8 * M * D + 8 * M * O + 4 * O + 8 * O
    cap = max(8, budget_bytes // bytes_per_row)

    def candidates(step):
        t = min(N, cap)
        t -= t % step
        while t >= step:
            if N % t == 0:
                yield t
            t -= step

    # Prefer a 16-row-aligned tile (bf16 native sublane tile) with an even tile count >= 2
    # so both v7x TensorCores get balanced work on the "parallel" axes.
    for step in (16, 8):
        for t in candidates(step):
            if (N // t) >= 2 and (N // t) % 2 == 0:
                return t
    for step in (16, 8):
        for t in candidates(step):
            return t
    return 8


def semantic_attention(z, w1, b1, w2, *, tile_n=None):
    """z: (M, N, D) f32. w1: (D, H). b1: (1, H). w2: (H, O=1024). Returns (out_emb, att_mp)."""
    M, N, D = z.shape
    H = w1.shape[1]
    O = w2.shape[1]
    assert D == O, "nn module hard-codes out dim 1024; beta*z needs in_size == 1024"
    assert N % 8 == 0, "node count must be a multiple of 8 (TPU sublane tiling)"

    budget, vmem_limit = _vmem_budget_and_limit()
    tn = _choose_tile_n(M, N, D, O, budget) if tile_n is None else tile_n
    assert N % tn == 0 and tn % 8 == 0
    n_tiles = N // tn

    # Pre-cast weights to bf16 once (halves resident-weight VMEM + one-time DMA and removes
    # per-grid-step casts inside the kernel).  Bias stays f32 (added post-matmul in f32).
    w1_bf = w1.astype(jnp.bfloat16)
    w2_bf = w2.astype(jnp.bfloat16)

    # bf16 intermediate logits halve the (N, O) HBM traffic between the two passes;
    # fall back to f32 if the tile is not 16-row aligned (bf16 native sublane tiling).
    logits_dtype = jnp.bfloat16 if tn % 16 == 0 else jnp.float32
    logits_bytes = np.dtype(logits_dtype).itemsize

    const2 = lambda i: (0, 0)

    # ---- Pass 1: projected logits per N-tile (no cross-tile state -> "parallel") ----
    w_logits = pl.pallas_call(
        _logits_kernel,
        grid=(n_tiles,),
        in_specs=[
            pl.BlockSpec((M, tn, D), lambda i: (0, i, 0)),   # z tile, streamed
            pl.BlockSpec((D, H), const2),                    # resident bf16 weights
            pl.BlockSpec((1, H), const2),                    # bias (f32)
            pl.BlockSpec((H, O), const2),
        ],
        out_specs=pl.BlockSpec((tn, O), lambda i: (i, 0)),
        out_shape=jax.ShapeDtypeStruct((N, O), logits_dtype),
        compiler_params=pltpu.CompilerParams(
            dimension_semantics=("parallel",),
            vmem_limit_bytes=vmem_limit),
        cost_estimate=pl.CostEstimate(
            flops=2 * M * N * D * H + 2 * N * H * O + M * N * H,
            transcendentals=M * N * H,
            bytes_accessed=4 * M * N * D + 2 * (D * H + H * O) + 4 * H
                           + N * O * logits_bytes,
        ),
    )(z, w1_bf, b1, w2_bf)

    # ---- Softmax statistics over the node axis: tiny (N, O) reduction, done in XLA ----
    # (Keeping the stats out of pass 1 lets its grid axis be "parallel" for v7x megacore.)
    w_f32 = w_logits.astype(jnp.float32)
    mx = jnp.max(w_f32, axis=0, keepdims=True)               # (1, O)
    s = jnp.sum(jnp.exp(w_f32 - mx), axis=0, keepdims=True)  # (1, O)

    # ---- Pass 2: beta * z writeback (HBM-bound; parallel over N-tiles) ----
    out_emb, att_mp = pl.pallas_call(
        _apply_kernel,
        grid=(n_tiles,),
        in_specs=[
            pl.BlockSpec((M, tn, D), lambda i: (0, i, 0)),
            pl.BlockSpec((tn, O), lambda i: (i, 0)),
            pl.BlockSpec((1, O), const2),
            pl.BlockSpec((1, O), const2),
        ],
        out_specs=(
            pl.BlockSpec((M, tn, O), lambda i: (0, i, 0)),
            pl.BlockSpec((tn, O), lambda i: (i, 0)),
        ),
        out_shape=(
            jax.ShapeDtypeStruct((M, N, O), jnp.float32),
            jax.ShapeDtypeStruct((N, O), jnp.float32),
        ),
        compiler_params=pltpu.CompilerParams(
            dimension_semantics=("parallel",),
            vmem_limit_bytes=vmem_limit),
        cost_estimate=pl.CostEstimate(
            flops=(M + 2) * N * O,
            transcendentals=N * O,
            bytes_accessed=4 * M * N * D + N * O * logits_bytes + 8 * O
                           + 4 * M * N * O + 4 * N * O,
        ),
    )(z, w_logits, mx, s)

    return out_emb, att_mp


def _reference(z, w1, b1, w2):
    p = jnp.tanh(z @ w1 + b1) @ w2
    w = p.mean(0)
    beta = jax.nn.softmax(w, axis=0)
    return beta[None] * z, beta


if __name__ == "__main__":
    # Small-but-faithful shapes: the module hard-codes out dim 1024, so D = 1024;
    # keep M (metapaths), N (nodes), hidden H small.
    M, N, D, H = 3, 256, 1024, 128

    key = jax.random.PRNGKey(0)
    kz, k1, kb, k2 = jax.random.split(key, 4)
    z = jax.random.normal(kz, (M, N, D), dtype=jnp.float32)
    w1 = jax.random.normal(k1, (D, H), dtype=jnp.float32) * (1.0 / np.sqrt(D))
    b1 = jax.random.normal(kb, (1, H), dtype=jnp.float32) * 0.01
    w2 = jax.random.normal(k2, (H, D), dtype=jnp.float32) * (1.0 / np.sqrt(H))

    # tile_n=64 -> 4 N-tiles: exercises the gridded logits + parallel apply path (bf16 logits).
    fn = jax.jit(functools.partial(semantic_attention, tile_n=64))
    out_emb, att_mp = jax.block_until_ready(fn(z, w1, b1, w2))

    ref_out, ref_att = _reference(z, w1, b1, w2)
    assert out_emb.shape == (M, N, D) and att_mp.shape == (N, D)
    # bf16 MXU operands + bf16 logits intermediate => looser tolerance than pure f32.
    np.testing.assert_allclose(np.asarray(att_mp), np.asarray(ref_att), rtol=5e-2, atol=5e-4)
    np.testing.assert_allclose(np.asarray(out_emb), np.asarray(ref_out), rtol=5e-2, atol=2e-3)

    print("KERNEL_OK")
</pallas_src>

<mosaic_0001>
module attributes {stable_mosaic.version = 11 : i64} {
  func.func @_logits_kernel(%arg0: i32, %arg1: memref<3x64x1024xf32, #tpu.memory_space<vmem>>, %arg2: memref<1024x128xbf16, #tpu.memory_space<vmem>>, %arg3: memref<1x128xf32, #tpu.memory_space<vmem>>, %arg4: memref<128x1024xbf16, #tpu.memory_space<vmem>>, %arg5: memref<64x1024xbf16, #tpu.memory_space<vmem>>) attributes {dimension_semantics = [#tpu.dimension_semantics<parallel>], iteration_bounds = array<i64: 4>, scalar_prefetch = 0 : i64, scratch_operands = 0 : i64, tpu.core_type = #tpu.core_type<tc>, window_params = [{transform_indices = @transform_0, window_bounds = array<i64: 3, 64, 1024>}, {pipeline_mode = #tpu.pipeline_mode<synchronous>, transform_indices = @transform_1, window_bounds = array<i64: 1024, 128>}, {pipeline_mode = #tpu.pipeline_mode<synchronous>, transform_indices = @transform_2, window_bounds = array<i64: 1, 128>}, {pipeline_mode = #tpu.pipeline_mode<synchronous>, transform_indices = @transform_3, window_bounds = array<i64: 128, 1024>}, {transform_indices = @transform_4, window_bounds = array<i64: 64, 1024>}]} {
    %c0 = arith.constant 0 : index
    %c0_0 = arith.constant 0 : index
    %c0_1 = arith.constant 0 : index
    %0 = vector.load %arg1[%c0, %c0_0, %c0_1] : memref<3x64x1024xf32, #tpu.memory_space<vmem>>, vector<3x64x1024xf32>
    %1 = arith.truncf %0 : vector<3x64x1024xf32> to vector<3x64x1024xbf16>
    %2 = vector.shape_cast %1 : vector<3x64x1024xbf16> to vector<192x1024xbf16>
    %c0_2 = arith.constant 0 : index
    %c0_3 = arith.constant 0 : index
    %3 = vector.load %arg2[%c0_2, %c0_3] : memref<1024x128xbf16, #tpu.memory_space<vmem>>, vector<1024x128xbf16>
    %cst = arith.constant dense<0.000000e+00> : vector<192x128xf32>
    %4 = tpu.matmul %2, %3, %cst {dimension_numbers = #tpu.dot_dimension_numbers<[1], [0], [0], [1], [0, 0, 1, 1], [], []>} : vector<192x1024xbf16>, vector<1024x128xbf16>, vector<192x128xf32> -> vector<192x128xf32>
    %c0_4 = arith.constant 0 : index
    %c0_5 = arith.constant 0 : index
    %5 = vector.load %arg3[%c0_4, %c0_5] : memref<1x128xf32, #tpu.memory_space<vmem>>, vector<1x128xf32>
    %6 = vector.broadcast %5 : vector<1x128xf32> to vector<192x128xf32>
    %7 = arith.addf %4, %6 : vector<192x128xf32>
    %8 = math.tanh %7 : vector<192x128xf32>
    %9 = vector.shape_cast %8 : vector<192x128xf32> to vector<3x64x128xf32>
    %cst_6 = arith.constant dense<0.000000e+00> : vector<64x128xf32>
    %10 = vector.multi_reduction <add>, %9, %cst_6 [0] : vector<3x64x128xf32> to vector<64x128xf32>
    %cst_7 = arith.constant 0.333333343 : f32
    %11 = vector.broadcast %cst_7 : f32 to vector<64x128xf32>
    %12 = arith.mulf %10, %11 : vector<64x128xf32>
    %13 = arith.truncf %12 : vector<64x128xf32> to vector<64x128xbf16>
    %c0_8 = arith.constant 0 : index
    %c0_9 = arith.constant 0 : index
    %14 = vector.load %arg4[%c0_8, %c0_9] : memref<128x1024xbf16, #tpu.memory_space<vmem>>, vector<128x1024xbf16>
    %cst_10 = arith.constant dense<0.000000e+00> : vector<64x1024xf32>
    %15 = tpu.matmul %13, %14, %cst_10 {dimension_numbers = #tpu.dot_dimension_numbers<[1], [0], [0], [1], [0, 0, 1, 1], [], []>} : vector<64x128xbf16>, vector<128x1024xbf16>, vector<64x1024xf32> -> vector<64x1024xf32>
    %16 = arith.truncf %15 : vector<64x1024xf32> to vector<64x1024xbf16>
    %c0_11 = arith.constant 0 : index
    %c0_12 = arith.constant 0 : index
    %17 = vector.load %arg5[%c0_11, %c0_12] : memref<64x1024xbf16, #tpu.memory_space<vmem>>, vector<64x1024xbf16>
    tpu.vector_store %arg5[%c0_11, %c0_12], %16 {strides = array<i32>} : memref<64x1024xbf16, #tpu.memory_space<vmem>>, vector<64x1024xbf16>,
    return
  }
  func.func @transform_0(%arg0: i32) -> (i32, i32, i32) {
    %c0_i32 = arith.constant 0 : i32
    %c0_i32_0 = arith.constant 0 : i32
    %c0_i32_1 = arith.constant 0 : i32
    return %c0_i32, %arg0, %c0_i32_0 : i32, i32, i32
  }
  func.func @transform_1(%arg0: i32) -> (i32, i32) {
    %c0_i32 = arith.constant 0 : i32
    %c0_i32_0 = arith.constant 0 : i32
    %c0_i32_1 = arith.constant 0 : i32
    return %c0_i32, %c0_i32_0 : i32, i32
  }
  func.func @transform_2(%arg0: i32) -> (i32, i32) {
    %c0_i32 = arith.constant 0 : i32
    %c0_i32_0 = arith.constant 0 : i32
    %c0_i32_1 = arith.constant 0 : i32
    return %c0_i32, %c0_i32_0 : i32, i32
  }
  func.func @transform_3(%arg0: i32) -> (i32, i32) {
    %c0_i32 = arith.constant 0 : i32
    %c0_i32_0 = arith.constant 0 : i32
    %c0_i32_1 = arith.constant 0 : i32
    return %c0_i32, %c0_i32_0 : i32, i32
  }
  func.func @transform_4(%arg0: i32) -> (i32, i32) {
    %c0_i32 = arith.constant 0 : i32
    %c0_i32_0 = arith.constant 0 : i32
    return %arg0, %c0_i32 : i32, i32
  }
}

module attributes {stable_mosaic.version = 11 : i64} {
  func.func @_apply_kernel(%arg0: i32, %arg1: memref<3x64x1024xf32, #tpu.memory_space<vmem>>, %arg2: memref<64x1024xbf16, #tpu.memory_space<vmem>>, %arg3: memref<1x1024xf32, #tpu.memory_space<vmem>>, %arg4: memref<1x1024xf32, #tpu.memory_space<vmem>>, %arg5: memref<3x64x1024xf32, #tpu.memory_space<vmem>>, %arg6: memref<64x1024xf32, #tpu.memory_space<vmem>>) attributes {dimension_semantics = [#tpu.dimension_semantics<parallel>], iteration_bounds = array<i64: 4>, scalar_prefetch = 0 : i64, scratch_operands = 0 : i64, tpu.core_type = #tpu.core_type<tc>, window_params = [{transform_indices = @transform_0, window_bounds = array<i64: 3, 64, 1024>}, {transform_indices = @transform_1, window_bounds = array<i64: 64, 1024>}, {pipeline_mode = #tpu.pipeline_mode<synchronous>, transform_indices = @transform_2, window_bounds = array<i64: 1, 1024>}, {pipeline_mode = #tpu.pipeline_mode<synchronous>, transform_indices = @transform_3, window_bounds = array<i64: 1, 1024>}, {transform_indices = @transform_4, window_bounds = array<i64: 3, 64, 1024>}, {transform_indices = @transform_5, window_bounds = array<i64: 64, 1024>}]} {
    %c0 = arith.constant 0 : index
    %c0_0 = arith.constant 0 : index
    %0 = vector.load %arg4[%c0, %c0_0] : memref<1x1024xf32, #tpu.memory_space<vmem>>, vector<1x1024xf32>
    %1 = tpu.reciprocal %0 : vector<1x1024xf32> -> vector<1x1024xf32>
    %c0_1 = arith.constant 0 : index
    %c0_2 = arith.constant 0 : index
    %2 = vector.load %arg2[%c0_1, %c0_2] : memref<64x1024xbf16, #tpu.memory_space<vmem>>, vector<64x1024xbf16>
    %3 = arith.extf %2 : vector<64x1024xbf16> to vector<64x1024xf32>
    %c0_3 = arith.constant 0 : index
    %c0_4 = arith.constant 0 : index
    %4 = vector.load %arg3[%c0_3, %c0_4] : memref<1x1024xf32, #tpu.memory_space<vmem>>, vector<1x1024xf32>
    %5 = vector.broadcast %4 : vector<1x1024xf32> to vector<64x1024xf32>
    %6 = arith.subf %3, %5 : vector<64x1024xf32>
    %7 = math.exp %6 : vector<64x1024xf32>
    %8 = vector.broadcast %1 : vector<1x1024xf32> to vector<64x1024xf32>
    %9 = arith.mulf %7, %8 : vector<64x1024xf32>
    %c0_5 = arith.constant 0 : index
    %c0_6 = arith.constant 0 : index
    %10 = vector.load %arg6[%c0_5, %c0_6] : memref<64x1024xf32, #tpu.memory_space<vmem>>, vector<64x1024xf32>
    tpu.vector_store %arg6[%c0_5, %c0_6], %9 {strides = array<i32>} : memref<64x1024xf32, #tpu.memory_space<vmem>>, vector<64x1024xf32>,
    %11 = vector.shape_cast %9 : vector<64x1024xf32> to vector<1x64x1024xf32>
    %c0_7 = arith.constant 0 : index
    %c0_8 = arith.constant 0 : index
    %c0_9 = arith.constant 0 : index
    %12 = vector.load %arg1[%c0_7, %c0_8, %c0_9] : memref<3x64x1024xf32, #tpu.memory_space<vmem>>, vector<3x64x1024xf32>
    %13 = vector.broadcast %11 : vector<1x64x1024xf32> to vector<3x64x1024xf32>
    %14 = arith.mulf %13, %12 : vector<3x64x1024xf32>
    %c0_10 = arith.constant 0 : index
    %c0_11 = arith.constant 0 : index
    %c0_12 = arith.constant 0 : index
    %15 = vector.load %arg5[%c0_10, %c0_11, %c0_12] : memref<3x64x1024xf32, #tpu.memory_space<vmem>>, vector<3x64x1024xf32>
    tpu.vector_store %arg5[%c0_10, %c0_11, %c0_12], %14 {strides = array<i32>} : memref<3x64x1024xf32, #tpu.memory_space<vmem>>, vector<3x64x1024xf32>,
    return
  }
  func.func @transform_0(%arg0: i32) -> (i32, i32, i32) {
    %c0_i32 = arith.constant 0 : i32
    %c0_i32_0 = arith.constant 0 : i32
    %c0_i32_1 = arith.constant 0 : i32
    return %c0_i32, %arg0, %c0_i32_0 : i32, i32, i32
  }
  func.func @transform_1(%arg0: i32) -> (i32, i32) {
    %c0_i32 = arith.constant 0 : i32
    %c0_i32_0 = arith.constant 0 : i32
    return %arg0, %c0_i32 : i32, i32
  }
  func.func @transform_2(%arg0: i32) -> (i32, i32) {
    %c0_i32 = arith.constant 0 : i32
    %c0_i32_0 = arith.constant 0 : i32
    %c0_i32_1 = arith.constant 0 : i32
    return %c0_i32, %c0_i32_0 : i32, i32
  }
  func.func @transform_3(%arg0: i32) -> (i32, i32) {
    %c0_i32 = arith.constant 0 : i32
    %c0_i32_0 = arith.constant 0 : i32
    %c0_i32_1 = arith.constant 0 : i32
    return %c0_i32, %c0_i32_0 : i32, i32
  }
  func.func @transform_4(%arg0: i32) -> (i32, i32, i32) {
    %c0_i32 = arith.constant 0 : i32
    %c0_i32_0 = arith.constant 0 : i32
    %c0_i32_1 = arith.constant 0 : i32
    return %c0_i32, %arg0, %c0_i32_0 : i32, i32, i32
  }
  func.func @transform_5(%arg0: i32) -> (i32, i32) {
    %c0_i32 = arith.constant 0 : i32
    %c0_i32_0 = arith.constant 0 : i32
    return %arg0, %c0_i32 : i32, i32
  }
}

</mosaic_0001>

<bundles_post_ra>
// kernel: semantic_attention.3
= control target key start
LH: loop header
LB: loop body
LE: loop exit
PB: predicated region body
PF: predicated region fallthrough
CT: control target
= control target key end

     0   :  { %11 = vsyncpa [#allocation4], 0  ;;  %s3911_s0 = inlined_call_operand.vmem [shape: f32[3,256,1024], index: 0, kind: input, shape index: {}]   ;;  %s3912_s1 = inlined_call_operand.vmem [shape: bf16[256,1024], index: 1, kind: input, shape index: {}]   ;;  %s3913_s2 = inlined_call_operand.vmem [shape: f32[1,1024], index: 2, kind: input, shape index: {}]   ;;  %s3914_s3 = inlined_call_operand.vmem [shape: f32[1,1024], index: 3, kind: input, shape index: {}]   ;;  %s3915_s4 = inlined_call_operand.hbm [shape: f32[3,256,1024], index: 4, kind: output, shape index: {0}]   ;;  %s3916_s5 = inlined_call_operand.hbm [shape: f32[256,1024], index: 5, kind: output, shape index: {1}]  }
   0x1   :  { %13 = vsyncpa [#allocation4 + $0x1], 0 }
   0x2   :  { %14 = vsyncpa [#allocation6], 0 }
   0x3   :  { %16 = vsyncpa [#allocation6 + $0x1], 0  ;;  %s2272_s18 = smov 0   ;;  %s2274_s19 = smov 0  }
   0x4   :  { %s2276_s20 = smov 0   ;;  %s2278_s21 = smov 0  }
   0x5 LB: > { %s2293_s22 = sadd.s32 4294967295, %s2231_s21   ;;  %s1883_s23 = sadd.s32 4294967294, %s2231_s21   ;;  %s2231_s21 = sphi %s2278_s21, %s4034_s21   ;;  %s2227_s20 = sphi %s2276_s20, %s4033_s20   ;;  %s2223_s19 = sphi %s2274_s19, %s4032_s19   ;;  %s2219_s18 = sphi %s2272_s18, %s4031_s18  }
   0x6   : > { %s2297_s24 = sadd.s32 1, %s2231_s21   ;;  %s29_s25 = sadd.s32 1, %s2227_s20 }
   0x7   : > { %s26_s26 = ssub.s32 %s2231_s21, %s2297_s24  ;;  %p36_p0 = scmp.ne.s32.totalorder %s2227_s20, %s2223_s19 }
   0x8   : > { %p27_p1 = scmp.eq.s32.totalorder %s26_s26, 0  ;;  %p37_p2 = scmp.eq.s32.totalorder %s2231_s21, 0 }
   0x9   : > { %p134_p3 = scmp.eq.s32.totalorder %s2293_s22, 3  ;;  %p139_p4 = scmp.ne.s32.totalorder %s2223_s19, %s2219_s18 }
   0xa   : > { %s2309_s27 = scalar_select %p27_p1, %s2227_s20, %s29_s25  }
   0xb   : > { %p38_p5 = por %p37_p2, %p36_p0  ;;  %p2311_p6 = por %p134_p3, %p36_p0 }
   0xc   : > { %p140_p7 = scmp.eq.s32.totalorder %s1883_s23, 3  ;;  %p1885_p9 = scmp.ge.s32.totalorder %s2231_s21, 4 }
   0xe   : > { %p2315_p8 = por %p140_p7, %p139_p4  ;;  %188 = sbr.rel (%p1885_p9) target bundleno = 215 (0xd7), region = 24 }
  0x13   : > { %191 = sbr.rel (!%p38_p5) target bundleno = 215 (0xd7), region = 28  ;;  %s193_s30 = sand.u32 (%p38_p5), 1, %s2227_s20  }
  0x14   : > { %s1904_s6 = sshll.u32 (%p38_p5), %s2231_s21, 9  ;;  %s1910_s7 = smul.u32 (%p38_p5), 1536, %s193_s30 }
  0x15   : > { %s2325_s10 = scalar_lea.vmem (%p38_p5), %s3911_s0, %s1904_s6 }
  0x16   : > { %v212_v0 = vld [vmem:[%s2325_s10] sm:$0xff] (%p38_p5)  ;;  %v214_v1 = vld [vmem:[%s2325_s10 + $0x8] sm:$0xff] (%p38_p5)  ;;  %v216_v2 = vld [vmem:[%s2325_s10 + $0x10] sm:$0xff] (%p38_p5)  ;;  %s2330_s11 = scalar_lea.vmem (%p38_p5), [#allocation2], %s1910_s7 }
  0x17   : > { %213 = vst [vmem:[%s2330_s11] sm:$0xff] (%p38_p5), %v212_v0  ;;  %v218_v3 = vld [vmem:[%s2325_s10 + $0x18] sm:$0xff] (%p38_p5)  ;;  %v220_v4 = vld [vmem:[%s2325_s10 + $0x20] sm:$0xff] (%p38_p5)  ;;  %v222_v5 = vld [vmem:[%s2325_s10 + $0x28] sm:$0xff] (%p38_p5) }
  0x18   : > { %215 = vst [vmem:[%s2330_s11 + $0x8] sm:$0xff] %v214_v1  ;;  %v224_v6 = vld [vmem:[%s2325_s10 + $0x30] sm:$0xff]  ;;  %v226_v7 = vld [vmem:[%s2325_s10 + $0x38] sm:$0xff]  ;;  %v228_v8 = vld [vmem:[%s2325_s10 + $0x40] sm:$0xff] }
  0x19   : > { %217 = vst [vmem:[%s2330_s11 + $0x10] sm:$0xff] %v216_v2  ;;  %v230_v9 = vld [vmem:[%s2325_s10 + $0x48] sm:$0xff]  ;;  %v232_v10 = vld [vmem:[%s2325_s10 + $0x50] sm:$0xff]  ;;  %v234_v11 = vld [vmem:[%s2325_s10 + $0x58] sm:$0xff] }
  0x1a   : > { %219 = vst [vmem:[%s2330_s11 + $0x18] sm:$0xff] %v218_v3  ;;  %v236_v12 = vld [vmem:[%s2325_s10 + $0x60] sm:$0xff]  ;;  %v238_v13 = vld [vmem:[%s2325_s10 + $0x68] sm:$0xff]  ;;  %v240_v14 = vld [vmem:[%s2325_s10 + $0x70] sm:$0xff] }
  0x1b   : > { %221 = vst [vmem:[%s2330_s11 + $0x20] sm:$0xff] %v220_v4  ;;  %v242_v15 = vld [vmem:[%s2325_s10 + $0x78] sm:$0xff]  ;;  %v244_v16 = vld [vmem:[%s2325_s10 + $0x80] sm:$0xff]  ;;  %v246_v17 = vld [vmem:[%s2325_s10 + $0x88] sm:$0xff] }
  0x1c   : > { %223 = vst [vmem:[%s2330_s11 + $0x28] sm:$0xff] %v222_v5  ;;  %v248_v18 = vld [vmem:[%s2325_s10 + $0x90] sm:$0xff]  ;;  %v250_v19 = vld [vmem:[%s2325_s10 + $0x98] sm:$0xff]  ;;  %v252_v20 = vld [vmem:[%s2325_s10 + $0xa0] sm:$0xff] }
  0x1d   : > { %225 = vst [vmem:[%s2330_s11 + $0x30] sm:$0xff] %v224_v6  ;;  %v254_v21 = vld [vmem:[%s2325_s10 + $0xa8] sm:$0xff]  ;;  %v256_v22 = vld [vmem:[%s2325_s10 + $0xb0] sm:$0xff]  ;;  %v258_v23 = vld [vmem:[%s2325_s10 + $0xb8] sm:$0xff] }
  0x1e   : > { %227 = vst [vmem:[%s2330_s11 + $0x38] sm:$0xff] %v226_v7  ;;  %v260_v24 = vld [vmem:[%s2325_s10 + $0xc0] sm:$0xff]  ;;  %v262_v25 = vld [vmem:[%s2325_s10 + $0xc8] sm:$0xff]  ;;  %v264_v26 = vld [vmem:[%s2325_s10 + $0xd0] sm:$0xff] }
  0x1f   : > { %229 = vst [vmem:[%s2330_s11 + $0x40] sm:$0xff] %v228_v8  ;;  %v266_v27 = vld [vmem:[%s2325_s10 + $0xd8] sm:$0xff]  ;;  %v268_v28 = vld [vmem:[%s2325_s10 + $0xe0] sm:$0xff]  ;;  %v270_v29 = vld [vmem:[%s2325_s10 + $0xe8] sm:$0xff] }
  0x20   : > { %231 = vst [vmem:[%s2330_s11 + $0x48] sm:$0xff] %v230_v9  ;;  %v272_v30 = vld [vmem:[%s2325_s10 + $0xf0] sm:$0xff]  ;;  %v274_v31 = vld [vmem:[%s2325_s10 + $0xf8] sm:$0xff]  ;;  %v276_v32 = vld [vmem:[%s2325_s10 + $0x100] sm:$0xff] }
  0x21   : > { %233 = vst [vmem:[%s2330_s11 + $0x50] sm:$0xff] %v232_v10  ;;  %v278_v33 = vld [vmem:[%s2325_s10 + $0x108] sm:$0xff]  ;;  %v280_v34 = vld [vmem:[%s2325_s10 + $0x110] sm:$0xff]  ;;  %v282_v35 = vld [vmem:[%s2325_s10 + $0x118] sm:$0xff] }
  0x22   : > { %235 = vst [vmem:[%s2330_s11 + $0x58] sm:$0xff] %v234_v11  ;;  %v284_v36 = vld [vmem:[%s2325_s10 + $0x120] sm:$0xff]  ;;  %v286_v37 = vld [vmem:[%s2325_s10 + $0x128] sm:$0xff]  ;;  %v288_v38 = vld [vmem:[%s2325_s10 + $0x130] sm:$0xff] }
  0x23   : > { %237 = vst [vmem:[%s2330_s11 + $0x60] sm:$0xff] %v236_v12  ;;  %v290_v39 = vld [vmem:[%s2325_s10 + $0x138] sm:$0xff]  ;;  %v292_v40 = vld [vmem:[%s2325_s10 + $0x140] sm:$0xff]  ;;  %v294_v41 = vld [vmem:[%s2325_s10 + $0x148] sm:$0xff] }
  0x24   : > { %239 = vst [vmem:[%s2330_s11 + $0x68] sm:$0xff] %v238_v13  ;;  %v296_v42 = vld [vmem:[%s2325_s10 + $0x150] sm:$0xff]  ;;  %v298_v43 = vld [vmem:[%s2325_s10 + $0x158] sm:$0xff]  ;;  %v300_v44 = vld [vmem:[%s2325_s10 + $0x160] sm:$0xff] }
  0x25   : > { %241 = vst [vmem:[%s2330_s11 + $0x70] sm:$0xff] %v240_v14  ;;  %v302_v45 = vld [vmem:[%s2325_s10 + $0x168] sm:$0xff]  ;;  %v304_v46 = vld [vmem:[%s2325_s10 + $0x170] sm:$0xff]  ;;  %v306_v47 = vld [vmem:[%s2325_s10 + $0x178] sm:$0xff] }
  0x26   : > { %243 = vst [vmem:[%s2330_s11 + $0x78] sm:$0xff] %v242_v15  ;;  %v308_v48 = vld [vmem:[%s2325_s10 + $0x180] sm:$0xff]  ;;  %v310_v49 = vld [vmem:[%s2325_s10 + $0x188] sm:$0xff]  ;;  %v312_v50 = vld [vmem:[%s2325_s10 + $0x190] sm:$0xff] }
  0x27   : > { %245 = vst [vmem:[%s2330_s11 + $0x80] sm:$0xff] %v244_v16  ;;  %v314_v51 = vld [vmem:[%s2325_s10 + $0x198] sm:$0xff]  ;;  %v316_v52 = vld [vmem:[%s2325_s10 + $0x1a0] sm:$0xff]  ;;  %v318_v53 = vld [vmem:[%s2325_s10 + $0x1a8] sm:$0xff] }
  0x28   : > { %247 = vst [vmem:[%s2330_s11 + $0x88] sm:$0xff] %v246_v17  ;;  %v320_v54 = vld [vmem:[%s2325_s10 + $0x1b0] sm:$0xff]  ;;  %v322_v55 = vld [vmem:[%s2325_s10 + $0x1b8] sm:$0xff]  ;;  %v324_v56 = vld [vmem:[%s2325_s10 + $0x1c0] sm:$0xff] }
  0x29   : > { %249 = vst [vmem:[%s2330_s11 + $0x90] sm:$0xff] %v248_v18  ;;  %v326_v57 = vld [vmem:[%s2325_s10 + $0x1c8] sm:$0xff]  ;;  %v328_v58 = vld [vmem:[%s2325_s10 + $0x1d0] sm:$0xff]  ;;  %v330_v59 = vld [vmem:[%s2325_s10 + $0x1d8] sm:$0xff] }
  0x2a   : > { %251 = vst [vmem:[%s2330_s11 + $0x98] sm:$0xff] %v250_v19  ;;  %v332_v60 = vld [vmem:[%s2325_s10 + $0x1e0] sm:$0xff]  ;;  %v334_v61 = vld [vmem:[%s2325_s10 + $0x1e8] sm:$0xff]  ;;  %v336_v62 = vld [vmem:[%s2325_s10 + $0x1f0] sm:$0xff] }
  0x2b   : > { %253 = vst [vmem:[%s2330_s11 + $0xa0] sm:$0xff] %v252_v20  ;;  %v338_v63 = vld [vmem:[%s2325_s10 + $0x1f8] sm:$0xff]  ;;  %v340_v0 = vld [vmem:[%s2325_s10 + $0x800] sm:$0xff]  ;;  %v342_v1 = vld [vmem:[%s2325_s10 + $0x808] sm:$0xff] }
  0x2c   : > { %255 = vst [vmem:[%s2330_s11 + $0xa8] sm:$0xff] %v254_v21  ;;  %v344_v2 = vld [vmem:[%s2325_s10 + $0x810] sm:$0xff]  ;;  %v346_v3 = vld [vmem:[%s2325_s10 + $0x818] sm:$0xff]  ;;  %v348_v4 = vld [vmem:[%s2325_s10 + $0x820] sm:$0xff] }
  0x2d   : > { %257 = vst [vmem:[%s2330_s11 + $0xb0] sm:$0xff] %v256_v22  ;;  %v350_v5 = vld [vmem:[%s2325_s10 + $0x828] sm:$0xff]  ;;  %v352_v6 = vld [vmem:[%s2325_s10 + $0x830] sm:$0xff]  ;;  %v354_v7 = vld [vmem:[%s2325_s10 + $0x838] sm:$0xff] }
  0x2e   : > { %259 = vst [vmem:[%s2330_s11 + $0xb8] sm:$0xff] %v258_v23  ;;  %v356_v8 = vld [vmem:[%s2325_s10 + $0x840] sm:$0xff]  ;;  %v358_v9 = vld [vmem:[%s2325_s10 + $0x848] sm:$0xff]  ;;  %v360_v10 = vld [vmem:[%s2325_s10 + $0x850] sm:$0xff] }
  0x2f   : > { %261 = vst [vmem:[%s2330_s11 + $0xc0] sm:$0xff] %v260_v24  ;;  %v362_v11 = vld [vmem:[%s2325_s10 + $0x858] sm:$0xff]  ;;  %v364_v12 = vld [vmem:[%s2325_s10 + $0x860] sm:$0xff]  ;;  %v366_v13 = vld [vmem:[%s2325_s10 + $0x868] sm:$0xff] }
  0x30   : > { %263 = vst [vmem:[%s2330_s11 + $0xc8] sm:$0xff] %v262_v25  ;;  %v368_v14 = vld [vmem:[%s2325_s10 + $0x870] sm:$0xff]  ;;  %v370_v15 = vld [vmem:[%s2325_s10 + $0x878] sm:$0xff]  ;;  %v372_v16 = vld [vmem:[%s2325_s10 + $0x880] sm:$0xff] }
  0x31   : > { %265 = vst [vmem:[%s2330_s11 + $0xd0] sm:$0xff] %v264_v26  ;;  %v374_v17 = vld [vmem:[%s2325_s10 + $0x888] sm:$0xff]  ;;  %v376_v18 = vld [vmem:[%s2325_s10 + $0x890] sm:$0xff]  ;;  %v378_v19 = vld [vmem:[%s2325_s10 + $0x898] sm:$0xff] }
  0x32   : > { %267 = vst [vmem:[%s2330_s11 + $0xd8] sm:$0xff] %v266_v27  ;;  %v380_v20 = vld [vmem:[%s2325_s10 + $0x8a0] sm:$0xff]  ;;  %v382_v21 = vld [vmem:[%s2325_s10 + $0x8a8] sm:$0xff]  ;;  %v384_v22 = vld [vmem:[%s2325_s10 + $0x8b0] sm:$0xff] }
  0x33   : > { %269 = vst [vmem:[%s2330_s11 + $0xe0] sm:$0xff] %v268_v28  ;;  %v386_v23 = vld [vmem:[%s2325_s10 + $0x8b8] sm:$0xff]  ;;  %v388_v24 = vld [vmem:[%s2325_s10 + $0x8c0] sm:$0xff]  ;;  %v390_v25 = vld [vmem:[%s2325_s10 + $0x8c8] sm:$0xff] }
  0x34   : > { %271 = vst [vmem:[%s2330_s11 + $0xe8] sm:$0xff] %v270_v29  ;;  %v392_v26 = vld [vmem:[%s2325_s10 + $0x8d0] sm:$0xff]  ;;  %v394_v27 = vld [vmem:[%s2325_s10 + $0x8d8] sm:$0xff]  ;;  %v396_v28 = vld [vmem:[%s2325_s10 + $0x8e0] sm:$0xff] }
  0x35   : > { %273 = vst [vmem:[%s2330_s11 + $0xf0] sm:$0xff] %v272_v30  ;;  %v398_v29 = vld [vmem:[%s2325_s10 + $0x8e8] sm:$0xff]  ;;  %v400_v30 = vld [vmem:[%s2325_s10 + $0x8f0] sm:$0xff] }
  0x36   : > { %275 = vst [vmem:[%s2330_s11 + $0xf8] sm:$0xff] %v274_v31  ;;  %v402_v31 = vld [vmem:[%s2325_s10 + $0x8f8] sm:$0xff] }
  0x37   : > { %277 = vst [vmem:[%s2330_s11 + $0x100] sm:$0xff] %v276_v32  ;;  %v404_v32 = vld [vmem:[%s2325_s10 + $0x900] sm:$0xff] }
  0x38   : > { %279 = vst [vmem:[%s2330_s11 + $0x108] sm:$0xff] %v278_v33  ;;  %v406_v33 = vld [vmem:[%s2325_s10 + $0x908] sm:$0xff] }
  0x39   : > { %281 = vst [vmem:[%s2330_s11 + $0x110] sm:$0xff] %v280_v34  ;;  %v408_v34 = vld [vmem:[%s2325_s10 + $0x910] sm:$0xff] }
  0x3a   : > { %283 = vst [vmem:[%s2330_s11 + $0x118] sm:$0xff] %v282_v35  ;;  %v410_v35 = vld [vmem:[%s2325_s10 + $0x918] sm:$0xff] }
  0x3b   : > { %285 = vst [vmem:[%s2330_s11 + $0x120] sm:$0xff] %v284_v36  ;;  %v412_v36 = vld [vmem:[%s2325_s10 + $0x920] sm:$0xff] }
  0x3c   : > { %287 = vst [vmem:[%s2330_s11 + $0x128] sm:$0xff] %v286_v37  ;;  %v414_v37 = vld [vmem:[%s2325_s10 + $0x928] sm:$0xff] }
  0x3d   : > { %289 = vst [vmem:[%s2330_s11 + $0x130] sm:$0xff] %v288_v38  ;;  %v416_v38 = vld [vmem:[%s2325_s10 + $0x930] sm:$0xff] }
  0x3e   : > { %291 = vst [vmem:[%s2330_s11 + $0x138] sm:$0xff] %v290_v39  ;;  %v418_v39 = vld [vmem:[%s2325_s10 + $0x938] sm:$0xff] }
  0x3f   : > { %293 = vst [vmem:[%s2330_s11 + $0x140] sm:$0xff] %v292_v40  ;;  %v420_v40 = vld [vmem:[%s2325_s10 + $0x940] sm:$0xff] }
  0x40   : > { %295 = vst [vmem:[%s2330_s11 + $0x148] sm:$0xff] %v294_v41  ;;  %v422_v41 = vld [vmem:[%s2325_s10 + $0x948] sm:$0xff] }
  0x41   : > { %297 = vst [vmem:[%s2330_s11 + $0x150] sm:$0xff] %v296_v42  ;;  %v424_v42 = vld [vmem:[%s2325_s10 + $0x950] sm:$0xff] }
  0x42   : > { %299 = vst [vmem:[%s2330_s11 + $0x158] sm:$0xff] %v298_v43  ;;  %v426_v43 = vld [vmem:[%s2325_s10 + $0x958] sm:$0xff] }
  0x43   : > { %301 = vst [vmem:[%s2330_s11 + $0x160] sm:$0xff] %v300_v44  ;;  %v428_v44 = vld [vmem:[%s2325_s10 + $0x960] sm:$0xff] }
  0x44   : > { %303 = vst [vmem:[%s2330_s11 + $0x168] sm:$0xff] %v302_v45  ;;  %v430_v45 = vld [vmem:[%s2325_s10 + $0x968] sm:$0xff] }
  0x45   : > { %305 = vst [vmem:[%s2330_s11 + $0x170] sm:$0xff] %v304_v46  ;;  %v432_v46 = vld [vmem:[%s2325_s10 + $0x970] sm:$0xff] }
  0x46   : > { %307 = vst [vmem:[%s2330_s11 + $0x178] sm:$0xff] %v306_v47  ;;  %v434_v47 = vld [vmem:[%s2325_s10 + $0x978] sm:$0xff] }
  0x47   : > { %309 = vst [vmem:[%s2330_s11 + $0x180] sm:$0xff] %v308_v48  ;;  %v436_v48 = vld [vmem:[%s2325_s10 + $0x980] sm:$0xff] }
  0x48   : > { %311 = vst [vmem:[%s2330_s11 + $0x188] sm:$0xff] %v310_v49  ;;  %v438_v49 = vld [vmem:[%s2325_s10 + $0x988] sm:$0xff] }
  0x49   : > { %313 = vst [vmem:[%s2330_s11 + $0x190] sm:$0xff] %v312_v50  ;;  %v440_v50 = vld [vmem:[%s2325_s10 + $0x990] sm:$0xff] }
  0x4a   : > { %315 = vst [vmem:[%s2330_s11 + $0x198] sm:$0xff] %v314_v51  ;;  %v442_v51 = vld [vmem:[%s2325_s10 + $0x998] sm:$0xff] }
  0x4b   : > { %317 = vst [vmem:[%s2330_s11 + $0x1a0] sm:$0xff] %v316_v52  ;;  %v444_v52 = vld [vmem:[%s2325_s10 + $0x9a0] sm:$0xff] }
  0x4c   : > { %319 = vst [vmem:[%s2330_s11 + $0x1a8] sm:$0xff] %v318_v53  ;;  %v446_v53 = vld [vmem:[%s2325_s10 + $0x9a8] sm:$0xff] }
  0x4d   : > { %321 = vst [vmem:[%s2330_s11 + $0x1b0] sm:$0xff] %v320_v54  ;;  %v448_v54 = vld [vmem:[%s2325_s10 + $0x9b0] sm:$0xff] }
  0x4e   : > { %323 = vst [vmem:[%s2330_s11 + $0x1b8] sm:$0xff] %v322_v55  ;;  %v450_v55 = vld [vmem:[%s2325_s10 + $0x9b8] sm:$0xff] }
  0x4f   : > { %325 = vst [vmem:[%s2330_s11 + $0x1c0] sm:$0xff] %v324_v56  ;;  %v452_v56 = vld [vmem:[%s2325_s10 + $0x9c0] sm:$0xff] }
  0x50   : > { %327 = vst [vmem:[%s2330_s11 + $0x1c8] sm:$0xff] %v326_v57  ;;  %v454_v57 = vld [vmem:[%s2325_s10 + $0x9c8] sm:$0xff] }
  0x51   : > { %329 = vst [vmem:[%s2330_s11 + $0x1d0] sm:$0xff] %v328_v58  ;;  %v456_v58 = vld [vmem:[%s2325_s10 + $0x9d0] sm:$0xff] }
  0x52   : > { %331 = vst [vmem:[%s2330_s11 + $0x1d8] sm:$0xff] %v330_v59  ;;  %v458_v59 = vld [vmem:[%s2325_s10 + $0x9d8] sm:$0xff] }
  0x53   : > { %333 = vst [vmem:[%s2330_s11 + $0x1e0] sm:$0xff] %v332_v60  ;;  %v460_v60 = vld [vmem:[%s2325_s10 + $0x9e0] sm:$0xff] }
  0x54   : > { %335 = vst [vmem:[%s2330_s11 + $0x1e8] sm:$0xff] %v334_v61  ;;  %v462_v61 = vld [vmem:[%s2325_s10 + $0x9e8] sm:$0xff] }
  0x55   : > { %337 = vst [vmem:[%s2330_s11 + $0x1f0] sm:$0xff] %v336_v62  ;;  %v464_v62 = vld [vmem:[%s2325_s10 + $0x9f0] sm:$0xff] }
  0x56   : > { %339 = vst [vmem:[%s2330_s11 + $0x1f8] sm:$0xff] %v338_v63  ;;  %v466_v63 = vld [vmem:[%s2325_s10 + $0x9f8] sm:$0xff] }
  0x57   : > { %341 = vst [vmem:[%s2330_s11 + $0x200] sm:$0xff] %v340_v0  ;;  %v468_v0 = vld [vmem:[%s2325_s10 + $0x1000] sm:$0xff] }
  0x58   : > { %343 = vst [vmem:[%s2330_s11 + $0x208] sm:$0xff] %v342_v1  ;;  %v470_v1 = vld [vmem:[%s2325_s10 + $0x1008] sm:$0xff] }
  0x59   : > { %345 = vst [vmem:[%s2330_s11 + $0x210] sm:$0xff] %v344_v2  ;;  %v472_v2 = vld [vmem:[%s2325_s10 + $0x1010] sm:$0xff] }
  0x5a   : > { %347 = vst [vmem:[%s2330_s11 + $0x218] sm:$0xff] %v346_v3  ;;  %v474_v3 = vld [vmem:[%s2325_s10 + $0x1018] sm:$0xff] }
  0x5b   : > { %349 = vst [vmem:[%s2330_s11 + $0x220] sm:$0xff] %v348_v4  ;;  %v476_v4 = vld [vmem:[%s2325_s10 + $0x1020] sm:$0xff] }
  0x5c   : > { %351 = vst [vmem:[%s2330_s11 + $0x228] sm:$0xff] %v350_v5  ;;  %v478_v5 = vld [vmem:[%s2325_s10 + $0x1028] sm:$0xff] }
  0x5d   : > { %353 = vst [vmem:[%s2330_s11 + $0x230] sm:$0xff] %v352_v6  ;;  %v480_v6 = vld [vmem:[%s2325_s10 + $0x1030] sm:$0xff] }
  0x5e   : > { %355 = vst [vmem:[%s2330_s11 + $0x238] sm:$0xff] %v354_v7  ;;  %v482_v7 = vld [vmem:[%s2325_s10 + $0x1038] sm:$0xff] }
  0x5f   : > { %357 = vst [vmem:[%s2330_s11 + $0x240] sm:$0xff] %v356_v8  ;;  %v484_v8 = vld [vmem:[%s2325_s10 + $0x1040] sm:$0xff] }
  0x60   : > { %359 = vst [vmem:[%s2330_s11 + $0x248] sm:$0xff] %v358_v9  ;;  %v486_v9 = vld [vmem:[%s2325_s10 + $0x1048] sm:$0xff] }
  0x61   : > { %361 = vst [vmem:[%s2330_s11 + $0x250] sm:$0xff] %v360_v10  ;;  %v488_v10 = vld [vmem:[%s2325_s10 + $0x1050] sm:$0xff] }
  0x62   : > { %363 = vst [vmem:[%s2330_s11 + $0x258] sm:$0xff] %v362_v11  ;;  %v490_v11 = vld [vmem:[%s2325_s10 + $0x1058] sm:$0xff] }
  0x63   : > { %365 = vst [vmem:[%s2330_s11 + $0x260] sm:$0xff] %v364_v12  ;;  %v492_v12 = vld [vmem:[%s2325_s10 + $0x1060] sm:$0xff] }
  0x64   : > { %367 = vst [vmem:[%s2330_s11 + $0x268] sm:$0xff] %v366_v13  ;;  %v494_v13 = vld [vmem:[%s2325_s10 + $0x1068] sm:$0xff] }
  0x65   : > { %369 = vst [vmem:[%s2330_s11 + $0x270] sm:$0xff] %v368_v14  ;;  %v496_v14 = vld [vmem:[%s2325_s10 + $0x1070] sm:$0xff] }
  0x66   : > { %371 = vst [vmem:[%s2330_s11 + $0x278] sm:$0xff] %v370_v15  ;;  %v498_v15 = vld [vmem:[%s2325_s10 + $0x1078] sm:$0xff] }
  0x67   : > { %373 = vst [vmem:[%s2330_s11 + $0x280] sm:$0xff] %v372_v16  ;;  %v500_v16 = vld [vmem:[%s2325_s10 + $0x1080] sm:$0xff] }
  0x68   : > { %375 = vst [vmem:[%s2330_s11 + $0x288] sm:$0xff] %v374_v17  ;;  %v502_v17 = vld [vmem:[%s2325_s10 + $0x1088] sm:$0xff] }
  0x69   : > { %377 = vst [vmem:[%s2330_s11 + $0x290] sm:$0xff] %v376_v18  ;;  %v504_v18 = vld [vmem:[%s2325_s10 + $0x1090] sm:$0xff] }
  0x6a   : > { %379 = vst [vmem:[%s2330_s11 + $0x298] sm:$0xff] %v378_v19  ;;  %v506_v19 = vld [vmem:[%s2325_s10 + $0x1098] sm:$0xff] }
  0x6b   : > { %381 = vst [vmem:[%s2330_s11 + $0x2a0] sm:$0xff] %v380_v20  ;;  %v508_v20 = vld [vmem:[%s2325_s10 + $0x10a0] sm:$0xff] }
  0x6c   : > { %383 = vst [vmem:[%s2330_s11 + $0x2a8] sm:$0xff] %v382_v21  ;;  %v510_v21 = vld [vmem:[%s2325_s10 + $0x10a8] sm:$0xff] }
  0x6d   : > { %385 = vst [vmem:[%s2330_s11 + $0x2b0] sm:$0xff] %v384_v22  ;;  %v512_v22 = vld [vmem:[%s2325_s10 + $0x10b0] sm:$0xff] }
  0x6e   : > { %387 = vst [vmem:[%s2330_s11 + $0x2b8] sm:$0xff] %v386_v23  ;;  %v514_v23 = vld [vmem:[%s2325_s10 + $0x10b8] sm:$0xff] }
  0x6f   : > { %389 = vst [vmem:[%s2330_s11 + $0x2c0] sm:$0xff] %v388_v24  ;;  %v516_v24 = vld [vmem:[%s2325_s10 + $0x10c0] sm:$0xff] }
  0x70   : > { %391 = vst [vmem:[%s2330_s11 + $0x2c8] sm:$0xff] %v390_v25  ;;  %v518_v25 = vld [vmem:[%s2325_s10 + $0x10c8] sm:$0xff] }
  0x71   : > { %393 = vst [vmem:[%s2330_s11 + $0x2d0] sm:$0xff] %v392_v26  ;;  %v520_v26 = vld [vmem:[%s2325_s10 + $0x10d0] sm:$0xff] }
  0x72   : > { %395 = vst [vmem:[%s2330_s11 + $0x2d8] sm:$0xff] %v394_v27  ;;  %v522_v27 = vld [vmem:[%s2325_s10 + $0x10d8] sm:$0xff] }
  0x73   : > { %397 = vst [vmem:[%s2330_s11 + $0x2e0] sm:$0xff] %v396_v28  ;;  %v524_v28 = vld [vmem:[%s2325_s10 + $0x10e0] sm:$0xff] }
  0x74   : > { %399 = vst [vmem:[%s2330_s11 + $0x2e8] sm:$0xff] %v398_v29  ;;  %v526_v29 = vld [vmem:[%s2325_s10 + $0x10e8] sm:$0xff] }
  0x75   : > { %401 = vst [vmem:[%s2330_s11 + $0x2f0] sm:$0xff] %v400_v30  ;;  %v528_v30 = vld [vmem:[%s2325_s10 + $0x10f0] sm:$0xff] }
  0x76   : > { %403 = vst [vmem:[%s2330_s11 + $0x2f8] sm:$0xff] %v402_v31  ;;  %v530_v31 = vld [vmem:[%s2325_s10 + $0x10f8] sm:$0xff] }
  0x77   : > { %405 = vst [vmem:[%s2330_s11 + $0x300] sm:$0xff] %v404_v32  ;;  %v532_v32 = vld [vmem:[%s2325_s10 + $0x1100] sm:$0xff] }
  0x78   : > { %407 = vst [vmem:[%s2330_s11 + $0x308] sm:$0xff] %v406_v33  ;;  %v534_v33 = vld [vmem:[%s2325_s10 + $0x1108] sm:$0xff] }
  0x79   : > { %409 = vst [vmem:[%s2330_s11 + $0x310] sm:$0xff] %v408_v34  ;;  %v536_v34 = vld [vmem:[%s2325_s10 + $0x1110] sm:$0xff] }
  0x7a   : > { %411 = vst [vmem:[%s2330_s11 + $0x318] sm:$0xff] %v410_v35  ;;  %v538_v35 = vld [vmem:[%s2325_s10 + $0x1118] sm:$0xff] }
  0x7b   : > { %413 = vst [vmem:[%s2330_s11 + $0x320] sm:$0xff] %v412_v36  ;;  %v540_v36 = vld [vmem:[%s2325_s10 + $0x1120] sm:$0xff] }
  0x7c   : > { %415 = vst [vmem:[%s2330_s11 + $0x328] sm:$0xff] %v414_v37  ;;  %v542_v37 = vld [vmem:[%s2325_s10 + $0x1128] sm:$0xff] }
  0x7d   : > { %417 = vst [vmem:[%s2330_s11 + $0x330] sm:$0xff] %v416_v38  ;;  %v544_v38 = vld [vmem:[%s2325_s10 + $0x1130] sm:$0xff] }
  0x7e   : > { %419 = vst [vmem:[%s2330_s11 + $0x338] sm:$0xff] %v418_v39  ;;  %v546_v39 = vld [vmem:[%s2325_s10 + $0x1138] sm:$0xff] }
  0x7f   : > { %421 = vst [vmem:[%s2330_s11 + $0x340] sm:$0xff] %v420_v40  ;;  %v548_v40 = vld [vmem:[%s2325_s10 + $0x1140] sm:$0xff] }
  0x80   : > { %423 = vst [vmem:[%s2330_s11 + $0x348] sm:$0xff] %v422_v41  ;;  %v550_v41 = vld [vmem:[%s2325_s10 + $0x1148] sm:$0xff] }
  0x81   : > { %425 = vst [vmem:[%s2330_s11 + $0x350] sm:$0xff] %v424_v42  ;;  %v552_v42 = vld [vmem:[%s2325_s10 + $0x1150] sm:$0xff] }
  0x82   : > { %427 = vst [vmem:[%s2330_s11 + $0x358] sm:$0xff] %v426_v43  ;;  %v554_v43 = vld [vmem:[%s2325_s10 + $0x1158] sm:$0xff] }
  0x83   : > { %429 = vst [vmem:[%s2330_s11 + $0x360] sm:$0xff] %v428_v44  ;;  %v556_v44 = vld [vmem:[%s2325_s10 + $0x1160] sm:$0xff] }
  0x84   : > { %431 = vst [vmem:[%s2330_s11 + $0x368] sm:$0xff] %v430_v45  ;;  %v558_v45 = vld [vmem:[%s2325_s10 + $0x1168] sm:$0xff] }
  0x85   : > { %433 = vst [vmem:[%s2330_s11 + $0x370] sm:$0xff] %v432_v46  ;;  %v560_v46 = vld [vmem:[%s2325_s10 + $0x1170] sm:$0xff] }
  0x86   : > { %435 = vst [vmem:[%s2330_s11 + $0x378] sm:$0xff] %v434_v47  ;;  %v562_v47 = vld [vmem:[%s2325_s10 + $0x1178] sm:$0xff] }
  0x87   : > { %437 = vst [vmem:[%s2330_s11 + $0x380] sm:$0xff] %v436_v48  ;;  %v564_v48 = vld [vmem:[%s2325_s10 + $0x1180] sm:$0xff] }
  0x88   : > { %439 = vst [vmem:[%s2330_s11 + $0x388] sm:$0xff] %v438_v49  ;;  %v566_v49 = vld [vmem:[%s2325_s10 + $0x1188] sm:$0xff] }
  0x89   : > { %441 = vst [vmem:[%s2330_s11 + $0x390] sm:$0xff] %v440_v50  ;;  %v568_v50 = vld [vmem:[%s2325_s10 + $0x1190] sm:$0xff] }
  0x8a   : > { %443 = vst [vmem:[%s2330_s11 + $0x398] sm:$0xff] %v442_v51  ;;  %v570_v51 = vld [vmem:[%s2325_s10 + $0x1198] sm:$0xff] }
  0x8b   : > { %445 = vst [vmem:[%s2330_s11 + $0x3a0] sm:$0xff] %v444_v52  ;;  %v572_v52 = vld [vmem:[%s2325_s10 + $0x11a0] sm:$0xff] }
  0x8c   : > { %447 = vst [vmem:[%s2330_s11 + $0x3a8] sm:$0xff] %v446_v53  ;;  %v574_v53 = vld [vmem:[%s2325_s10 + $0x11a8] sm:$0xff] }
  0x8d   : > { %449 = vst [vmem:[%s2330_s11 + $0x3b0] sm:$0xff] %v448_v54  ;;  %v576_v54 = vld [vmem:[%s2325_s10 + $0x11b0] sm:$0xff] }
  0x8e   : > { %451 = vst [vmem:[%s2330_s11 + $0x3b8] sm:$0xff] %v450_v55  ;;  %v578_v55 = vld [vmem:[%s2325_s10 + $0x11b8] sm:$0xff] }
  0x8f   : > { %453 = vst [vmem:[%s2330_s11 + $0x3c0] sm:$0xff] %v452_v56  ;;  %v580_v56 = vld [vmem:[%s2325_s10 + $0x11c0] sm:$0xff] }
  0x90   : > { %455 = vst [vmem:[%s2330_s11 + $0x3c8] sm:$0xff] %v454_v57  ;;  %v582_v57 = vld [vmem:[%s2325_s10 + $0x11c8] sm:$0xff] }
  0x91   : > { %457 = vst [vmem:[%s2330_s11 + $0x3d0] sm:$0xff] %v456_v58  ;;  %v584_v58 = vld [vmem:[%s2325_s10 + $0x11d0] sm:$0xff] }
  0x92   : > { %459 = vst [vmem:[%s2330_s11 + $0x3d8] sm:$0xff] %v458_v59  ;;  %v586_v59 = vld [vmem:[%s2325_s10 + $0x11d8] sm:$0xff] }
  0x93   : > { %461 = vst [vmem:[%s2330_s11 + $0x3e0] sm:$0xff] %v460_v60  ;;  %v588_v60 = vld [vmem:[%s2325_s10 + $0x11e0] sm:$0xff] }
  0x94   : > { %463 = vst [vmem:[%s2330_s11 + $0x3e8] sm:$0xff] %v462_v61  ;;  %v590_v61 = vld [vmem:[%s2325_s10 + $0x11e8] sm:$0xff] }
  0x95   : > { %465 = vst [vmem:[%s2330_s11 + $0x3f0] sm:$0xff] %v464_v62  ;;  %v592_v62 = vld [vmem:[%s2325_s10 + $0x11f0] sm:$0xff] }
  0x96   : > { %467 = vst [vmem:[%s2330_s11 + $0x3f8] sm:$0xff] %v466_v63  ;;  %v594_v63 = vld [vmem:[%s2325_s10 + $0x11f8] sm:$0xff] }
  0x97   : > { %469 = vst [vmem:[%s2330_s11 + $0x400] sm:$0xff] %v468_v0 }
  0x98   : > { %471 = vst [vmem:[%s2330_s11 + $0x408] sm:$0xff] %v470_v1 }
  0x99   : > { %473 = vst [vmem:[%s2330_s11 + $0x410] sm:$0xff] %v472_v2 }
  0x9a   : > { %475 = vst [vmem:[%s2330_s11 + $0x418] sm:$0xff] %v474_v3 }
  0x9b   : > { %477 = vst [vmem:[%s2330_s11 + $0x420] sm:$0xff] %v476_v4 }
  0x9c   : > { %479 = vst [vmem:[%s2330_s11 + $0x428] sm:$0xff] %v478_v5 }
  0x9d   : > { %481 = vst [vmem:[%s2330_s11 + $0x430] sm:$0xff] %v480_v6 }
  0x9e   : > { %483 = vst [vmem:[%s2330_s11 + $0x438] sm:$0xff] %v482_v7 }
  0x9f   : > { %485 = vst [vmem:[%s2330_s11 + $0x440] sm:$0xff] %v484_v8 }
  0xa0   : > { %487 = vst [vmem:[%s2330_s11 + $0x448] sm:$0xff] %v486_v9 }
  0xa1   : > { %489 = vst [vmem:[%s2330_s11 + $0x450] sm:$0xff] %v488_v10 }
  0xa2   : > { %491 = vst [vmem:[%s2330_s11 + $0x458] sm:$0xff] %v490_v11 }
  0xa3   : > { %493 = vst [vmem:[%s2330_s11 + $0x460] sm:$0xff] %v492_v12 }
  0xa4   : > { %495 = vst [vmem:[%s2330_s11 + $0x468] sm:$0xff] %v494_v13 }
  0xa5   : > { %497 = vst [vmem:[%s2330_s11 + $0x470] sm:$0xff] %v496_v14 }
  0xa6   : > { %499 = vst [vmem:[%s2330_s11 + $0x478] sm:$0xff] %v498_v15 }
  0xa7   : > { %501 = vst [vmem:[%s2330_s11 + $0x480] sm:$0xff] %v500_v16 }
  0xa8   : > { %503 = vst [vmem:[%s2330_s11 + $0x488] sm:$0xff] %v502_v17 }
  0xa9   : > { %505 = vst [vmem:[%s2330_s11 + $0x490] sm:$0xff] %v504_v18 }
  0xaa   : > { %507 = vst [vmem:[%s2330_s11 + $0x498] sm:$0xff] %v506_v19 }
  0xab   : > { %509 = vst [vmem:[%s2330_s11 + $0x4a0] sm:$0xff] %v508_v20 }
  0xac   : > { %511 = vst [vmem:[%s2330_s11 + $0x4a8] sm:$0xff] %v510_v21 }
  0xad   : > { %513 = vst [vmem:[%s2330_s11 + $0x4b0] sm:$0xff] %v512_v22 }
  0xae   : > { %515 = vst [vmem:[%s2330_s11 + $0x4b8] sm:$0xff] %v514_v23 }
  0xaf   : > { %517 = vst [vmem:[%s2330_s11 + $0x4c0] sm:$0xff] %v516_v24 }
  0xb0   : > { %519 = vst [vmem:[%s2330_s11 + $0x4c8] sm:$0xff] %v518_v25 }
  0xb1   : > { %521 = vst [vmem:[%s2330_s11 + $0x4d0] sm:$0xff] %v520_v26 }
  0xb2   : > { %523 = vst [vmem:[%s2330_s11 + $0x4d8] sm:$0xff] %v522_v27 }
  0xb3   : > { %525 = vst [vmem:[%s2330_s11 + $0x4e0] sm:$0xff] %v524_v28 }
  0xb4   : > { %527 = vst [vmem:[%s2330_s11 + $0x4e8] sm:$0xff] %v526_v29 }
  0xb5   : > { %529 = vst [vmem:[%s2330_s11 + $0x4f0] sm:$0xff] %v528_v30 }
  0xb6   : > { %531 = vst [vmem:[%s2330_s11 + $0x4f8] sm:$0xff] %v530_v31 }
  0xb7   : > { %533 = vst [vmem:[%s2330_s11 + $0x500] sm:$0xff] %v532_v32 }
  0xb8   : > { %535 = vst [vmem:[%s2330_s11 + $0x508] sm:$0xff] %v534_v33 }
  0xb9   : > { %537 = vst [vmem:[%s2330_s11 + $0x510] sm:$0xff] %v536_v34 }
  0xba   : > { %539 = vst [vmem:[%s2330_s11 + $0x518] sm:$0xff] %v538_v35 }
  0xbb   : > { %541 = vst [vmem:[%s2330_s11 + $0x520] sm:$0xff] %v540_v36 }
  0xbc   : > { %543 = vst [vmem:[%s2330_s11 + $0x528] sm:$0xff] %v542_v37 }
  0xbd   : > { %545 = vst [vmem:[%s2330_s11 + $0x530] sm:$0xff] %v544_v38 }
  0xbe   : > { %547 = vst [vmem:[%s2330_s11 + $0x538] sm:$0xff] %v546_v39 }
  0xbf   : > { %549 = vst [vmem:[%s2330_s11 + $0x540] sm:$0xff] %v548_v40 }
  0xc0   : > { %551 = vst [vmem:[%s2330_s11 + $0x548] sm:$0xff] %v550_v41 }
  0xc1   : > { %553 = vst [vmem:[%s2330_s11 + $0x550] sm:$0xff] %v552_v42 }
  0xc2   : > { %555 = vst [vmem:[%s2330_s11 + $0x558] sm:$0xff] %v554_v43 }
  0xc3   : > { %557 = vst [vmem:[%s2330_s11 + $0x560] sm:$0xff] %v556_v44 }
  0xc4   : > { %559 = vst [vmem:[%s2330_s11 + $0x568] sm:$0xff] %v558_v45 }
  0xc5   : > { %561 = vst [vmem:[%s2330_s11 + $0x570] sm:$0xff] %v560_v46 }
  0xc6   : > { %563 = vst [vmem:[%s2330_s11 + $0x578] sm:$0xff] %v562_v47 }
  0xc7   : > { %565 = vst [vmem:[%s2330_s11 + $0x580] sm:$0xff] %v564_v48 }
  0xc8   : > { %567 = vst [vmem:[%s2330_s11 + $0x588] sm:$0xff] %v566_v49 }
  0xc9   : > { %569 = vst [vmem:[%s2330_s11 + $0x590] sm:$0xff] %v568_v50 }
  0xca   : > { %571 = vst [vmem:[%s2330_s11 + $0x598] sm:$0xff] %v570_v51 }
  0xcb   : > { %573 = vst [vmem:[%s2330_s11 + $0x5a0] sm:$0xff] %v572_v52 }
  0xcc   : > { %575 = vst [vmem:[%s2330_s11 + $0x5a8] sm:$0xff] %v574_v53 }
  0xcd   : > { %577 = vst [vmem:[%s2330_s11 + $0x5b0] sm:$0xff] %v576_v54 }
  0xce   : > { %579 = vst [vmem:[%s2330_s11 + $0x5b8] sm:$0xff] %v578_v55 }
  0xcf   : > { %581 = vst [vmem:[%s2330_s11 + $0x5c0] sm:$0xff] %v580_v56 }
  0xd0   : > { %583 = vst [vmem:[%s2330_s11 + $0x5c8] sm:$0xff] %v582_v57 }
  0xd1   : > { %585 = vst [vmem:[%s2330_s11 + $0x5d0] sm:$0xff] %v584_v58 }
  0xd2   : > { %587 = vst [vmem:[%s2330_s11 + $0x5d8] sm:$0xff] %v586_v59 }
  0xd3   : > { %589 = vst [vmem:[%s2330_s11 + $0x5e0] sm:$0xff] %v588_v60 }
  0xd4   : > { %591 = vst [vmem:[%s2330_s11 + $0x5e8] sm:$0xff] %v590_v61 }
  0xd5   : > { %593 = vst [vmem:[%s2330_s11 + $0x5f0] sm:$0xff] %v592_v62 }
  0xd6   : > { %595 = vst [vmem:[%s2330_s11 + $0x5f8] sm:$0xff] %v594_v63 }
  0xd7 PF: > { %p1889_p10 = scmp.ge.s32.totalorder %s2231_s21, 1  ;;  %p610_p11 = scmp.lt.s32.totalorder %s2231_s21, 5 }
  0xd9   : > { %p611_p12 = pnand %p1889_p10, %p610_p11 }
  0xdb   : > { %614 = sbr.rel (%p611_p12) target bundleno = 564 (0x234), region = 55 }
  0xe0   : > { %s1891_s12 = sshll.u32 %s2293_s22, 3  ;;  %v665_v0 = vld [vmem:[%s3914_s3] sm:$0xff]  ;;  %s2720_s15 = sand.u32 1, %s2223_s19  }
  0xe1   : > { %1971 = vrcp.f32 %v665_v0  ;;  %p657_p13 = scmp.lt.s32.totalorder %s1891_s12, 31  ;;  %v675_v1 = vand.u32 2147483647, %v665_v0  ;;  %v677_v2 = vand.u32 2147483648, %v665_v0  ;;  %v776_v3 = vld [vmem:[%s3913_s2] sm:$0xff]  ;;  %vm671_vm0 = vweird.f32 %v665_v0  ;;  %s1890_s6 = sshll.u32 %s2720_s15, 9 }
  0xe2   : > { %v2725_v4 = vperm.slane %v776_v3, 0  ;;  %v2727_v5 = vperm.slane %v776_v3, 1  ;;  %v2729_v6 = vperm.slane %v776_v3, 2  ;;  %v2731_v7 = vperm.slane %v776_v3, 3  ;;  %s2804_s7 = scalar_lea.vmem [#allocation5], %s1890_s6  ;;  %s1911_s8 = smul.u32 1536, %s2720_s15 }
  0xe3   : > { %s4036_s12 = smov (!%p657_p13, %s1891_s12), 31  ;;  %vm2738_vm1 = vcmp.eq.f32.partialorder %v675_v1, 8.507059e+37  ;;  %v678_v10 = vor.u32 1.1754944e-38, %v677_v2  ;;  %v2742_v11 = vperm.slane %v776_v3, 4  ;;  %v2744_v12 = vperm.slane %v776_v3, 5  ;;  %s1708_s11 = scalar_lea.sflag [#allocation4], %s2720_s15 }
  0xe4   : > { %s1905_s23 = sshll.u32 %s4036_s12, 5  ;;  %v2749_v17 = vperm.slane %v776_v3, 6  ;;  %v2751_v18 = vperm.slane %v776_v3, 7  ;;  %s3127_s9 = scalar_lea.vmem [#allocation2], %s1911_s8 }
  0xe5   : > { %s2736_s30 = scalar_lea.vmem %s3912_s1, %s1905_s23  ;;  %s3162_s10 = scalar_lea.vmem [#allocation3], %s1911_s8 }
  0xe6   : > { %v680_v14 = vld [vmem:[%s2736_s30] sm:$0xff]  ;;  %v681_v15 = vld [vmem:[%s2736_s30 + $0x8] sm:$0xff]  ;;  %v682_v16 = vld [vmem:[%s2736_s30 + $0x10] sm:$0xff] }
  0xe7   : > { %v1972_v8 = vpop.eup %1971  ;;  %v712_v19 = vunpack.c.l.bf16 %v680_v14  ;;  %v713_v20 = vunpack.c.h.bf16 %v680_v14  ;;  %v714_v21 = vunpack.c.l.bf16 %v681_v15  ;;  %v715_v22 = vunpack.c.h.bf16 %v681_v15  ;;  %v683_v23 = vld [vmem:[%s2736_s30 + $0x18] sm:$0xff]  ;;  %v684_v36 = vld [vmem:[%s2736_s30 + $0x20] sm:$0xff]  ;;  %v685_v37 = vld [vmem:[%s2736_s30 + $0x28] sm:$0xff] }
  0xe8   : > { %v667_v13 = vmul.f32 %v1972_v8, %v665_v0  ;;  %vm672_vm2 = vweird.f32 %v1972_v8  ;;  %v716_v25 = vunpack.c.l.bf16 %v682_v16  ;;  %v717_v26 = vunpack.c.h.bf16 %v682_v16  ;;  %v686_v62 = vld [vmem:[%s2736_s30 + $0x30] sm:$0xff]  ;;  %v687_v16 = vld [vmem:[%s2736_s30 + $0x38] sm:$0xff] }
  0xe9   : > { %v718_v27 = vunpack.c.l.bf16 %v683_v23  ;;  %v794_v28 = vsub.f32 %v712_v19, %v2725_v4  ;;  %v795_v29 = vsub.f32 %v713_v20, %v2727_v5  ;;  %v796_v30 = vsub.f32 %v714_v21, %v2729_v6  ;;  %vm2765_vm3 = vmor %vm671_vm0, %vm672_vm2 }
  0xea   : > { %v668_v24 = vsub.f32 1.0, %v667_v13  ;;  %v797_v31 = vsub.f32 %v715_v22, %v2731_v7  ;;  %v798_v33 = vsub.f32 %v716_v25, %v2742_v11  ;;  %v799_v34 = vsub.f32 %v717_v26, %v2744_v12 }
  0xeb   : > { %v800_v35 = vsub.f32 %v718_v27, %v2749_v17  ;;  %v858_v39 = vmul.f32 1.442695, %v794_v28  ;;  %v860_v40 = vmul.f32 1.442695, %v795_v29  ;;  %v862_v41 = vmul.f32 1.442695, %v796_v30 }
  0xec   : > { %v669_v32 = vmul.f32 %v1972_v8, %v668_v24  ;;  %v719_v42 = vunpack.c.h.bf16 %v683_v23  ;;  %v864_v44 = vmul.f32 1.442695, %v797_v31  ;;  %v866_v45 = vmul.f32 1.442695, %v798_v33 }
  0xed   : > { %v868_v46 = vmul.f32 1.442695, %v799_v34  ;;  %1973 = vpow2.f32 %v858_v39  ;;  %v870_v47 = vmul.f32 1.442695, %v800_v35  ;;  %v720_v49 = vunpack.c.l.bf16 %v684_v36 }
  0xee   : > { %v670_v43 = vadd.f32 %v1972_v8, %v669_v32  ;;  %v801_v48 = vsub.f32 %v719_v42, %v2751_v18  ;;  %1975 = vpow2.f32 %v860_v40  ;;  %v721_v51 = vunpack.c.h.bf16 %v684_v36  ;;  %v688_v32 = vld [vmem:[%s2736_s30 + $0x40] sm:$0xff] }
  0xef   : > { %v722_v52 = vunpack.c.l.bf16 %v685_v37  ;;  %1977 = vpow2.f32 %v862_v41  ;;  %v802_v55 = vsub.f32 %v720_v49, %v2725_v4  ;;  %v723_v9 = vunpack.c.h.bf16 %v685_v37 }
  0xf0   : > { %v674_v50 = vsel %vm2765_vm3, %v1972_v8, %v670_v43  ;;  %v872_v54 = vmul.f32 1.442695, %v801_v48  ;;  %1979 = vpow2.f32 %v864_v44  ;;  %v803_v3 = vsub.f32 %v721_v51, %v2727_v5 }
  0xf1   : > { %v679_v53 = vsel %vm2738_vm1, %v678_v10, %v674_v50  ;;  %1981 = vpow2.f32 %v866_v45  ;;  %v874_v1 = vmul.f32 1.442695, %v802_v55  ;;  %v804_v8 = vsub.f32 %v722_v52, %v2729_v6 }
  0xf2   : > { %v2776_v56 = vperm.slane %v679_v53, 0  ;;  %v2778_v57 = vperm.slane %v679_v53, 1  ;;  %v2780_v58 = vperm.slane %v679_v53, 2  ;;  %v2782_v59 = vperm.slane %v679_v53, 3 }
  0xf3   : > { %v2784_v60 = vperm.slane %v679_v53, 4  ;;  %v2786_v61 = vperm.slane %v679_v53, 5  ;;  %1983 = vpow2.f32 %v868_v46  ;;  %v2789_v63 = vperm.slane %v679_v53, 6  ;;  %v1974_v2 = vpop.eup %1973  ;;  %v689_v46 = vld [vmem:[%s2736_s30 + $0x48] sm:$0xff] }
  0xf4   : > { %v2791_v0 = vperm.slane %v679_v53, 7  ;;  %1985 = vpow2.f32 %v870_v47  ;;  %v1976_v10 = vpop.eup %1975  ;;  %v2796_v13 = vmul.f32 %v1974_v2, %v2776_v56  ;;  %v724_v14 = vunpack.c.l.bf16 %v686_v62  ;;  %v690_v47 = vld [vmem:[%s2736_s30 + $0x50] sm:$0xff] }
  0xf5   : > { %1987 = vpow2.f32 %v872_v54  ;;  %v725_v15 = vunpack.c.h.bf16 %v686_v62  ;;  %v1978_v19 = vpop.eup %1977  ;;  %v2800_v20 = vmul.f32 %v1976_v10, %v2778_v57  ;;  %v876_v21 = vmul.f32 1.442695, %v803_v3  ;;  %v691_v3 = vld [vmem:[%s2736_s30 + $0x58] sm:$0xff] }
  0xf6   : > { %1989 = vpow2.f32 %v874_v1  ;;  %v878_v22 = vmul.f32 1.442695, %v804_v8  ;;  %v1980_v23 = vpop.eup %1979  ;;  %1067 = vst [vmem:[%s2804_s7] sm:$0xff] %v2796_v13  ;;  %v2809_v24 = vmul.f32 %v1978_v19, %v2780_v58  ;;  %v805_v25 = vsub.f32 %v723_v9, %v2731_v7 }
  0xf7   : > { %v806_v26 = vsub.f32 %v724_v14, %v2742_v11  ;;  %v807_v27 = vsub.f32 %v725_v15, %v2744_v12  ;;  %v1982_v28 = vpop.eup %1981  ;;  %1068 = vst [vmem:[%s2804_s7 + $0x8] sm:$0xff] %v2800_v20  ;;  %v2817_v29 = vmul.f32 %v1980_v23, %v2782_v59  ;;  %1991 = vpow2.f32 %v876_v21 }
  0xf8   : > { %v726_v30 = vunpack.c.l.bf16 %v687_v16  ;;  %v727_v31 = vunpack.c.h.bf16 %v687_v16  ;;  %1069 = vst [vmem:[%s2804_s7 + $0x10] sm:$0xff] %v2809_v24  ;;  %v2823_v34 = vmul.f32 %v1982_v28, %v2784_v60  ;;  %1993 = vpow2.f32 %v878_v22 }
  0xf9   : > { %v1984_v33 = vpop.eup %1983  ;;  %v880_v35 = vmul.f32 1.442695, %v805_v25  ;;  %v882_v36 = vmul.f32 1.442695, %v806_v26  ;;  %1070 = vst [vmem:[%s2804_s7 + $0x18] sm:$0xff] %v2817_v29  ;;  %v728_v44 = vunpack.c.l.bf16 %v688_v32  ;;  %v729_v45 = vunpack.c.h.bf16 %v688_v32 }
  0xfa   : > { %v1986_v37 = vpop.eup %1985  ;;  %v2828_v38 = vmul.f32 %v1984_v33, %v2786_v61  ;;  %v884_v39 = vmul.f32 1.442695, %v807_v27  ;;  %v808_v40 = vsub.f32 %v726_v30, %v2749_v17  ;;  %v809_v41 = vsub.f32 %v727_v31, %v2751_v18  ;;  %1071 = vst [vmem:[%s2804_s7 + $0x20] sm:$0xff] %v2823_v34  ;;  %v692_v27 = vld [vmem:[%s2736_s30 + $0x60] sm:$0xff] }
  0xfb   : > { %v1988_v42 = vpop.eup %1987  ;;  %v2835_v43 = vmul.f32 %v1986_v37, %v2789_v63  ;;  %1995 = vpow2.f32 %v880_v35  ;;  %v810_v53 = vsub.f32 %v728_v44, %v2725_v4  ;;  %v811_v54 = vsub.f32 %v729_v45, %v2727_v5  ;;  %v693_v45 = vld [vmem:[%s2736_s30 + $0x68] sm:$0xff] }
  0xfc   : > { %v1990_v48 = vpop.eup %1989  ;;  %1072 = vst [vmem:[%s2804_s7 + $0x28] sm:$0xff] %v2828_v38  ;;  %v2842_v49 = vmul.f32 %v1988_v42, %v2791_v0  ;;  %1997 = vpow2.f32 %v882_v36  ;;  %v886_v50 = vmul.f32 1.442695, %v808_v40  ;;  %v888_v51 = vmul.f32 1.442695, %v809_v41 }
  0xfd   : > { %1073 = vst [vmem:[%s2804_s7 + $0x30] sm:$0xff] %v2835_v43  ;;  %v2847_v52 = vmul.f32 %v1990_v48, %v2776_v56  ;;  %1999 = vpow2.f32 %v884_v39  ;;  %v1992_v55 = vpop.eup %1991  ;;  %v730_v62 = vunpack.c.l.bf16 %v689_v46  ;;  %v731_v1 = vunpack.c.h.bf16 %v689_v46 }
  0xfe   : > { %1074 = vst [vmem:[%s2804_s7 + $0x38] sm:$0xff] %v2842_v49  ;;  %2001 = vpow2.f32 %v886_v50  ;;  %v732_v2 = vunpack.c.l.bf16 %v690_v47  ;;  %v1994_v8 = vpop.eup %1993  ;;  %v2857_v9 = vmul.f32 %v1992_v55, %v2778_v57  ;;  %v890_v10 = vmul.f32 1.442695, %v810_v53 }
  0xff   : > { %1075 = vst [vmem:[%s2804_s7 + $0x40] sm:$0xff] %v2847_v52  ;;  %2003 = vpow2.f32 %v888_v51  ;;  %v892_v14 = vmul.f32 1.442695, %v811_v54  ;;  %v2860_v15 = vmul.f32 %v1994_v8, %v2780_v58  ;;  %v812_v16 = vsub.f32 %v730_v62, %v2729_v6  ;;  %v694_v51 = vld [vmem:[%s2736_s30 + $0x70] sm:$0xff] }
 0x100   : > { %v813_v19 = vsub.f32 %v731_v1, %v2731_v7  ;;  %v814_v21 = vsub.f32 %v732_v2, %v2742_v11  ;;  %1076 = vst [vmem:[%s2804_s7 + $0x48] sm:$0xff] %v2857_v9  ;;  %2005 = vpow2.f32 %v890_v10  ;;  %v733_v23 = vunpack.c.h.bf16 %v690_v47 }
 0x101   : > { %v1996_v22 = vpop.eup %1995  ;;  %v734_v25 = vunpack.c.l.bf16 %v691_v3  ;;  %v735_v26 = vunpack.c.h.bf16 %v691_v3  ;;  %1077 = vst [vmem:[%s2804_s7 + $0x50] sm:$0xff] %v2860_v15  ;;  %2007 = vpow2.f32 %v892_v14  ;;  %v894_v31 = vmul.f32 1.442695, %v812_v16 }
 0x102   : > { %v1998_v28 = vpop.eup %1997  ;;  %v2871_v30 = vmul.f32 %v1996_v22, %v2782_v59  ;;  %v896_v32 = vmul.f32 1.442695, %v813_v19  ;;  %v898_v36 = vmul.f32 1.442695, %v814_v21  ;;  %v815_v37 = vsub.f32 %v733_v23, %v2744_v12  ;;  %v695_v19 = vld [vmem:[%s2736_s30 + $0x78] sm:$0xff] }
 0x103   : > { %v2000_v33 = vpop.eup %1999  ;;  %v2874_v35 = vmul.f32 %v1998_v28, %v2784_v60  ;;  %v816_v39 = vsub.f32 %v734_v25, %v2749_v17  ;;  %2009 = vpow2.f32 %v894_v31  ;;  %v817_v42 = vsub.f32 %v735_v26, %v2751_v18 }
 0x104   : > { %v2002_v40 = vpop.eup %2001  ;;  %1078 = vst [vmem:[%s2804_s7 + $0x58] sm:$0xff] %v2871_v30  ;;  %v2881_v41 = vmul.f32 %v2000_v33, %v2786_v61  ;;  %v736_v44 = vunpack.c.l.bf16 %v692_v27  ;;  %2011 = vpow2.f32 %v896_v32  ;;  %v900_v48 = vmul.f32 1.442695, %v815_v37 }
 0x105   : > { %v2004_v46 = vpop.eup %2003  ;;  %1079 = vst [vmem:[%s2804_s7 + $0x60] sm:$0xff] %v2874_v35  ;;  %v2888_v47 = vmul.f32 %v2002_v40, %v2789_v63  ;;  %v902_v50 = vmul.f32 1.442695, %v816_v39  ;;  %2013 = vpow2.f32 %v898_v36  ;;  %v904_v54 = vmul.f32 1.442695, %v817_v42  ;;  %v696_v39 = vld [vmem:[%s2736_s30 + $0x80] sm:$0xff] }
 0x106   : > { %1080 = vst [vmem:[%s2804_s7 + $0x68] sm:$0xff] %v2881_v41  ;;  %v2894_v53 = vmul.f32 %v2004_v46, %v2791_v0  ;;  %v818_v55 = vsub.f32 %v736_v44, %v2725_v4  ;;  %v2006_v62 = vpop.eup %2005  ;;  %2015 = vpow2.f32 %v900_v48  ;;  %v737_v1 = vunpack.c.h.bf16 %v692_v27 }
 0x107   : > { %1081 = vst [vmem:[%s2804_s7 + $0x70] sm:$0xff] %v2888_v47  ;;  %v738_v2 = vunpack.c.l.bf16 %v693_v45  ;;  %v739_v3 = vunpack.c.h.bf16 %v693_v45  ;;  %v2008_v8 = vpop.eup %2007  ;;  %v2902_v10 = vmul.f32 %v2006_v62, %v2776_v56  ;;  %2017 = vpow2.f32 %v902_v50 }
 0x108   : > { %1082 = vst [vmem:[%s2804_s7 + $0x78] sm:$0xff] %v2894_v53  ;;  %v906_v14 = vmul.f32 1.442695, %v818_v55  ;;  %v740_v16 = vunpack.c.l.bf16 %v694_v51  ;;  %v2906_v21 = vmul.f32 %v2008_v8, %v2778_v57  ;;  %2019 = vpow2.f32 %v904_v54 }
 0x109   : > { %v819_v22 = vsub.f32 %v737_v1, %v2727_v5  ;;  %v820_v23 = vsub.f32 %v738_v2, %v2729_v6  ;;  %v2010_v25 = vpop.eup %2009  ;;  %1083 = vst [vmem:[%s2804_s7 + $0x80] sm:$0xff] %v2902_v10  ;;  %v821_v26 = vsub.f32 %v739_v3, %v2731_v7  ;;  %v741_v28 = vunpack.c.h.bf16 %v694_v51  ;;  %v697_v3 = vld [vmem:[%s2736_s30 + $0x88] sm:$0xff] }
 0x10a   : > { %2021 = vpow2.f32 %v906_v14  ;;  %v822_v27 = vsub.f32 %v740_v16, %v2742_v11  ;;  %v2012_v31 = vpop.eup %2011  ;;  %1084 = vst [vmem:[%s2804_s7 + $0x88] sm:$0xff] %v2906_v21  ;;  %v2917_v32 = vmul.f32 %v2010_v25, %v2780_v58  ;;  %v742_v37 = vunpack.c.l.bf16 %v695_v19 }
 0x10b   : > { %v908_v33 = vmul.f32 1.442695, %v819_v22  ;;  %v910_v36 = vmul.f32 1.442695, %v820_v23  ;;  %v2014_v40 = vpop.eup %2013  ;;  %v2921_v42 = vmul.f32 %v2012_v31, %v2782_v59  ;;  %v912_v44 = vmul.f32 1.442695, %v821_v26 }
 0x10c   : > { %v914_v45 = vmul.f32 1.442695, %v822_v27  ;;  %v823_v46 = vsub.f32 %v741_v28, %v2744_v12  ;;  %v2016_v48 = vpop.eup %2015  ;;  %1085 = vst [vmem:[%s2804_s7 + $0x90] sm:$0xff] %v2917_v32  ;;  %v2927_v50 = vmul.f32 %v2014_v40, %v2784_v60  ;;  %v824_v51 = vsub.f32 %v742_v37, %v2749_v17  ;;  %v698_v27 = vld [vmem:[%s2736_s30 + $0x90] sm:$0xff] }
 0x10d   : > { %2023 = vpow2.f32 %v908_v33  ;;  %v743_v54 = vunpack.c.h.bf16 %v695_v19  ;;  %v2018_v55 = vpop.eup %2017  ;;  %1086 = vst [vmem:[%s2804_s7 + $0x98] sm:$0xff] %v2921_v42  ;;  %v2933_v62 = vmul.f32 %v2016_v48, %v2786_v61  ;;  %v744_v2 = vunpack.c.l.bf16 %v696_v39  ;;  %v699_v48 = vld [vmem:[%s2736_s30 + $0x98] sm:$0xff] }
 0x10e   : > { %2025 = vpow2.f32 %v910_v36  ;;  %v916_v1 = vmul.f32 1.442695, %v823_v46  ;;  %v2020_v8 = vpop.eup %2019  ;;  %1087 = vst [vmem:[%s2804_s7 + $0xa0] sm:$0xff] %v2927_v50  ;;  %v2939_v14 = vmul.f32 %v2018_v55, %v2789_v63  ;;  %v918_v16 = vmul.f32 1.442695, %v824_v51 }
 0x10f   : > { %2027 = vpow2.f32 %v912_v44  ;;  %v825_v19 = vsub.f32 %v743_v54, %v2751_v18  ;;  %1088 = vst [vmem:[%s2804_s7 + $0xa8] sm:$0xff] %v2933_v62  ;;  %v2945_v23 = vmul.f32 %v2020_v8, %v2791_v0  ;;  %v826_v25 = vsub.f32 %v744_v2, %v2725_v4 }
 0x110   : > { %v2022_v22 = vpop.eup %2021  ;;  %2029 = vpow2.f32 %v914_v45  ;;  %v745_v26 = vunpack.c.h.bf16 %v696_v39  ;;  %1089 = vst [vmem:[%s2804_s7 + $0xb0] sm:$0xff] %v2939_v14  ;;  %v746_v33 = vunpack.c.l.bf16 %v697_v3  ;;  %v747_v40 = vunpack.c.h.bf16 %v697_v3 }
 0x111   : > { %v2952_v28 = vmul.f32 %v2022_v22, %v2776_v56  ;;  %2031 = vpow2.f32 %v916_v1  ;;  %v920_v31 = vmul.f32 1.442695, %v825_v19  ;;  %1090 = vst [vmem:[%s2804_s7 + $0xb8] sm:$0xff] %v2945_v23  ;;  %v922_v36 = vmul.f32 1.442695, %v826_v25 }
 0x112   : > { %2033 = vpow2.f32 %v918_v16  ;;  %v827_v37 = vsub.f32 %v745_v26, %v2727_v5  ;;  %v828_v39 = vsub.f32 %v746_v33, %v2729_v6  ;;  %v748_v45 = vunpack.c.l.bf16 %v698_v27 }
 0x113   : > { %v2024_v44 = vpop.eup %2023  ;;  %1091 = vst [vmem:[%s2804_s7 + $0xc0] sm:$0xff] %v2952_v28  ;;  %2035 = vpow2.f32 %v920_v31  ;;  %v749_v46 = vunpack.c.h.bf16 %v698_v27  ;;  %v829_v1 = vsub.f32 %v747_v40, %v2731_v7  ;;  %v750_v27 = vunpack.c.l.bf16 %v699_v48  ;;  %v700_v31 = vld [vmem:[%s2736_s30 + $0xa0] sm:$0xff] }
 0x114   : > { %v2026_v51 = vpop.eup %2025  ;;  %v2962_v54 = vmul.f32 %v2024_v44, %v2778_v57  ;;  %2037 = vpow2.f32 %v922_v36  ;;  %v924_v55 = vmul.f32 1.442695, %v827_v37  ;;  %v926_v8 = vmul.f32 1.442695, %v828_v39 }
 0x115   : > { %v2028_v2 = vpop.eup %2027  ;;  %v2966_v3 = vmul.f32 %v2026_v51, %v2780_v58  ;;  %v830_v16 = vsub.f32 %v748_v45, %v2742_v11  ;;  %v831_v19 = vsub.f32 %v749_v46, %v2744_v12  ;;  %v928_v26 = vmul.f32 1.442695, %v829_v1  ;;  %v701_v51 = vld [vmem:[%s2736_s30 + $0xa8] sm:$0xff] }
 0x116   : > { %v2030_v22 = vpop.eup %2029  ;;  %1092 = vst [vmem:[%s2804_s7 + $0xc8] sm:$0xff] %v2962_v54  ;;  %v2973_v25 = vmul.f32 %v2028_v2, %v2782_v59  ;;  %2039 = vpow2.f32 %v924_v55  ;;  %v832_v45 = vsub.f32 %v750_v27, %v2749_v17  ;;  %v751_v46 = vunpack.c.h.bf16 %v699_v48 }
 0x117   : > { %v2032_v33 = vpop.eup %2031  ;;  %1093 = vst [vmem:[%s2804_s7 + $0xd0] sm:$0xff] %v2966_v3  ;;  %v2979_v36 = vmul.f32 %v2030_v22, %v2784_v60  ;;  %2041 = vpow2.f32 %v926_v8  ;;  %v930_v37 = vmul.f32 1.442695, %v830_v16  ;;  %v932_v40 = vmul.f32 1.442695, %v831_v19  ;;  %v702_v16 = vld [vmem:[%s2736_s30 + $0xb0] sm:$0xff] }
 0x118   : > { %v2034_v44 = vpop.eup %2033  ;;  %1094 = vst [vmem:[%s2804_s7 + $0xd8] sm:$0xff] %v2973_v25  ;;  %v2984_v39 = vmul.f32 %v2032_v33, %v2786_v61  ;;  %2043 = vpow2.f32 %v928_v26  ;;  %v752_v2 = vunpack.c.l.bf16 %v700_v31  ;;  %v753_v8 = vunpack.c.h.bf16 %v700_v31 }
 0x119   : > { %3970 = vst [vmem:[#allocation11_spill] sm:$0xff] %v2979_v36  ;;  %v2036_v55 = vpop.eup %2035  ;;  %v2991_v1 = vmul.f32 %v2034_v44, %v2789_v63  ;;  %2045 = vpow2.f32 %v930_v37  ;;  %v934_v48 = vmul.f32 1.442695, %v832_v45  ;;  %v833_v26 = vsub.f32 %v751_v46, %v2751_v18 }
 0x11a   : > { %3971 = vst [vmem:[#allocation12_spill] sm:$0xff] %v2984_v39  ;;  %v2038_v19 = vpop.eup %2037  ;;  %v2997_v22 = vmul.f32 %v2036_v55, %v2791_v0  ;;  %2047 = vpow2.f32 %v932_v40  ;;  %v834_v33 = vsub.f32 %v752_v2, %v2725_v4  ;;  %v835_v31 = vsub.f32 %v753_v8, %v2727_v5 }
 0x11b   : > { %1095 = vst [vmem:[%s2804_s7 + $0xe0] sm:$0xff] %v2979_v36  ;;  %v3003_v27 = vmul.f32 %v2038_v19, %v2776_v56  ;;  %v754_v37 = vunpack.c.l.bf16 %v701_v51  ;;  %2049 = vpow2.f32 %v934_v48  ;;  %v936_v55 = vmul.f32 1.442695, %v833_v26  ;;  %v703_v26 = vld [vmem:[%s2736_s30 + $0xb8] sm:$0xff] }
 0x11c   : > { %3972 = vst [vmem:[#allocation13_spill] sm:$0xff] %v2991_v1  ;;  %v2040_v44 = vpop.eup %2039  ;;  %v755_v40 = vunpack.c.h.bf16 %v701_v51  ;;  %v756_v45 = vunpack.c.l.bf16 %v702_v16  ;;  %v938_v2 = vmul.f32 1.442695, %v834_v33 }
 0x11d   : > { %1096 = vst [vmem:[%s2804_s7 + $0xe8] sm:$0xff] %v2984_v39  ;;  %v2042_v46 = vpop.eup %2041  ;;  %v3012_v19 = vmul.f32 %v2040_v44, %v2778_v57  ;;  %v836_v8 = vsub.f32 %v754_v37, %v2729_v6  ;;  %2051 = vpow2.f32 %v936_v55  ;;  %v757_v37 = vunpack.c.h.bf16 %v702_v16  ;;  %v704_v44 = vld [vmem:[%s2736_s30 + $0xc0] sm:$0xff] }
 0x11e   : > { %3973 = vst [vmem:[#allocation14_spill] sm:$0xff] %v2997_v22  ;;  %v2044_v39 = vpop.eup %2043  ;;  %v837_v51 = vsub.f32 %v755_v40, %v2731_v7  ;;  %v838_v48 = vsub.f32 %v756_v45, %v2742_v11  ;;  %2053 = vpow2.f32 %v938_v2  ;;  %v758_v16 = vunpack.c.l.bf16 %v703_v26 }
 0x11f   : > { %1097 = vst [vmem:[%s2804_s7 + $0xf0] sm:$0xff] %v2991_v1  ;;  %v940_v1 = vmul.f32 1.442695, %v835_v31  ;;  %v3024_v33 = vmul.f32 %v2044_v39, %v2782_v59  ;;  %v942_v31 = vmul.f32 1.442695, %v836_v8  ;;  %v839_v2 = vsub.f32 %v757_v37, %v2744_v12  ;;  %v705_v8 = vld [vmem:[%s2736_s30 + $0xc8] sm:$0xff] }
 0x120   : > { %3974 = vst [vmem:[#allocation15_spill] sm:$0xff] %v3003_v27  ;;  %v944_v40 = vmul.f32 1.442695, %v837_v51  ;;  %v946_v45 = vmul.f32 1.442695, %v838_v48 }
 0x121   : > { %1098 = vst [vmem:[%s2804_s7 + $0xf8] sm:$0xff] %v2997_v22  ;;  %v3016_v22 = vmul.f32 %v2042_v46, %v2780_v58  ;;  %2055 = vpow2.f32 %v940_v1  ;;  %v761_v1 = vunpack.c.h.bf16 %v704_v44  ;;  %v948_v48 = vmul.f32 1.442695, %v839_v2  ;;  %v706_v2 = vld [vmem:[%s2736_s30 + $0xd0] sm:$0xff] }
 0x122   : > { %1099 = vst [vmem:[%s2804_s7 + $0x100] sm:$0xff] %v3003_v27  ;;  %v2046_v27 = vpop.eup %2045  ;;  %2057 = vpow2.f32 %v942_v31  ;;  %v840_v31 = vsub.f32 %v758_v16, %v2749_v17 }
 0x123   : > { %3975 = vst [vmem:[#allocation16_spill] sm:$0xff] %v3012_v19  ;;  %v2048_v46 = vpop.eup %2047  ;;  %v3030_v55 = vmul.f32 %v2046_v27, %v2784_v60  ;;  %2059 = vpow2.f32 %v944_v40  ;;  %v759_v27 = vunpack.c.h.bf16 %v703_v26  ;;  %v843_v26 = vsub.f32 %v761_v1, %v2727_v5 }
 0x124   : > { %3976 = vst [vmem:[#allocation17_spill] sm:$0xff] %v3016_v22  ;;  %v3035_v39 = vmul.f32 %v2048_v46, %v2786_v61  ;;  %2061 = vpow2.f32 %v946_v45  ;;  %v762_v40 = vunpack.c.l.bf16 %v705_v8  ;;  %v763_v45 = vunpack.c.h.bf16 %v705_v8 }
 0x125   : > { %1100 = vst [vmem:[%s2804_s7 + $0x108] sm:$0xff] %v3012_v19  ;;  %v2050_v19 = vpop.eup %2049  ;;  %v841_v46 = vsub.f32 %v759_v27, %v2751_v18  ;;  %2063 = vpow2.f32 %v948_v48 }
 0x126   : > { %3977 = vst [vmem:[#allocation18_spill] sm:$0xff] %v3024_v33  ;;  %v3044_v51 = vmul.f32 %v2050_v19, %v2789_v63  ;;  %v2052_v37 = vpop.eup %2051  ;;  %v950_v19 = vmul.f32 1.442695, %v840_v31  ;;  %v844_v8 = vsub.f32 %v762_v40, %v2729_v6  ;;  %v845_v48 = vsub.f32 %v763_v45, %v2731_v7 }
 0x127   : > { %1101 = vst [vmem:[%s2804_s7 + $0x110] sm:$0xff] %v3016_v22  ;;  %v760_v22 = vunpack.c.l.bf16 %v704_v44  ;;  %v2054_v44 = vpop.eup %2053 }
 0x128   : > { %3978 = vst [vmem:[#allocation19_spill] sm:$0xff] %v3030_v55  ;;  %v2056_v16 = vpop.eup %2055  ;;  %v3057_v27 = vmul.f32 %v2054_v44, %v2776_v56  ;;  %2065 = vpow2.f32 %v950_v19  ;;  %v707_v44 = vld [vmem:[%s2736_s30 + $0xd8] sm:$0xff]  ;;  %v958_v19 = vmul.f32 1.442695, %v844_v8  ;;  %v960_v45 = vmul.f32 1.442695, %v845_v48 }
 0x129   : > { %1102 = vst [vmem:[%s2804_s7 + $0x118] sm:$0xff] %v3024_v33  ;;  %v956_v33 = vmul.f32 1.442695, %v843_v26  ;;  %v2058_v36 = vpop.eup %2057  ;;  %v765_v26 = vunpack.c.h.bf16 %v706_v2  ;;  %v709_v48 = vld [vmem:[%s2736_s30 + $0xe8] sm:$0xff] }
 0x12a   : > { %3979 = vst [vmem:[#allocation20_spill] sm:$0xff] %v3035_v39  ;;  %v2060_v31 = vpop.eup %2059 }
 0x12b   : > { %1103 = vst [vmem:[%s2804_s7 + $0x120] sm:$0xff] %v3030_v55  ;;  %v842_v55 = vsub.f32 %v760_v22, %v2725_v4  ;;  %v952_v22 = vmul.f32 1.442695, %v841_v46  ;;  %v3069_v46 = vmul.f32 %v2058_v36, %v2780_v58  ;;  %v3076_v40 = vmul.f32 %v2060_v31, %v2782_v59 }
 0x12c   : > { %1104 = vst [vmem:[%s2804_s7 + $0x128] sm:$0xff] %v3035_v39  ;;  %v3053_v39 = vmul.f32 %v2052_v37, %v2791_v0  ;;  %v3062_v37 = vmul.f32 %v2056_v16, %v2778_v57  ;;  %v708_v16 = vld [vmem:[%s2736_s30 + $0xe0] sm:$0xff]  ;;  %v767_v31 = vunpack.c.h.bf16 %v707_v44 }
 0x12d   : > { %1105 = vst [vmem:[%s2804_s7 + $0x130] sm:$0xff] %v3044_v51  ;;  %v954_v1 = vmul.f32 1.442695, %v842_v55  ;;  %2067 = vpow2.f32 %v952_v22  ;;  %v764_v55 = vunpack.c.l.bf16 %v706_v2  ;;  %v847_v22 = vsub.f32 %v765_v26, %v2744_v12 }
 0x12e   : > { %3980 = vst [vmem:[#allocation21_spill] sm:$0xff] %v3053_v39  ;;  %v768_v8 = vunpack.c.l.bf16 %v708_v16 }
 0x12f   : > { %3981 = vst [vmem:[#allocation22_spill] sm:$0xff] %v3057_v27  ;;  %2069 = vpow2.f32 %v954_v1  ;;  %v846_v2 = vsub.f32 %v764_v55, %v2742_v11  ;;  %v766_v1 = vunpack.c.l.bf16 %v707_v44  ;;  %v964_v55 = vmul.f32 1.442695, %v847_v22 }
 0x130   : > { %1106 = vst [vmem:[%s2804_s7 + $0x138] sm:$0xff] %v3053_v39  ;;  %v2062_v39 = vpop.eup %2061  ;;  %2071 = vpow2.f32 %v956_v33  ;;  %v769_v44 = vunpack.c.h.bf16 %v708_v16 }
 0x131   : > { %3982 = vst [vmem:[#allocation23_spill] sm:$0xff] %v3062_v37  ;;  %v3081_v36 = vmul.f32 %v2062_v39, %v2784_v60  ;;  %2073 = vpow2.f32 %v958_v19  ;;  %v962_v33 = vmul.f32 1.442695, %v846_v2  ;;  %v850_v19 = vsub.f32 %v768_v8, %v2725_v4  ;;  %v710_v2 = vld [vmem:[%s2736_s30 + $0xf0] sm:$0xff] }
 0x132   : > { %1107 = vst [vmem:[%s2804_s7 + $0x140] sm:$0xff] %v3057_v27  ;;  %v2064_v27 = vpop.eup %2063  ;;  %2075 = vpow2.f32 %v960_v45  ;;  %v771_v45 = vunpack.c.h.bf16 %v709_v48 }
 0x133   : > { %3983 = vst [vmem:[#allocation24_spill] sm:$0xff] %v3069_v46  ;;  %v3092_v39 = vmul.f32 %v2064_v27, %v2786_v61  ;;  %v2066_v26 = vpop.eup %2065  ;;  %2077 = vpow2.f32 %v962_v33  ;;  %v770_v27 = vunpack.c.l.bf16 %v709_v48  ;;  %v970_v33 = vmul.f32 1.442695, %v850_v19 }
 0x134   : > { %1108 = vst [vmem:[%s2804_s7 + $0x148] sm:$0xff] %v3062_v37  ;;  %v2068_v37 = vpop.eup %2067  ;;  %2079 = vpow2.f32 %v964_v55  ;;  %v851_v48 = vsub.f32 %v769_v44, %v2727_v5  ;;  %v772_v55 = vunpack.c.l.bf16 %v710_v2  ;;  %v1131_v44 = vld [vmem:[%s3127_s9] sm:$0xff] }
 0x135   : > { %3984 = vst [vmem:[#allocation25_spill] sm:$0xff] %v3076_v40  ;;  %v2070_v22 = vpop.eup %2069 }
 0x136   : > { %1109 = vst [vmem:[%s2804_s7 + $0x150] sm:$0xff] %v3069_v46  ;;  %v848_v46 = vsub.f32 %v766_v1, %v2749_v17  ;;  %v3104_v1 = vmul.f32 %v2068_v37, %v2791_v0  ;;  %v2072_v16 = vpop.eup %2071  ;;  %v3109_v8 = vmul.f32 %v2070_v22, %v2776_v56  ;;  %v711_v22 = vld [vmem:[%s2736_s30 + $0xf8] sm:$0xff] }
 0x137   : > { %3985 = vst [vmem:[#allocation26_spill] sm:$0xff] %v3081_v36  ;;  %v2074_v37 = vpop.eup %2073 }
 0x138   : > { %1110 = vst [vmem:[%s2804_s7 + $0x158] sm:$0xff] %v3076_v40  ;;  %v849_v40 = vsub.f32 %v767_v31, %v2751_v18  ;;  %v966_v31 = vmul.f32 1.442695, %v848_v46  ;;  %v3116_v46 = vmul.f32 %v2072_v16, %v2778_v57  ;;  %v3123_v5 = vmul.f32 %v2074_v37, %v2780_v58 }
 0x139   : > { %1111 = vst [vmem:[%s2804_s7 + $0x160] sm:$0xff] %v3081_v36  ;;  %v3100_v36 = vmul.f32 %v2066_v26, %v2789_v63  ;;  %v852_v26 = vsub.f32 %v770_v27, %v2729_v6  ;;  %v972_v6 = vmul.f32 1.442695, %v851_v48  ;;  %v774_v16 = vunpack.c.l.bf16 %v711_v22 }
 0x13a   : > { %1112 = vst [vmem:[%s2804_s7 + $0x168] sm:$0xff] %v3092_v39  ;;  %v968_v4 = vmul.f32 1.442695, %v849_v40  ;;  %2081 = vpow2.f32 %v966_v31  ;;  %v853_v40 = vsub.f32 %v771_v45, %v2731_v7  ;;  %v854_v45 = vsub.f32 %v772_v55, %v2742_v11 }
 0x13b   : > { %3986 = vst [vmem:[#allocation27_spill] sm:$0xff] %v3100_v36  ;;  %v974_v19 = vmul.f32 1.442695, %v852_v26  ;;  %v775_v48 = vunpack.c.h.bf16 %v711_v22 }
 0x13c   : > { %1113 = vst [vmem:[%s2804_s7 + $0x170] sm:$0xff] %v3100_v36  ;;  %v2076_v36 = vpop.eup %2075  ;;  %2083 = vpow2.f32 %v968_v4  ;;  %v976_v27 = vmul.f32 1.442695, %v853_v40  ;;  %v773_v4 = vunpack.c.h.bf16 %v710_v2  ;;  %v856_v40 = vsub.f32 %v774_v16, %v2749_v17 }
 0x13d   : > { %1114 = vst [vmem:[%s2804_s7 + $0x178] sm:$0xff] %v3104_v1  ;;  %v3133_v7 = vmul.f32 %v2076_v36, %v2782_v59  ;;  %2085 = vpow2.f32 %v970_v33  ;;  %v2078_v31 = vpop.eup %2077  ;;  %v978_v36 = vmul.f32 1.442695, %v854_v45  ;;  %v1323_v33 = vmul.f32 %v1131_v44, %v2796_v13 }
 0x13e   : > { %1115 = vst [vmem:[%s2804_s7 + $0x180] sm:$0xff] %v3109_v8  ;;  %2087 = vpow2.f32 %v972_v6  ;;  %v2080_v26 = vpop.eup %2079  ;;  %v3141_v37 = vmul.f32 %v2078_v31, %v2784_v60  ;;  %v855_v2 = vsub.f32 %v773_v4, %v2744_v12  ;;  %v857_v22 = vsub.f32 %v775_v48, %v2751_v18  ;;  %v1132_v31 = vld [vmem:[%s3127_s9 + $0x8] sm:$0xff]  ;;  %v1133_v48 = vld [vmem:[%s3127_s9 + $0x10] sm:$0xff] }
 0x13f   : > { %1116 = vst [vmem:[%s2804_s7 + $0x188] sm:$0xff] %v3116_v46  ;;  %2089 = vpow2.f32 %v974_v19  ;;  %v3145_v11 = vmul.f32 %v2080_v26, %v2786_v61  ;;  %v982_v12 = vmul.f32 1.442695, %v856_v40  ;;  %v1134_v40 = vld [vmem:[%s3127_s9 + $0x18] sm:$0xff] }
 0x140   : > { %1117 = vst [vmem:[%s2804_s7 + $0x190] sm:$0xff] %v3123_v5  ;;  %2091 = vpow2.f32 %v976_v27  ;;  %v2082_v55 = vpop.eup %2081  ;;  %v980_v19 = vmul.f32 1.442695, %v855_v2  ;;  %v984_v27 = vmul.f32 1.442695, %v857_v22 }
 0x141   : > { %1118 = vst [vmem:[%s2804_s7 + $0x198] sm:$0xff] %v3133_v7  ;;  %2093 = vpow2.f32 %v978_v36  ;;  %v3155_v13 = vmul.f32 %v2082_v55, %v2789_v63 }
 0x142   : > { %1119 = vst [vmem:[%s2804_s7 + $0x1a0] sm:$0xff] %v3141_v37  ;;  %v2084_v6 = vpop.eup %2083  ;;  %2095 = vpow2.f32 %v980_v19  ;;  %v1326_v19 = vmul.f32 %v1134_v40, %v2817_v29 }
 0x143   : > { %1120 = vst [vmem:[%s2804_s7 + $0x1a8] sm:$0xff] %v3145_v11  ;;  %v2086_v44 = vpop.eup %2085  ;;  %v3158_v17 = vmul.f32 %v2084_v6, %v2791_v0  ;;  %2097 = vpow2.f32 %v982_v12  ;;  %v1137_v12 = vld [vmem:[%s3127_s9 + $0x30] sm:$0xff] }
 0x144   : > { %1515 = vst [vmem:[%s3162_s10] sm:$0xff] %v1323_v33  ;;  %v2088_v18 = vpop.eup %2087  ;;  %v3168_v45 = vmul.f32 %v2086_v44, %v2776_v56  ;;  %2099 = vpow2.f32 %v984_v27  ;;  %v1138_v27 = vld [vmem:[%s3127_s9 + $0x38] sm:$0xff]  ;;  %v1329_v29 = vmul.f32 %v1137_v12, %v2835_v43  ;;  %v1143_v43 = vld [vmem:[%s3127_s9 + $0x60] sm:$0xff] }
 0x145   : > { %1121 = vst [vmem:[%s2804_s7 + $0x1b0] sm:$0xff] %v3155_v13  ;;  %v2090_v4 = vpop.eup %2089  ;;  %v3174_v16 = vmul.f32 %v2088_v18, %v2778_v57  ;;  %v1324_v57 = vmul.f32 %v1132_v31, %v2800_v20  ;;  %v1139_v18 = vld [vmem:[%s3127_s9 + $0x40] sm:$0xff]  ;;  %v1140_v31 = vld [vmem:[%s3127_s9 + $0x48] sm:$0xff] }
 0x146   : > { %1122 = vst [vmem:[%s2804_s7 + $0x1b8] sm:$0xff] %v3158_v17  ;;  %v2092_v26 = vpop.eup %2091  ;;  %v3180_v56 = vmul.f32 %v2090_v4, %v2780_v58  ;;  %v1325_v58 = vmul.f32 %v1133_v48, %v2809_v24  ;;  %v1331_v4 = vmul.f32 %v1139_v18, %v2847_v52  ;;  %v1332_v48 = vmul.f32 %v1140_v31, %v2857_v9  ;;  %v1145_v52 = vld [vmem:[%s3127_s9 + $0x70] sm:$0xff]  ;;  %v1146_v9 = vld [vmem:[%s3127_s9 + $0x78] sm:$0xff] }
 0x147   : > { %1123 = vst [vmem:[%s2804_s7 + $0x1c0] sm:$0xff] %v3168_v45  ;;  %v2094_v36 = vpop.eup %2093  ;;  %v3185_v33 = vmul.f32 %v2092_v26, %v2782_v59  ;;  %v1135_v59 = vld [vmem:[%s3127_s9 + $0x20] sm:$0xff]  ;;  %v1337_v40 = vmul.f32 %v1145_v52, %v2888_v47  ;;  %v3990_v52 = vld [vmem:[#allocation14_spill] sm:$0xff] }
 0x148   : > { %1124 = vst [vmem:[%s2804_s7 + $0x1c8] sm:$0xff] %v3174_v16  ;;  %v3191_v2 = vmul.f32 %v2094_v36, %v2784_v60  ;;  %v2096_v55 = vpop.eup %2095  ;;  %v1136_v60 = vld [vmem:[%s3127_s9 + $0x28] sm:$0xff]  ;;  %v1327_v44 = vmul.f32 %v1135_v59, %v2823_v34  ;;  %v1141_v34 = vld [vmem:[%s3127_s9 + $0x50] sm:$0xff]  ;;  %v1151_v47 = vld [vmem:[%s3127_s9 + $0xa0] sm:$0xff] }
 0x149   : > { %1125 = vst [vmem:[%s2804_s7 + $0x1d0] sm:$0xff] %v3180_v56  ;;  %v2098_v20 = vpop.eup %2097  ;;  %v3201_v22 = vmul.f32 %v2096_v55, %v2786_v61  ;;  %v1333_v26 = vmul.f32 %v1141_v34, %v2860_v15  ;;  %v1147_v15 = vld [vmem:[%s3127_s9 + $0x80] sm:$0xff]  ;;  %v1338_v55 = vmul.f32 %v1146_v9, %v2894_v53  ;;  %v1152_v53 = vld [vmem:[%s3127_s9 + $0xa8] sm:$0xff]  ;;  %v1165_v9 = vld [vmem:[%s3127_s9 + $0x110] sm:$0xff] }
 0x14a   : > { %1126 = vst [vmem:[%s2804_s7 + $0x1d8] sm:$0xff] %v3185_v33  ;;  %v2100_v24 = vpop.eup %2099  ;;  %v3206_v6 = vmul.f32 %v2098_v20, %v2789_v63  ;;  %v1328_v63 = vmul.f32 %v1136_v60, %v2828_v38  ;;  %v1142_v38 = vld [vmem:[%s3127_s9 + $0x58] sm:$0xff]  ;;  %v1339_v59 = vmul.f32 %v1147_v15, %v2902_v10  ;;  %v1153_v10 = vld [vmem:[%s3127_s9 + $0xb0] sm:$0xff]  ;;  %v1344_v12 = vmul.f32 %v1152_v53, %v2933_v62 }
 0x14b   : > { %1127 = vst [vmem:[%s2804_s7 + $0x1e0] sm:$0xff] %v3191_v2  ;;  %v3214_v61 = vmul.f32 %v2100_v24, %v2791_v0  ;;  %v1330_v0 = vmul.f32 %v1138_v27, %v2842_v49  ;;  %v1144_v49 = vld [vmem:[%s3127_s9 + $0x68] sm:$0xff]  ;;  %v1334_v36 = vmul.f32 %v1142_v38, %v2871_v30  ;;  %v1158_v62 = vld [vmem:[%s3127_s9 + $0xd8] sm:$0xff]  ;;  %v1169_v53 = vld [vmem:[%s3127_s9 + $0x130] sm:$0xff] }
 0x14c   : > { %1516 = vst [vmem:[%s3162_s10 + $0x8] sm:$0xff] %v1324_v57  ;;  %v1335_v57 = vmul.f32 %v1143_v43, %v2874_v35  ;;  %v1148_v30 = vld [vmem:[%s3127_s9 + $0x88] sm:$0xff]  ;;  %v1149_v35 = vld [vmem:[%s3127_s9 + $0x90] sm:$0xff]  ;;  %v1350_v31 = vmul.f32 %v1158_v62, %v2973_v25  ;;  %v1163_v43 = vld [vmem:[%s3127_s9 + $0x100] sm:$0xff] }
 0x14d   : > { %1517 = vst [vmem:[%s3162_s10 + $0x10] sm:$0xff] %v1325_v58  ;;  %v1336_v58 = vmul.f32 %v1144_v49, %v2881_v41  ;;  %v1150_v41 = vld [vmem:[%s3127_s9 + $0x98] sm:$0xff]  ;;  %v1340_v20 = vmul.f32 %v1148_v30, %v2906_v21  ;;  %v1341_v60 = vmul.f32 %v1149_v35, %v2917_v32  ;;  %v1155_v32 = vld [vmem:[%s3127_s9 + $0xc0] sm:$0xff]  ;;  %v3988_v38 = vld [vmem:[#allocation12_spill] sm:$0xff] }
 0x14e   : > { %1128 = vst [vmem:[%s2804_s7 + $0x1e8] sm:$0xff] %v3201_v22  ;;  %v1342_v24 = vmul.f32 %v1150_v41, %v2921_v42  ;;  %v1154_v21 = vld [vmem:[%s3127_s9 + $0xb8] sm:$0xff]  ;;  %v1156_v42 = vld [vmem:[%s3127_s9 + $0xc8] sm:$0xff]  ;;  %v1167_v35 = vld [vmem:[%s3127_s9 + $0x120] sm:$0xff] }
 0x14f   : > { %1129 = vst [vmem:[%s2804_s7 + $0x1f0] sm:$0xff] %v3206_v6  ;;  %v1346_v27 = vmul.f32 %v1154_v21, %v2945_v23  ;;  %v1348_v18 = vmul.f32 %v1156_v42, %v2962_v54  ;;  %v1160_v23 = vld [vmem:[%s3127_s9 + $0xe8] sm:$0xff]  ;;  %v3998_v62 = vld [vmem:[#allocation22_spill] sm:$0xff] }
 0x150   : > { %1130 = vst [vmem:[%s2804_s7 + $0x1f8] sm:$0xff] %v3214_v61  ;;  %v3992_v30 = vld [vmem:[#allocation16_spill] sm:$0xff] }
 0x151   : > { %1518 = vst [vmem:[%s3162_s10 + $0x18] sm:$0xff] %v1326_v19  ;;  %v1343_v19 = vmul.f32 %v1151_v47, %v2927_v50  ;;  %v1157_v50 = vld [vmem:[%s3127_s9 + $0xd0] sm:$0xff]  ;;  %v3994_v47 = vld [vmem:[#allocation18_spill] sm:$0xff]  ;;  %v3996_v21 = vld [vmem:[#allocation20_spill] sm:$0xff] }
 0x152   : > { %1519 = vst [vmem:[%s3162_s10 + $0x20] sm:$0xff] %v1327_v44  ;;  %v1345_v44 = vmul.f32 %v1153_v10, %v2939_v14  ;;  %v1159_v14 = vld [vmem:[%s3127_s9 + $0xe0] sm:$0xff]  ;;  %v1172_v42 = vld [vmem:[%s3127_s9 + $0x148] sm:$0xff] }
 0x153   : > { %1520 = vst [vmem:[%s3162_s10 + $0x28] sm:$0xff] %v1328_v63  ;;  %v1347_v63 = vmul.f32 %v1155_v32, %v2952_v28  ;;  %v1161_v28 = vld [vmem:[%s3127_s9 + $0xf0] sm:$0xff]  ;;  %v1171_v32 = vld [vmem:[%s3127_s9 + $0x140] sm:$0xff] }
 0x154   : > { %1521 = vst [vmem:[%s3162_s10 + $0x30] sm:$0xff] %v1329_v29  ;;  %v1349_v29 = vmul.f32 %v1157_v50, %v2966_v3 }
 0x155   : > { %1522 = vst [vmem:[%s3162_s10 + $0x38] sm:$0xff] %v1330_v0  ;;  %v3987_v0 = vld [vmem:[#allocation11_spill] sm:$0xff] }
 0x156   : > { %1523 = vst [vmem:[%s3162_s10 + $0x40] sm:$0xff] %v1331_v4  ;;  %v1351_v34 = vmul.f32 %v1159_v14, %v3987_v0  ;;  %v1162_v4 = vld [vmem:[%s3127_s9 + $0xf8] sm:$0xff] }
 0x157   : > { %1524 = vst [vmem:[%s3162_s10 + $0x48] sm:$0xff] %v1332_v48  ;;  %v1352_v48 = vmul.f32 %v1160_v23, %v3988_v38  ;;  %v1174_v14 = vld [vmem:[%s3127_s9 + $0x158] sm:$0xff] }
 0x158   : > { %1525 = vst [vmem:[%s3162_s10 + $0x50] sm:$0xff] %v1333_v26  ;;  %v3989_v26 = vld [vmem:[#allocation13_spill] sm:$0xff] }
 0x159   : > { %1526 = vst [vmem:[%s3162_s10 + $0x58] sm:$0xff] %v1334_v36  ;;  %v1353_v49 = vmul.f32 %v1161_v28, %v3989_v26  ;;  %v1164_v36 = vld [vmem:[%s3127_s9 + $0x108] sm:$0xff] }
 0x15a   : > { %1527 = vst [vmem:[%s3162_s10 + $0x60] sm:$0xff] %v1335_v57  ;;  %v1354_v57 = vmul.f32 %v1162_v4, %v3990_v52  ;;  %v4000_v28 = vld [vmem:[#allocation24_spill] sm:$0xff] }
 0x15b   : > { %1528 = vst [vmem:[%s3162_s10 + $0x68] sm:$0xff] %v1336_v58  ;;  %v3991_v58 = vld [vmem:[#allocation15_spill] sm:$0xff]  ;;  %v1176_v4 = vld [vmem:[%s3127_s9 + $0x168] sm:$0xff] }
 0x15c   : > { %1529 = vst [vmem:[%s3162_s10 + $0x70] sm:$0xff] %v1337_v40  ;;  %v1355_v15 = vmul.f32 %v1163_v43, %v3991_v58  ;;  %v1166_v40 = vld [vmem:[%s3127_s9 + $0x118] sm:$0xff] }
 0x15d   : > { %1530 = vst [vmem:[%s3162_s10 + $0x78] sm:$0xff] %v1338_v55  ;;  %v1356_v55 = vmul.f32 %v1164_v36, %v3992_v30  ;;  %v4002_v36 = vld [vmem:[#allocation26_spill] sm:$0xff] }
 0x15e   : > { %1531 = vst [vmem:[%s3162_s10 + $0x80] sm:$0xff] %v1339_v59  ;;  %v3993_v59 = vld [vmem:[#allocation17_spill] sm:$0xff] }
 0x15f   : > { %1532 = vst [vmem:[%s3162_s10 + $0x88] sm:$0xff] %v1340_v20  ;;  %v1357_v41 = vmul.f32 %v1165_v9, %v3993_v59  ;;  %v1168_v20 = vld [vmem:[%s3127_s9 + $0x128] sm:$0xff]  ;;  %v1178_v9 = vld [vmem:[%s3127_s9 + $0x178] sm:$0xff] }
 0x160   : > { %1533 = vst [vmem:[%s3162_s10 + $0x90] sm:$0xff] %v1341_v60  ;;  %v1358_v60 = vmul.f32 %v1166_v40, %v3994_v47  ;;  %v1179_v40 = vld [vmem:[%s3127_s9 + $0x180] sm:$0xff] }
 0x161   : > { %1534 = vst [vmem:[%s3162_s10 + $0x98] sm:$0xff] %v1342_v24  ;;  %v3995_v24 = vld [vmem:[#allocation19_spill] sm:$0xff] }
 0x162   : > { %1535 = vst [vmem:[%s3162_s10 + $0xa0] sm:$0xff] %v1343_v19  ;;  %v1359_v10 = vmul.f32 %v1167_v35, %v3995_v24  ;;  %v1170_v19 = vld [vmem:[%s3127_s9 + $0x138] sm:$0xff] }
 0x163   : > { %1536 = vst [vmem:[%s3162_s10 + $0xa8] sm:$0xff] %v1344_v12  ;;  %v1360_v12 = vmul.f32 %v1168_v20, %v3996_v21  ;;  %v1370_v20 = vmul.f32 %v1178_v9, %v3104_v1 }
 0x164   : > { %1537 = vst [vmem:[%s3162_s10 + $0xb0] sm:$0xff] %v1345_v44  ;;  %v1361_v44 = vmul.f32 %v1169_v53, %v3044_v51  ;;  %v1371_v53 = vmul.f32 %v1179_v40, %v3109_v8 }
 0x165   : > { %1538 = vst [vmem:[%s3162_s10 + $0xb8] sm:$0xff] %v1346_v27  ;;  %v3997_v27 = vld [vmem:[#allocation21_spill] sm:$0xff] }
 0x166   : > { %1539 = vst [vmem:[%s3162_s10 + $0xc0] sm:$0xff] %v1347_v63  ;;  %v1362_v50 = vmul.f32 %v1170_v19, %v3997_v27  ;;  %v1173_v63 = vld [vmem:[%s3127_s9 + $0x150] sm:$0xff] }
 0x167   : > { %1540 = vst [vmem:[%s3162_s10 + $0xc8] sm:$0xff] %v1348_v18  ;;  %v1363_v18 = vmul.f32 %v1171_v32, %v3998_v62 }
 0x168   : > { %1541 = vst [vmem:[%s3162_s10 + $0xd0] sm:$0xff] %v1349_v29  ;;  %v3999_v29 = vld [vmem:[#allocation23_spill] sm:$0xff] }
 0x169   : > { %1542 = vst [vmem:[%s3162_s10 + $0xd8] sm:$0xff] %v1350_v31  ;;  %v1364_v23 = vmul.f32 %v1172_v42, %v3999_v29  ;;  %v1175_v31 = vld [vmem:[%s3127_s9 + $0x160] sm:$0xff] }
 0x16a   : > { %1543 = vst [vmem:[%s3162_s10 + $0xe0] sm:$0xff] %v1351_v34  ;;  %v1365_v34 = vmul.f32 %v1173_v63, %v4000_v28 }
 0x16b   : > { %1544 = vst [vmem:[%s3162_s10 + $0xe8] sm:$0xff] %v1352_v48  ;;  %v4001_v48 = vld [vmem:[#allocation25_spill] sm:$0xff] }
 0x16c   : > { %1545 = vst [vmem:[%s3162_s10 + $0xf0] sm:$0xff] %v1353_v49  ;;  %v1366_v43 = vmul.f32 %v1174_v14, %v4001_v48  ;;  %v1177_v49 = vld [vmem:[%s3127_s9 + $0x170] sm:$0xff] }
 0x16d   : > { %1546 = vst [vmem:[%s3162_s10 + $0xf8] sm:$0xff] %v1354_v57  ;;  %v1367_v57 = vmul.f32 %v1175_v31, %v4002_v36 }
 0x16e   : > { %1547 = vst [vmem:[%s3162_s10 + $0x100] sm:$0xff] %v1355_v15  ;;  %v1368_v15 = vmul.f32 %v1176_v4, %v3092_v39 }
 0x16f   : > { %1548 = vst [vmem:[%s3162_s10 + $0x108] sm:$0xff] %v1356_v55  ;;  %v4003_v55 = vld [vmem:[#allocation27_spill] sm:$0xff] }
 0x170   : > { %1549 = vst [vmem:[%s3162_s10 + $0x110] sm:$0xff] %v1357_v41  ;;  %v1369_v35 = vmul.f32 %v1177_v49, %v4003_v55  ;;  %v1180_v41 = vld [vmem:[%s3127_s9 + $0x188] sm:$0xff] }
 0x171   : > { %1550 = vst [vmem:[%s3162_s10 + $0x118] sm:$0xff] %v1358_v60  ;;  %v1181_v60 = vld [vmem:[%s3127_s9 + $0x190] sm:$0xff]  ;;  %v1372_v19 = vmul.f32 %v1180_v41, %v3116_v46 }
 0x172   : > { %1551 = vst [vmem:[%s3162_s10 + $0x120] sm:$0xff] %v1359_v10  ;;  %v1182_v10 = vld [vmem:[%s3127_s9 + $0x198] sm:$0xff]  ;;  %v1373_v32 = vmul.f32 %v1181_v60, %v3123_v5 }
 0x173   : > { %1552 = vst [vmem:[%s3162_s10 + $0x128] sm:$0xff] %v1360_v12  ;;  %v1183_v12 = vld [vmem:[%s3127_s9 + $0x1a0] sm:$0xff]  ;;  %v1374_v42 = vmul.f32 %v1182_v10, %v3133_v7 }
 0x174   : > { %1553 = vst [vmem:[%s3162_s10 + $0x130] sm:$0xff] %v1361_v44  ;;  %v1184_v44 = vld [vmem:[%s3127_s9 + $0x1a8] sm:$0xff]  ;;  %v1375_v63 = vmul.f32 %v1183_v12, %v3141_v37 }
 0x175   : > { %1554 = vst [vmem:[%s3162_s10 + $0x138] sm:$0xff] %v1362_v50  ;;  %v1185_v50 = vld [vmem:[%s3127_s9 + $0x1b0] sm:$0xff]  ;;  %v1376_v14 = vmul.f32 %v1184_v44, %v3145_v11 }
 0x176   : > { %1555 = vst [vmem:[%s3162_s10 + $0x140] sm:$0xff] %v1363_v18  ;;  %v1186_v18 = vld [vmem:[%s3127_s9 + $0x1b8] sm:$0xff]  ;;  %v1377_v31 = vmul.f32 %v1185_v50, %v3155_v13  ;;  %v3399_v50 = vld [vmem:[%s2804_s7] sm:$0xff] }
 0x177   : > { %1556 = vst [vmem:[%s3162_s10 + $0x148] sm:$0xff] %v1364_v23  ;;  %v1187_v23 = vld [vmem:[%s3127_s9 + $0x1c0] sm:$0xff]  ;;  %v1378_v4 = vmul.f32 %v1186_v18, %v3158_v17  ;;  %v1198_v18 = vld [vmem:[%s3127_s9 + $0x218] sm:$0xff] }
 0x178   : > { %1557 = vst [vmem:[%s3162_s10 + $0x150] sm:$0xff] %v1365_v34  ;;  %v1188_v34 = vld [vmem:[%s3127_s9 + $0x1c8] sm:$0xff]  ;;  %v1379_v49 = vmul.f32 %v1187_v23, %v3168_v45 }
 0x179   : > { %1558 = vst [vmem:[%s3162_s10 + $0x158] sm:$0xff] %v1366_v43  ;;  %v1189_v43 = vld [vmem:[%s3127_s9 + $0x1d0] sm:$0xff]  ;;  %v1380_v9 = vmul.f32 %v1188_v34, %v3174_v16 }
 0x17a   : > { %1559 = vst [vmem:[%s3162_s10 + $0x160] sm:$0xff] %v1367_v57  ;;  %v1190_v57 = vld [vmem:[%s3127_s9 + $0x1d8] sm:$0xff]  ;;  %v1381_v40 = vmul.f32 %v1189_v43, %v3180_v56  ;;  %v3411_v34 = vld [vmem:[%s2804_s7 + $0x10] sm:$0xff]  ;;  %v1200_v43 = vld [vmem:[%s3127_s9 + $0x228] sm:$0xff] }
 0x17b   : > { %1560 = vst [vmem:[%s3162_s10 + $0x168] sm:$0xff] %v1368_v15  ;;  %v1191_v15 = vld [vmem:[%s3127_s9 + $0x1e0] sm:$0xff]  ;;  %v1382_v41 = vmul.f32 %v1190_v57, %v3185_v33 }
 0x17c   : > { %1561 = vst [vmem:[%s3162_s10 + $0x170] sm:$0xff] %v1369_v35  ;;  %v1192_v35 = vld [vmem:[%s3127_s9 + $0x1e8] sm:$0xff]  ;;  %v1383_v60 = vmul.f32 %v1191_v15, %v3191_v2  ;;  %v3423_v15 = vld [vmem:[%s2804_s7 + $0x20] sm:$0xff] }
 0x17d   : > { %1562 = vst [vmem:[%s3162_s10 + $0x178] sm:$0xff] %v1370_v20  ;;  %v1193_v20 = vld [vmem:[%s3127_s9 + $0x1f0] sm:$0xff]  ;;  %v1384_v10 = vmul.f32 %v1192_v35, %v3201_v22  ;;  %v1202_v35 = vld [vmem:[%s3127_s9 + $0x238] sm:$0xff] }
 0x17e   : > { %1563 = vst [vmem:[%s3162_s10 + $0x180] sm:$0xff] %v1371_v53  ;;  %v1194_v53 = vld [vmem:[%s3127_s9 + $0x1f8] sm:$0xff]  ;;  %v1385_v12 = vmul.f32 %v1193_v20, %v3206_v6 }
 0x17f   : > { %1564 = vst [vmem:[%s3162_s10 + $0x188] sm:$0xff] %v1372_v19  ;;  %v1195_v19 = vld [vmem:[%s3127_s9 + $0x200] sm:$0xff]  ;;  %v1386_v44 = vmul.f32 %v1194_v53, %v3214_v61  ;;  %v3435_v53 = vld [vmem:[%s2804_s7 + $0x30] sm:$0xff] }
 0x180   : > { %1565 = vst [vmem:[%s3162_s10 + $0x190] sm:$0xff] %v1373_v32  ;;  %v1196_v32 = vld [vmem:[%s3127_s9 + $0x208] sm:$0xff] }
 0x181   : > { %1566 = vst [vmem:[%s3162_s10 + $0x198] sm:$0xff] %v1374_v42  ;;  %v1197_v42 = vld [vmem:[%s3127_s9 + $0x210] sm:$0xff] }
 0x182   : > { %1567 = vst [vmem:[%s3162_s10 + $0x1a0] sm:$0xff] %v1375_v63  ;;  %v1387_v63 = vmul.f32 %v3399_v50, %v1195_v19  ;;  %v1204_v19 = vld [vmem:[%s3127_s9 + $0x248] sm:$0xff] }
 0x183   : > { %1568 = vst [vmem:[%s3162_s10 + $0x1a8] sm:$0xff] %v1376_v14  ;;  %v3405_v14 = vld [vmem:[%s2804_s7 + $0x8] sm:$0xff] }
 0x184   : > { %1569 = vst [vmem:[%s3162_s10 + $0x1b0] sm:$0xff] %v1377_v31  ;;  %v1388_v23 = vmul.f32 %v3405_v14, %v1196_v32  ;;  %v1199_v31 = vld [vmem:[%s3127_s9 + $0x220] sm:$0xff] }
 0x185   : > { %1570 = vst [vmem:[%s3162_s10 + $0x1b8] sm:$0xff] %v1378_v4  ;;  %v1389_v4 = vmul.f32 %v3411_v34, %v1197_v42  ;;  %v3447_v42 = vld [vmem:[%s2804_s7 + $0x40] sm:$0xff] }
 0x186   : > { %1571 = vst [vmem:[%s3162_s10 + $0x1c0] sm:$0xff] %v1379_v49  ;;  %v3417_v49 = vld [vmem:[%s2804_s7 + $0x18] sm:$0xff] }
 0x187   : > { %1572 = vst [vmem:[%s3162_s10 + $0x1c8] sm:$0xff] %v1380_v9  ;;  %v1390_v57 = vmul.f32 %v3417_v49, %v1198_v18  ;;  %v1201_v9 = vld [vmem:[%s3127_s9 + $0x230] sm:$0xff]  ;;  %v1206_v18 = vld [vmem:[%s3127_s9 + $0x258] sm:$0xff] }
 0x188   : > { %1573 = vst [vmem:[%s3162_s10 + $0x1d0] sm:$0xff] %v1381_v40  ;;  %v1391_v40 = vmul.f32 %v3423_v15, %v1199_v31 }
 0x189   : > { %1574 = vst [vmem:[%s3162_s10 + $0x1d8] sm:$0xff] %v1382_v41  ;;  %v3429_v41 = vld [vmem:[%s2804_s7 + $0x28] sm:$0xff] }
 0x18a   : > { %1575 = vst [vmem:[%s3162_s10 + $0x1e0] sm:$0xff] %v1383_v60  ;;  %v1392_v20 = vmul.f32 %v3429_v41, %v1200_v43  ;;  %v1203_v60 = vld [vmem:[%s3127_s9 + $0x240] sm:$0xff]  ;;  %v3459_v43 = vld [vmem:[%s2804_s7 + $0x50] sm:$0xff] }
 0x18b   : > { %1576 = vst [vmem:[%s3162_s10 + $0x1e8] sm:$0xff] %v1384_v10  ;;  %v1393_v10 = vmul.f32 %v3435_v53, %v1201_v9  ;;  %v1208_v9 = vld [vmem:[%s3127_s9 + $0x268] sm:$0xff] }
 0x18c   : > { %1577 = vst [vmem:[%s3162_s10 + $0x1f0] sm:$0xff] %v1385_v12  ;;  %v3441_v12 = vld [vmem:[%s2804_s7 + $0x38] sm:$0xff] }
 0x18d   : > { %1578 = vst [vmem:[%s3162_s10 + $0x1f8] sm:$0xff] %v1386_v44  ;;  %v1394_v32 = vmul.f32 %v3441_v12, %v1202_v35  ;;  %v1205_v44 = vld [vmem:[%s3127_s9 + $0x250] sm:$0xff] }
 0x18e   : > { %1579 = vst [vmem:[%s3162_s10 + $0x200] sm:$0xff] %v1387_v63  ;;  %v1395_v63 = vmul.f32 %v3447_v42, %v1203_v60  ;;  %v3471_v60 = vld [vmem:[%s2804_s7 + $0x60] sm:$0xff] }
 0x18f   : > { %1580 = vst [vmem:[%s3162_s10 + $0x208] sm:$0xff] %v1388_v23  ;;  %v3453_v23 = vld [vmem:[%s2804_s7 + $0x48] sm:$0xff] }
 0x190   : > { %1581 = vst [vmem:[%s3162_s10 + $0x210] sm:$0xff] %v1389_v4  ;;  %v1396_v31 = vmul.f32 %v3453_v23, %v1204_v19  ;;  %v1207_v4 = vld [vmem:[%s3127_s9 + $0x260] sm:$0xff]  ;;  %v1210_v19 = vld [vmem:[%s3127_s9 + $0x278] sm:$0xff] }
 0x191   : > { %1582 = vst [vmem:[%s3162_s10 + $0x218] sm:$0xff] %v1390_v57  ;;  %v1397_v57 = vmul.f32 %v3459_v43, %v1205_v44 }
 0x192   : > { %1583 = vst [vmem:[%s3162_s10 + $0x220] sm:$0xff] %v1391_v40  ;;  %v3465_v40 = vld [vmem:[%s2804_s7 + $0x58] sm:$0xff] }
 0x193   : > { %1584 = vst [vmem:[%s3162_s10 + $0x228] sm:$0xff] %v1392_v20  ;;  %v1398_v35 = vmul.f32 %v3465_v40, %v1206_v18  ;;  %v1209_v20 = vld [vmem:[%s3127_s9 + $0x270] sm:$0xff] }
 0x194   : > { %1585 = vst [vmem:[%s3162_s10 + $0x230] sm:$0xff] %v1393_v10  ;;  %v1399_v10 = vmul.f32 %v3471_v60, %v1207_v4 }
 0x195   : > { %4004 = vst [vmem:[#allocation11_spill] sm:$0xff] %v3459_v43  ;;  %v1211_v43 = vld [vmem:[%s3127_s9 + $0x280] sm:$0xff] }
 0x196   : > { %1586 = vst [vmem:[%s3162_s10 + $0x238] sm:$0xff] %v1394_v32  ;;  %v3477_v32 = vld [vmem:[%s2804_s7 + $0x68] sm:$0xff] }
 0x197   : > { %4005 = vst [vmem:[#allocation12_spill] sm:$0xff] %v3465_v40  ;;  %v1400_v44 = vmul.f32 %v3477_v32, %v1208_v9  ;;  %v1212_v40 = vld [vmem:[%s3127_s9 + $0x288] sm:$0xff] }
 0x198   : > { %1587 = vst [vmem:[%s3162_s10 + $0x240] sm:$0xff] %v1395_v63  ;;  %v3483_v63 = vld [vmem:[%s2804_s7 + $0x70] sm:$0xff] }
 0x199   : > { %4006 = vst [vmem:[#allocation13_spill] sm:$0xff] %v3471_v60  ;;  %v1401_v18 = vmul.f32 %v3483_v63, %v1209_v20  ;;  %v1213_v60 = vld [vmem:[%s3127_s9 + $0x290] sm:$0xff] }
 0x19a   : > { %1588 = vst [vmem:[%s3162_s10 + $0x248] sm:$0xff] %v1396_v31  ;;  %v3489_v31 = vld [vmem:[%s2804_s7 + $0x78] sm:$0xff] }
 0x19b   : > { %4007 = vst [vmem:[#allocation14_spill] sm:$0xff] %v3477_v32  ;;  %v1402_v4 = vmul.f32 %v3489_v31, %v1210_v19  ;;  %v1214_v32 = vld [vmem:[%s3127_s9 + $0x298] sm:$0xff] }
 0x19c   : > { %1589 = vst [vmem:[%s3162_s10 + $0x250] sm:$0xff] %v1397_v57  ;;  %v3495_v57 = vld [vmem:[%s2804_s7 + $0x80] sm:$0xff] }
 0x19d   : > { %4008 = vst [vmem:[#allocation15_spill] sm:$0xff] %v3483_v63  ;;  %v1403_v9 = vmul.f32 %v3495_v57, %v1211_v43  ;;  %v1215_v63 = vld [vmem:[%s3127_s9 + $0x2a0] sm:$0xff]  ;;  %v3513_v43 = vld [vmem:[%s2804_s7 + $0x98] sm:$0xff] }
 0x19e   : > { %1590 = vst [vmem:[%s3162_s10 + $0x258] sm:$0xff] %v1398_v35  ;;  %v3501_v35 = vld [vmem:[%s2804_s7 + $0x88] sm:$0xff] }
 0x19f   : > { %4009 = vst [vmem:[#allocation16_spill] sm:$0xff] %v3489_v31  ;;  %v1404_v20 = vmul.f32 %v3501_v35, %v1212_v40  ;;  %v1216_v31 = vld [vmem:[%s3127_s9 + $0x2a8] sm:$0xff]  ;;  %v3519_v40 = vld [vmem:[%s2804_s7 + $0xa0] sm:$0xff] }
 0x1a0   : > { %1591 = vst [vmem:[%s3162_s10 + $0x260] sm:$0xff] %v1399_v10  ;;  %v3507_v10 = vld [vmem:[%s2804_s7 + $0x90] sm:$0xff] }
 0x1a1   : > { %4010 = vst [vmem:[#allocation17_spill] sm:$0xff] %v3495_v57  ;;  %v1405_v19 = vmul.f32 %v3507_v10, %v1213_v60  ;;  %v1217_v57 = vld [vmem:[%s3127_s9 + $0x2b0] sm:$0xff]  ;;  %v3525_v60 = vld [vmem:[%s2804_s7 + $0xa8] sm:$0xff] }
 0x1a2   : > { %1592 = vst [vmem:[%s3162_s10 + $0x268] sm:$0xff] %v1400_v44  ;;  %v1406_v44 = vmul.f32 %v3513_v43, %v1214_v32  ;;  %v3531_v32 = vld [vmem:[%s2804_s7 + $0xb0] sm:$0xff] }
 0x1a3   : > { %4011 = vst [vmem:[#allocation18_spill] sm:$0xff] %v3501_v35  ;;  %v1218_v35 = vld [vmem:[%s3127_s9 + $0x2b8] sm:$0xff] }
 0x1a4   : > { %1593 = vst [vmem:[%s3162_s10 + $0x270] sm:$0xff] %v1401_v18  ;;  %v1407_v18 = vmul.f32 %v3519_v40, %v1215_v63  ;;  %v3537_v63 = vld [vmem:[%s2804_s7 + $0xb8] sm:$0xff] }
 0x1a5   : > { %4012 = vst [vmem:[#allocation19_spill] sm:$0xff] %v3507_v10  ;;  %v1219_v10 = vld [vmem:[%s3127_s9 + $0x2c0] sm:$0xff] }
 0x1a6   : > { %1594 = vst [vmem:[%s3162_s10 + $0x278] sm:$0xff] %v1402_v4  ;;  %v1408_v4 = vmul.f32 %v3525_v60, %v1216_v31  ;;  %v3543_v31 = vld [vmem:[%s2804_s7 + $0xc0] sm:$0xff] }
 0x1a7   : > { %4013 = vst [vmem:[#allocation20_spill] sm:$0xff] %v3513_v43  ;;  %v1220_v43 = vld [vmem:[%s3127_s9 + $0x2c8] sm:$0xff] }
 0x1a8   : > { %1595 = vst [vmem:[%s3162_s10 + $0x280] sm:$0xff] %v1403_v9  ;;  %v1409_v9 = vmul.f32 %v3531_v32, %v1217_v57  ;;  %v1412_v57 = vmul.f32 %v1220_v43, %v2962_v54  ;;  %v1226_v54 = vld [vmem:[%s3127_s9 + $0x2f8] sm:$0xff] }
 0x1a9   : > { %4014 = vst [vmem:[#allocation21_spill] sm:$0xff] %v3519_v40  ;;  %v1221_v40 = vld [vmem:[%s3127_s9 + $0x2d0] sm:$0xff] }
 0x1aa   : > { %1596 = vst [vmem:[%s3162_s10 + $0x288] sm:$0xff] %v1404_v20  ;;  %v1410_v20 = vmul.f32 %v3537_v63, %v1218_v35  ;;  %v1413_v35 = vmul.f32 %v1221_v40, %v2966_v3  ;;  %v1227_v3 = vld [vmem:[%s3127_s9 + $0x300] sm:$0xff] }
 0x1ab   : > { %4015 = vst [vmem:[#allocation22_spill] sm:$0xff] %v3525_v60  ;;  %v1222_v60 = vld [vmem:[%s3127_s9 + $0x2d8] sm:$0xff] }
 0x1ac   : > { %1597 = vst [vmem:[%s3162_s10 + $0x290] sm:$0xff] %v1405_v19  ;;  %v1411_v19 = vmul.f32 %v3543_v31, %v1219_v10  ;;  %v1225_v10 = vld [vmem:[%s3127_s9 + $0x2f0] sm:$0xff] }
 0x1ad   : > { %1598 = vst [vmem:[%s3162_s10 + $0x298] sm:$0xff] %v1406_v44  ;;  %v1223_v44 = vld [vmem:[%s3127_s9 + $0x2e0] sm:$0xff]  ;;  %v1417_v40 = vmul.f32 %v1225_v10, %v3989_v26 }
 0x1ae   : > { %4016 = vst [vmem:[#allocation23_spill] sm:$0xff] %v3537_v63  ;;  %v1224_v63 = vld [vmem:[%s3127_s9 + $0x2e8] sm:$0xff]  ;;  %v1231_v26 = vld [vmem:[%s3127_s9 + $0x320] sm:$0xff] }
 0x1af   : > { %1599 = vst [vmem:[%s3162_s10 + $0x2a0] sm:$0xff] %v1407_v18  ;;  %v1414_v18 = vmul.f32 %v1222_v60, %v2973_v25  ;;  %v1416_v43 = vmul.f32 %v1224_v63, %v3988_v38  ;;  %v1228_v25 = vld [vmem:[%s3127_s9 + $0x308] sm:$0xff]  ;;  %v1418_v60 = vmul.f32 %v1226_v54, %v3990_v52  ;;  %v1230_v38 = vld [vmem:[%s3127_s9 + $0x318] sm:$0xff] }
 0x1b0   : > { %1600 = vst [vmem:[%s3162_s10 + $0x2a8] sm:$0xff] %v1408_v4  ;;  %v1415_v4 = vmul.f32 %v1223_v44, %v3987_v0  ;;  %v1229_v0 = vld [vmem:[%s3127_s9 + $0x310] sm:$0xff]  ;;  %v1420_v63 = vmul.f32 %v1228_v25, %v3992_v30  ;;  %v1232_v52 = vld [vmem:[%s3127_s9 + $0x328] sm:$0xff]  ;;  %v1234_v30 = vld [vmem:[%s3127_s9 + $0x338] sm:$0xff] }
 0x1b1   : > { %1601 = vst [vmem:[%s3162_s10 + $0x2b0] sm:$0xff] %v1409_v9  ;;  %v1419_v9 = vmul.f32 %v1227_v3, %v3991_v58  ;;  %v1233_v58 = vld [vmem:[%s3127_s9 + $0x330] sm:$0xff]  ;;  %v1424_v44 = vmul.f32 %v1232_v52, %v3996_v21  ;;  %v1238_v21 = vld [vmem:[%s3127_s9 + $0x358] sm:$0xff] }
 0x1b2   : > { %1602 = vst [vmem:[%s3162_s10 + $0x2b8] sm:$0xff] %v1410_v20  ;;  %v1421_v20 = vmul.f32 %v1229_v0, %v3993_v59  ;;  %v1235_v59 = vld [vmem:[%s3127_s9 + $0x340] sm:$0xff] }
 0x1b3   : > { %1603 = vst [vmem:[%s3162_s10 + $0x2c0] sm:$0xff] %v1411_v19  ;;  %v1422_v19 = vmul.f32 %v1230_v38, %v3994_v47  ;;  %v1236_v47 = vld [vmem:[%s3127_s9 + $0x348] sm:$0xff]  ;;  %v1427_v10 = vmul.f32 %v1235_v59, %v3998_v62  ;;  %v1241_v62 = vld [vmem:[%s3127_s9 + $0x370] sm:$0xff] }
 0x1b4   : > { %1604 = vst [vmem:[%s3162_s10 + $0x2c8] sm:$0xff] %v1412_v57  ;;  %v1423_v57 = vmul.f32 %v1231_v26, %v3995_v24  ;;  %v1237_v24 = vld [vmem:[%s3127_s9 + $0x350] sm:$0xff]  ;;  %v1433_v25 = vmul.f32 %v1241_v62, %v4003_v55  ;;  %v1247_v55 = vld [vmem:[%s3127_s9 + $0x3a0] sm:$0xff] }
 0x1b5   : > { %1605 = vst [vmem:[%s3162_s10 + $0x2d0] sm:$0xff] %v1413_v35  ;;  %v1425_v35 = vmul.f32 %v1233_v58, %v3044_v51  ;;  %v1239_v51 = vld [vmem:[%s3127_s9 + $0x360] sm:$0xff]  ;;  %v1429_v54 = vmul.f32 %v1237_v24, %v4000_v28  ;;  %v1439_v26 = vmul.f32 %v1247_v55, %v3141_v37  ;;  %v1253_v37 = vld [vmem:[%s3127_s9 + $0x3d0] sm:$0xff] }
 0x1b6   : > { %1606 = vst [vmem:[%s3162_s10 + $0x2d8] sm:$0xff] %v1414_v18  ;;  %v1426_v18 = vmul.f32 %v1234_v30, %v3997_v27  ;;  %v1240_v27 = vld [vmem:[%s3127_s9 + $0x368] sm:$0xff]  ;;  %v1431_v3 = vmul.f32 %v1239_v51, %v4002_v36  ;;  %v1243_v28 = vld [vmem:[%s3127_s9 + $0x380] sm:$0xff]  ;;  %v1245_v36 = vld [vmem:[%s3127_s9 + $0x390] sm:$0xff]  ;;  %v1445_v30 = vmul.f32 %v1253_v37, %v3180_v56 }
 0x1b7   : > { %1607 = vst [vmem:[%s3162_s10 + $0x2e0] sm:$0xff] %v1415_v4  ;;  %v1428_v4 = vmul.f32 %v1236_v47, %v3999_v29  ;;  %v1242_v29 = vld [vmem:[%s3127_s9 + $0x378] sm:$0xff]  ;;  %v1435_v0 = vmul.f32 %v1243_v28, %v3109_v8  ;;  %v1437_v38 = vmul.f32 %v1245_v36, %v3123_v5  ;;  %v1249_v8 = vld [vmem:[%s3127_s9 + $0x3b0] sm:$0xff]  ;;  %v1251_v5 = vld [vmem:[%s3127_s9 + $0x3c0] sm:$0xff] }
 0x1b8   : > { %1608 = vst [vmem:[%s3162_s10 + $0x2e8] sm:$0xff] %v1416_v43  ;;  %v1430_v43 = vmul.f32 %v1238_v21, %v4001_v48  ;;  %v1244_v48 = vld [vmem:[%s3127_s9 + $0x388] sm:$0xff]  ;;  %v1441_v52 = vmul.f32 %v1249_v8, %v3155_v13  ;;  %v1443_v58 = vmul.f32 %v1251_v5, %v3168_v45  ;;  %v1255_v13 = vld [vmem:[%s3127_s9 + $0x3e0] sm:$0xff]  ;;  %v1257_v45 = vld [vmem:[%s3127_s9 + $0x3f0] sm:$0xff] }
 0x1b9   : > { %1609 = vst [vmem:[%s3162_s10 + $0x2f0] sm:$0xff] %v1417_v40  ;;  %v1432_v40 = vmul.f32 %v1240_v27, %v3092_v39  ;;  %v1246_v39 = vld [vmem:[%s3127_s9 + $0x398] sm:$0xff]  ;;  %v1447_v59 = vmul.f32 %v1255_v13, %v3191_v2  ;;  %v1259_v56 = vld [vmem:[%s3127_s9 + $0x400] sm:$0xff]  ;;  %v1449_v47 = vmul.f32 %v1257_v45, %v3206_v6  ;;  %v1261_v2 = vld [vmem:[%s3127_s9 + $0x410] sm:$0xff] }
 0x1ba   : > { %1610 = vst [vmem:[%s3162_s10 + $0x2f8] sm:$0xff] %v1418_v60  ;;  %v1434_v60 = vmul.f32 %v1242_v29, %v3104_v1  ;;  %v1248_v1 = vld [vmem:[%s3127_s9 + $0x3a8] sm:$0xff]  ;;  %v1451_v24 = vmul.f32 %v3399_v50, %v1259_v56  ;;  %v1263_v6 = vld [vmem:[%s3127_s9 + $0x420] sm:$0xff]  ;;  %v1453_v21 = vmul.f32 %v3411_v34, %v1261_v2  ;;  %v1265_v50 = vld [vmem:[%s3127_s9 + $0x430] sm:$0xff] }
 0x1bb   : > { %1611 = vst [vmem:[%s3162_s10 + $0x300] sm:$0xff] %v1419_v9  ;;  %v1436_v9 = vmul.f32 %v1244_v48, %v3116_v46  ;;  %v1250_v46 = vld [vmem:[%s3127_s9 + $0x3b8] sm:$0xff]  ;;  %v1455_v51 = vmul.f32 %v3423_v15, %v1263_v6  ;;  %v1267_v34 = vld [vmem:[%s3127_s9 + $0x440] sm:$0xff]  ;;  %v1457_v27 = vmul.f32 %v3435_v53, %v1265_v50  ;;  %v1269_v15 = vld [vmem:[%s3127_s9 + $0x450] sm:$0xff] }
 0x1bc   : > { %1612 = vst [vmem:[%s3162_s10 + $0x308] sm:$0xff] %v1420_v63  ;;  %v1438_v63 = vmul.f32 %v1246_v39, %v3133_v7  ;;  %v1252_v7 = vld [vmem:[%s3127_s9 + $0x3c8] sm:$0xff]  ;;  %v1459_v62 = vmul.f32 %v3447_v42, %v1267_v34  ;;  %v1271_v53 = vld [vmem:[%s3127_s9 + $0x460] sm:$0xff]  ;;  %v1273_v42 = vld [vmem:[%s3127_s9 + $0x470] sm:$0xff] }
 0x1bd   : > { %1613 = vst [vmem:[%s3162_s10 + $0x310] sm:$0xff] %v1421_v20  ;;  %v1440_v20 = vmul.f32 %v1248_v1, %v3145_v11  ;;  %v1254_v11 = vld [vmem:[%s3127_s9 + $0x3d8] sm:$0xff]  ;;  %v4017_v29 = vld [vmem:[#allocation11_spill] sm:$0xff]  ;;  %v4018_v28 = vld [vmem:[#allocation12_spill] sm:$0xff] }
 0x1be   : > { %1614 = vst [vmem:[%s3162_s10 + $0x318] sm:$0xff] %v1422_v19  ;;  %v1442_v19 = vmul.f32 %v1250_v46, %v3158_v17  ;;  %v1256_v17 = vld [vmem:[%s3127_s9 + $0x3e8] sm:$0xff]  ;;  %v4019_v48 = vld [vmem:[#allocation13_spill] sm:$0xff]  ;;  %v4020_v36 = vld [vmem:[#allocation14_spill] sm:$0xff] }
 0x1bf   : > { %1615 = vst [vmem:[%s3162_s10 + $0x320] sm:$0xff] %v1423_v57  ;;  %v1444_v57 = vmul.f32 %v1252_v7, %v3174_v16  ;;  %v1258_v16 = vld [vmem:[%s3127_s9 + $0x3f8] sm:$0xff]  ;;  %v1275_v39 = vld [vmem:[%s3127_s9 + $0x480] sm:$0xff]  ;;  %v4022_v1 = vld [vmem:[#allocation16_spill] sm:$0xff] }
 0x1c0   : > { %1616 = vst [vmem:[%s3162_s10 + $0x328] sm:$0xff] %v1424_v44  ;;  %v1446_v44 = vmul.f32 %v1254_v11, %v3185_v33  ;;  %v1260_v33 = vld [vmem:[%s3127_s9 + $0x408] sm:$0xff]  ;;  %v1277_v8 = vld [vmem:[%s3127_s9 + $0x490] sm:$0xff]  ;;  %v4024_v5 = vld [vmem:[#allocation18_spill] sm:$0xff] }
 0x1c1   : > { %1617 = vst [vmem:[%s3162_s10 + $0x330] sm:$0xff] %v1425_v35  ;;  %v1448_v35 = vmul.f32 %v1256_v17, %v3201_v22  ;;  %v1262_v22 = vld [vmem:[%s3127_s9 + $0x418] sm:$0xff]  ;;  %v1279_v7 = vld [vmem:[%s3127_s9 + $0x4a0] sm:$0xff]  ;;  %v4026_v11 = vld [vmem:[#allocation20_spill] sm:$0xff] }
 0x1c2   : > { %1618 = vst [vmem:[%s3162_s10 + $0x338] sm:$0xff] %v1426_v18  ;;  %v1450_v18 = vmul.f32 %v1258_v16, %v3214_v61  ;;  %v1264_v61 = vld [vmem:[%s3127_s9 + $0x428] sm:$0xff]  ;;  %v1281_v13 = vld [vmem:[%s3127_s9 + $0x4b0] sm:$0xff]  ;;  %v4028_v45 = vld [vmem:[#allocation22_spill] sm:$0xff] }
 0x1c3   : > { %1619 = vst [vmem:[%s3162_s10 + $0x340] sm:$0xff] %v1427_v10  ;;  %v1452_v10 = vmul.f32 %v3405_v14, %v1260_v33  ;;  %v1266_v14 = vld [vmem:[%s3127_s9 + $0x438] sm:$0xff]  ;;  %v1283_v16 = vld [vmem:[%s3127_s9 + $0x4c0] sm:$0xff]  ;;  %v1284_v56 = vld [vmem:[%s3127_s9 + $0x4c8] sm:$0xff] }
 0x1c4   : > { %1620 = vst [vmem:[%s3162_s10 + $0x348] sm:$0xff] %v1428_v4  ;;  %v1454_v4 = vmul.f32 %v3417_v49, %v1262_v22  ;;  %v1268_v49 = vld [vmem:[%s3127_s9 + $0x448] sm:$0xff]  ;;  %v1475_v2 = vmul.f32 %v3543_v31, %v1283_v16  ;;  %v2127_v6 = vld [vmem:[%s2804_s7 + $0xd0] sm:$0xff] }
 0x1c5   : > { %1621 = vst [vmem:[%s3162_s10 + $0x350] sm:$0xff] %v1429_v54  ;;  %v1456_v54 = vmul.f32 %v3429_v41, %v1264_v61  ;;  %v1270_v41 = vld [vmem:[%s3127_s9 + $0x458] sm:$0xff]  ;;  %v2126_v22 = vld [vmem:[%s2804_s7 + $0xc8] sm:$0xff]  ;;  %v1289_v50 = vld [vmem:[%s3127_s9 + $0x4f0] sm:$0xff] }
 0x1c6   : > { %1622 = vst [vmem:[%s3162_s10 + $0x358] sm:$0xff] %v1430_v43  ;;  %v1458_v43 = vmul.f32 %v3441_v12, %v1266_v14  ;;  %v1272_v12 = vld [vmem:[%s3127_s9 + $0x468] sm:$0xff]  ;;  %v1305_v16 = vld [vmem:[%s3127_s9 + $0x570] sm:$0xff] }
 0x1c7   : > { %1623 = vst [vmem:[%s3162_s10 + $0x360] sm:$0xff] %v1431_v3  ;;  %v1460_v3 = vmul.f32 %v3453_v23, %v1268_v49  ;;  %v1274_v23 = vld [vmem:[%s3127_s9 + $0x478] sm:$0xff]  ;;  %v1288_v61 = vld [vmem:[%s3127_s9 + $0x4e8] sm:$0xff]  ;;  %v1291_v49 = vld [vmem:[%s3127_s9 + $0x500] sm:$0xff] }
 0x1c8   : > { %1624 = vst [vmem:[%s3162_s10 + $0x368] sm:$0xff] %v1432_v40  ;;  %v1461_v40 = vmul.f32 %v4017_v29, %v1269_v15  ;;  %v2130_v34 = vld [vmem:[%s2804_s7 + $0xe8] sm:$0xff]  ;;  %v2133_v29 = vld [vmem:[%s2804_s7 + $0x100] sm:$0xff] }
 0x1c9   : > { %1625 = vst [vmem:[%s3162_s10 + $0x370] sm:$0xff] %v1433_v25  ;;  %v1462_v25 = vmul.f32 %v4018_v28, %v1270_v41  ;;  %v2132_v41 = vld [vmem:[%s2804_s7 + $0xf8] sm:$0xff]  ;;  %v2134_v28 = vld [vmem:[%s2804_s7 + $0x108] sm:$0xff] }
 0x1ca   : > { %1626 = vst [vmem:[%s3162_s10 + $0x378] sm:$0xff] %v1434_v60  ;;  %v1463_v60 = vmul.f32 %v4019_v48, %v1271_v53  ;;  %v1293_v53 = vld [vmem:[%s3127_s9 + $0x510] sm:$0xff] }
 0x1cb   : > { %1627 = vst [vmem:[%s3162_s10 + $0x380] sm:$0xff] %v1435_v0  ;;  %v1464_v0 = vmul.f32 %v4020_v36, %v1272_v12  ;;  %v1294_v12 = vld [vmem:[%s3127_s9 + $0x518] sm:$0xff]  ;;  %v2135_v48 = vld [vmem:[%s2804_s7 + $0x110] sm:$0xff] }
 0x1cc   : > { %1628 = vst [vmem:[%s3162_s10 + $0x388] sm:$0xff] %v1436_v9  ;;  %v4021_v9 = vld [vmem:[#allocation15_spill] sm:$0xff]  ;;  %v2136_v36 = vld [vmem:[%s2804_s7 + $0x118] sm:$0xff] }
 0x1cd   : > { %1629 = vst [vmem:[%s3162_s10 + $0x390] sm:$0xff] %v1437_v38  ;;  %v1465_v55 = vmul.f32 %v4021_v9, %v1273_v42  ;;  %v1276_v38 = vld [vmem:[%s3127_s9 + $0x488] sm:$0xff]  ;;  %v1295_v42 = vld [vmem:[%s3127_s9 + $0x520] sm:$0xff] }
 0x1ce   : > { %1630 = vst [vmem:[%s3162_s10 + $0x398] sm:$0xff] %v1438_v63  ;;  %v1466_v63 = vmul.f32 %v4022_v1, %v1274_v23  ;;  %v1296_v23 = vld [vmem:[%s3127_s9 + $0x528] sm:$0xff]  ;;  %v2137_v9 = vld [vmem:[%s2804_s7 + $0x120] sm:$0xff] }
 0x1cf   : > { %1631 = vst [vmem:[%s3162_s10 + $0x3a0] sm:$0xff] %v1439_v26  ;;  %v4023_v26 = vld [vmem:[#allocation17_spill] sm:$0xff]  ;;  %v2138_v1 = vld [vmem:[%s2804_s7 + $0x128] sm:$0xff] }
 0x1d0   : > { %1632 = vst [vmem:[%s3162_s10 + $0x3a8] sm:$0xff] %v1440_v20  ;;  %v1467_v46 = vmul.f32 %v4023_v26, %v1275_v39  ;;  %v1278_v20 = vld [vmem:[%s3127_s9 + $0x498] sm:$0xff]  ;;  %v1297_v39 = vld [vmem:[%s3127_s9 + $0x530] sm:$0xff] }
 0x1d1   : > { %1633 = vst [vmem:[%s3162_s10 + $0x3b0] sm:$0xff] %v1441_v52  ;;  %v1468_v52 = vmul.f32 %v4024_v5, %v1276_v38  ;;  %v1298_v38 = vld [vmem:[%s3127_s9 + $0x538] sm:$0xff]  ;;  %v2139_v26 = vld [vmem:[%s2804_s7 + $0x130] sm:$0xff] }
 0x1d2   : > { %1634 = vst [vmem:[%s3162_s10 + $0x3b8] sm:$0xff] %v1442_v19  ;;  %v4025_v19 = vld [vmem:[#allocation19_spill] sm:$0xff]  ;;  %v2140_v5 = vld [vmem:[%s2804_s7 + $0x138] sm:$0xff] }
 0x1d3   : > { %1635 = vst [vmem:[%s3162_s10 + $0x3c0] sm:$0xff] %v1443_v58  ;;  %v1469_v37 = vmul.f32 %v4025_v19, %v1277_v8  ;;  %v1280_v58 = vld [vmem:[%s3127_s9 + $0x4a8] sm:$0xff]  ;;  %v1299_v8 = vld [vmem:[%s3127_s9 + $0x540] sm:$0xff] }
 0x1d4   : > { %1636 = vst [vmem:[%s3162_s10 + $0x3c8] sm:$0xff] %v1444_v57  ;;  %v1470_v57 = vmul.f32 %v4026_v11, %v1278_v20  ;;  %v1300_v20 = vld [vmem:[%s3127_s9 + $0x548] sm:$0xff]  ;;  %v2141_v19 = vld [vmem:[%s2804_s7 + $0x140] sm:$0xff] }
 0x1d5   : > { %1637 = vst [vmem:[%s3162_s10 + $0x3d0] sm:$0xff] %v1445_v30  ;;  %v4027_v30 = vld [vmem:[#allocation21_spill] sm:$0xff]  ;;  %v2142_v11 = vld [vmem:[%s2804_s7 + $0x148] sm:$0xff] }
 0x1d6   : > { %1638 = vst [vmem:[%s3162_s10 + $0x3d8] sm:$0xff] %v1446_v44  ;;  %v1471_v17 = vmul.f32 %v4027_v30, %v1279_v7  ;;  %v1282_v44 = vld [vmem:[%s3127_s9 + $0x4b8] sm:$0xff]  ;;  %v1301_v7 = vld [vmem:[%s3127_s9 + $0x550] sm:$0xff] }
 0x1d7   : > { %1639 = vst [vmem:[%s3162_s10 + $0x3e0] sm:$0xff] %v1447_v59  ;;  %v1472_v59 = vmul.f32 %v4028_v45, %v1280_v58  ;;  %v1302_v58 = vld [vmem:[%s3127_s9 + $0x558] sm:$0xff]  ;;  %v2143_v30 = vld [vmem:[%s2804_s7 + $0x150] sm:$0xff] }
 0x1d8   : > { %1640 = vst [vmem:[%s3162_s10 + $0x3e8] sm:$0xff] %v1448_v35  ;;  %v1473_v35 = vmul.f32 %v3531_v32, %v1281_v13  ;;  %v1476_v32 = vmul.f32 %v2126_v22, %v1284_v56  ;;  %v1303_v13 = vld [vmem:[%s3127_s9 + $0x560] sm:$0xff]  ;;  %v2144_v45 = vld [vmem:[%s2804_s7 + $0x158] sm:$0xff] }
 0x1d9   : > { %1641 = vst [vmem:[%s3162_s10 + $0x3f0] sm:$0xff] %v1449_v47  ;;  %v4029_v47 = vld [vmem:[#allocation23_spill] sm:$0xff] }
 0x1da   : > { %1642 = vst [vmem:[%s3162_s10 + $0x3f8] sm:$0xff] %v1450_v18  ;;  %v1474_v33 = vmul.f32 %v4029_v47, %v1282_v44  ;;  %v1285_v18 = vld [vmem:[%s3127_s9 + $0x4d0] sm:$0xff]  ;;  %v1304_v44 = vld [vmem:[%s3127_s9 + $0x568] sm:$0xff]  ;;  %v1306_v47 = vld [vmem:[%s3127_s9 + $0x578] sm:$0xff] }
 0x1db   : > { %1643 = vst [vmem:[%s3162_s10 + $0x400] sm:$0xff] %v1451_v24  ;;  %v1286_v24 = vld [vmem:[%s3127_s9 + $0x4d8] sm:$0xff] }
 0x1dc   : > { %1644 = vst [vmem:[%s3162_s10 + $0x408] sm:$0xff] %v1452_v10  ;;  %v1287_v10 = vld [vmem:[%s3127_s9 + $0x4e0] sm:$0xff] }
 0x1dd   : > { %1645 = vst [vmem:[%s3162_s10 + $0x410] sm:$0xff] %v1453_v21  ;;  %v1477_v21 = vmul.f32 %v2127_v6, %v1285_v18 }
 0x1de   : > { %1646 = vst [vmem:[%s3162_s10 + $0x418] sm:$0xff] %v1454_v4  ;;  %v2128_v4 = vld [vmem:[%s2804_s7 + $0xd8] sm:$0xff] }
 0x1df   : > { %1647 = vst [vmem:[%s3162_s10 + $0x420] sm:$0xff] %v1455_v51  ;;  %v1478_v31 = vmul.f32 %v2128_v4, %v1286_v24  ;;  %v2129_v51 = vld [vmem:[%s2804_s7 + $0xe0] sm:$0xff]  ;;  %v2147_v24 = vld [vmem:[%s2804_s7 + $0x170] sm:$0xff] }
 0x1e0   : > { %1648 = vst [vmem:[%s3162_s10 + $0x428] sm:$0xff] %v1456_v54  ;;  %v1479_v14 = vmul.f32 %v2129_v51, %v1287_v10  ;;  %v1290_v54 = vld [vmem:[%s3127_s9 + $0x4f8] sm:$0xff]  ;;  %v1497_v22 = vmul.f32 %v2147_v24, %v1305_v16 }
 0x1e1   : > { %1649 = vst [vmem:[%s3162_s10 + $0x430] sm:$0xff] %v1457_v27  ;;  %v1480_v27 = vmul.f32 %v2130_v34, %v1288_v61  ;;  %v2148_v10 = vld [vmem:[%s2804_s7 + $0x178] sm:$0xff]  ;;  %v2149_v61 = vld [vmem:[%s2804_s7 + $0x180] sm:$0xff] }
 0x1e2   : > { %1650 = vst [vmem:[%s3162_s10 + $0x438] sm:$0xff] %v1458_v43  ;;  %v2131_v43 = vld [vmem:[%s2804_s7 + $0xf0] sm:$0xff]  ;;  %v1498_v6 = vmul.f32 %v2148_v10, %v1306_v47 }
 0x1e3   : > { %1651 = vst [vmem:[%s3162_s10 + $0x440] sm:$0xff] %v1459_v62  ;;  %v1481_v15 = vmul.f32 %v2131_v43, %v1289_v50  ;;  %v1292_v62 = vld [vmem:[%s3127_s9 + $0x508] sm:$0xff] }
 0x1e4   : > { %1652 = vst [vmem:[%s3162_s10 + $0x448] sm:$0xff] %v1460_v3  ;;  %v1482_v3 = vmul.f32 %v2132_v41, %v1290_v54  ;;  %v2150_v50 = vld [vmem:[%s2804_s7 + $0x188] sm:$0xff]  ;;  %v2151_v54 = vld [vmem:[%s2804_s7 + $0x190] sm:$0xff] }
 0x1e5   : > { %1653 = vst [vmem:[%s3162_s10 + $0x450] sm:$0xff] %v1461_v40  ;;  %v1483_v40 = vmul.f32 %v2133_v29, %v1291_v49  ;;  %v2152_v49 = vld [vmem:[%s2804_s7 + $0x198] sm:$0xff] }
 0x1e6   : > { %1654 = vst [vmem:[%s3162_s10 + $0x458] sm:$0xff] %v1462_v25  ;;  %v1484_v25 = vmul.f32 %v2134_v28, %v1292_v62  ;;  %v2153_v62 = vld [vmem:[%s2804_s7 + $0x1a0] sm:$0xff] }
 0x1e7   : > { %1655 = vst [vmem:[%s3162_s10 + $0x460] sm:$0xff] %v1463_v60  ;;  %v1485_v60 = vmul.f32 %v2135_v48, %v1293_v53  ;;  %v2154_v53 = vld [vmem:[%s2804_s7 + $0x1a8] sm:$0xff] }
 0x1e8   : > { %1656 = vst [vmem:[%s3162_s10 + $0x468] sm:$0xff] %v1464_v0  ;;  %v1486_v0 = vmul.f32 %v2136_v36, %v1294_v12  ;;  %v2155_v12 = vld [vmem:[%s2804_s7 + $0x1b0] sm:$0xff] }
 0x1e9   : > { %1657 = vst [vmem:[%s3162_s10 + $0x470] sm:$0xff] %v1465_v55  ;;  %v1487_v55 = vmul.f32 %v2137_v9, %v1295_v42  ;;  %v2156_v42 = vld [vmem:[%s2804_s7 + $0x1b8] sm:$0xff] }
 0x1ea   : > { %1658 = vst [vmem:[%s3162_s10 + $0x478] sm:$0xff] %v1466_v63  ;;  %v1488_v63 = vmul.f32 %v2138_v1, %v1296_v23  ;;  %v2157_v23 = vld [vmem:[%s2804_s7 + $0x1c0] sm:$0xff] }
 0x1eb   : > { %1659 = vst [vmem:[%s3162_s10 + $0x480] sm:$0xff] %v1467_v46  ;;  %v1489_v46 = vmul.f32 %v2139_v26, %v1297_v39  ;;  %v2158_v39 = vld [vmem:[%s2804_s7 + $0x1c8] sm:$0xff] }
 0x1ec   : > { %1660 = vst [vmem:[%s3162_s10 + $0x488] sm:$0xff] %v1468_v52  ;;  %v1490_v52 = vmul.f32 %v2140_v5, %v1298_v38  ;;  %v2159_v38 = vld [vmem:[%s2804_s7 + $0x1d0] sm:$0xff] }
 0x1ed   : > { %1661 = vst [vmem:[%s3162_s10 + $0x490] sm:$0xff] %v1469_v37  ;;  %v1491_v37 = vmul.f32 %v2141_v19, %v1299_v8  ;;  %v2160_v8 = vld [vmem:[%s2804_s7 + $0x1d8] sm:$0xff] }
 0x1ee   : > { %1662 = vst [vmem:[%s3162_s10 + $0x498] sm:$0xff] %v1470_v57  ;;  %v1492_v57 = vmul.f32 %v2142_v11, %v1300_v20  ;;  %v2161_v20 = vld [vmem:[%s2804_s7 + $0x1e0] sm:$0xff]  ;;  %v2164_v11 = vld [vmem:[%s2804_s7 + $0x1f8] sm:$0xff] }
 0x1ef   : > { %1663 = vst [vmem:[%s3162_s10 + $0x4a0] sm:$0xff] %v1471_v17  ;;  %v1493_v17 = vmul.f32 %v2143_v30, %v1301_v7  ;;  %v2162_v7 = vld [vmem:[%s2804_s7 + $0x1e8] sm:$0xff] }
 0x1f0   : > { %1664 = vst [vmem:[%s3162_s10 + $0x4a8] sm:$0xff] %v1472_v59  ;;  %v1494_v59 = vmul.f32 %v2144_v45, %v1302_v58 }
 0x1f1   : > { %1665 = vst [vmem:[%s3162_s10 + $0x4b0] sm:$0xff] %v1473_v35  ;;  %v2145_v35 = vld [vmem:[%s2804_s7 + $0x160] sm:$0xff] }
 0x1f2   : > { %1666 = vst [vmem:[%s3162_s10 + $0x4b8] sm:$0xff] %v1474_v33  ;;  %v1495_v56 = vmul.f32 %v2145_v35, %v1303_v13  ;;  %v2146_v33 = vld [vmem:[%s2804_s7 + $0x168] sm:$0xff] }
 0x1f3   : > { %1667 = vst [vmem:[%s3162_s10 + $0x4c0] sm:$0xff] %v1475_v2  ;;  %v1496_v18 = vmul.f32 %v2146_v33, %v1304_v44  ;;  %v1307_v2 = vld [vmem:[%s3127_s9 + $0x580] sm:$0xff] }
 0x1f4   : > { %1668 = vst [vmem:[%s3162_s10 + $0x4c8] sm:$0xff] %v1476_v32  ;;  %v1308_v32 = vld [vmem:[%s3127_s9 + $0x588] sm:$0xff]  ;;  %v1499_v4 = vmul.f32 %v2149_v61, %v1307_v2 }
 0x1f5   : > { %1669 = vst [vmem:[%s3162_s10 + $0x4d0] sm:$0xff] %v1477_v21  ;;  %v1309_v21 = vld [vmem:[%s3127_s9 + $0x590] sm:$0xff]  ;;  %v1500_v51 = vmul.f32 %v2150_v50, %v1308_v32 }
 0x1f6   : > { %1670 = vst [vmem:[%s3162_s10 + $0x4d8] sm:$0xff] %v1478_v31  ;;  %v1310_v31 = vld [vmem:[%s3127_s9 + $0x598] sm:$0xff]  ;;  %v1501_v34 = vmul.f32 %v2151_v54, %v1309_v21 }
 0x1f7   : > { %1671 = vst [vmem:[%s3162_s10 + $0x4e0] sm:$0xff] %v1479_v14  ;;  %v1311_v14 = vld [vmem:[%s3127_s9 + $0x5a0] sm:$0xff]  ;;  %v1502_v43 = vmul.f32 %v2152_v49, %v1310_v31 }
 0x1f8   : > { %1672 = vst [vmem:[%s3162_s10 + $0x4e8] sm:$0xff] %v1480_v27  ;;  %v1312_v27 = vld [vmem:[%s3127_s9 + $0x5a8] sm:$0xff]  ;;  %v1503_v41 = vmul.f32 %v2153_v62, %v1311_v14 }
 0x1f9   : > { %1673 = vst [vmem:[%s3162_s10 + $0x4f0] sm:$0xff] %v1481_v15  ;;  %v1313_v15 = vld [vmem:[%s3127_s9 + $0x5b0] sm:$0xff]  ;;  %v1504_v29 = vmul.f32 %v2154_v53, %v1312_v27 }
 0x1fa   : > { %1674 = vst [vmem:[%s3162_s10 + $0x4f8] sm:$0xff] %v1482_v3  ;;  %v1314_v3 = vld [vmem:[%s3127_s9 + $0x5b8] sm:$0xff]  ;;  %v1505_v28 = vmul.f32 %v2155_v12, %v1313_v15 }
 0x1fb   : > { %1675 = vst [vmem:[%s3162_s10 + $0x500] sm:$0xff] %v1483_v40  ;;  %v1315_v40 = vld [vmem:[%s3127_s9 + $0x5c0] sm:$0xff]  ;;  %v1506_v48 = vmul.f32 %v2156_v42, %v1314_v3 }
 0x1fc   : > { %1676 = vst [vmem:[%s3162_s10 + $0x508] sm:$0xff] %v1484_v25  ;;  %v1316_v25 = vld [vmem:[%s3127_s9 + $0x5c8] sm:$0xff]  ;;  %v1507_v36 = vmul.f32 %v2157_v23, %v1315_v40 }
 0x1fd   : > { %1677 = vst [vmem:[%s3162_s10 + $0x510] sm:$0xff] %v1485_v60  ;;  %v1317_v60 = vld [vmem:[%s3127_s9 + $0x5d0] sm:$0xff]  ;;  %v1508_v9 = vmul.f32 %v2158_v39, %v1316_v25 }
 0x1fe   : > { %1678 = vst [vmem:[%s3162_s10 + $0x518] sm:$0xff] %v1486_v0  ;;  %v1318_v0 = vld [vmem:[%s3127_s9 + $0x5d8] sm:$0xff]  ;;  %v1509_v1 = vmul.f32 %v2159_v38, %v1317_v60 }
 0x1ff   : > { %1679 = vst [vmem:[%s3162_s10 + $0x520] sm:$0xff] %v1487_v55  ;;  %v1319_v55 = vld [vmem:[%s3127_s9 + $0x5e0] sm:$0xff]  ;;  %v1510_v26 = vmul.f32 %v2160_v8, %v1318_v0 }
 0x200   : > { %1680 = vst [vmem:[%s3162_s10 + $0x528] sm:$0xff] %v1488_v63  ;;  %v1320_v63 = vld [vmem:[%s3127_s9 + $0x5e8] sm:$0xff]  ;;  %v1511_v5 = vmul.f32 %v2161_v20, %v1319_v55 }
 0x201   : > { %1681 = vst [vmem:[%s3162_s10 + $0x530] sm:$0xff] %v1489_v46  ;;  %v1321_v46 = vld [vmem:[%s3127_s9 + $0x5f0] sm:$0xff]  ;;  %v1512_v19 = vmul.f32 %v2162_v7, %v1320_v63 }
 0x202   : > { %1682 = vst [vmem:[%s3162_s10 + $0x538] sm:$0xff] %v1490_v52  ;;  %v1322_v52 = vld [vmem:[%s3127_s9 + $0x5f8] sm:$0xff] }
 0x203   : > { %1683 = vst [vmem:[%s3162_s10 + $0x540] sm:$0xff] %v1491_v37  ;;  %v2163_v37 = vld [vmem:[%s2804_s7 + $0x1f0] sm:$0xff] }
 0x204   : > { %1684 = vst [vmem:[%s3162_s10 + $0x548] sm:$0xff] %v1492_v57  ;;  %v1513_v58 = vmul.f32 %v2163_v37, %v1321_v46  ;;  %v1514_v57 = vmul.f32 %v2164_v11, %v1322_v52 }
 0x205   : > { %1685 = vst [vmem:[%s3162_s10 + $0x550] sm:$0xff] %v1493_v17 }
 0x206   : > { %1686 = vst [vmem:[%s3162_s10 + $0x558] sm:$0xff] %v1494_v59 }
 0x207   : > { %1687 = vst [vmem:[%s3162_s10 + $0x560] sm:$0xff] %v1495_v56 }
 0x208   : > { %1688 = vst [vmem:[%s3162_s10 + $0x568] sm:$0xff] %v1496_v18 }
 0x209   : > { %1689 = vst [vmem:[%s3162_s10 + $0x570] sm:$0xff] %v1497_v22 }
 0x20a   : > { %1690 = vst [vmem:[%s3162_s10 + $0x578] sm:$0xff] %v1498_v6 }
 0x20b   : > { %1691 = vst [vmem:[%s3162_s10 + $0x580] sm:$0xff] %v1499_v4 }
 0x20c   : > { %1692 = vst [vmem:[%s3162_s10 + $0x588] sm:$0xff] %v1500_v51 }
 0x20d   : > { %1693 = vst [vmem:[%s3162_s10 + $0x590] sm:$0xff] %v1501_v34 }
 0x20e   : > { %1694 = vst [vmem:[%s3162_s10 + $0x598] sm:$0xff] %v1502_v43 }
 0x20f   : > { %1695 = vst [vmem:[%s3162_s10 + $0x5a0] sm:$0xff] %v1503_v41 }
 0x210   : > { %1696 = vst [vmem:[%s3162_s10 + $0x5a8] sm:$0xff] %v1504_v29 }
 0x211   : > { %1697 = vst [vmem:[%s3162_s10 + $0x5b0] sm:$0xff] %v1505_v28 }
 0x212   : > { %1698 = vst [vmem:[%s3162_s10 + $0x5b8] sm:$0xff] %v1506_v48 }
 0x213   : > { %1699 = vst [vmem:[%s3162_s10 + $0x5c0] sm:$0xff] %v1507_v36 }
 0x214   : > { %1700 = vst [vmem:[%s3162_s10 + $0x5c8] sm:$0xff] %v1508_v9 }
 0x215   : > { %1701 = vst [vmem:[%s3162_s10 + $0x5d0] sm:$0xff] %v1509_v1 }
 0x216   : > { %1702 = vst [vmem:[%s3162_s10 + $0x5d8] sm:$0xff] %v1510_v26 }
 0x217   : > { %1703 = vst [vmem:[%s3162_s10 + $0x5e0] sm:$0xff] %v1511_v5 }
 0x218   : > { %1704 = vst [vmem:[%s3162_s10 + $0x5e8] sm:$0xff] %v1512_v19 }
 0x219   : > { %1705 = vst [vmem:[%s3162_s10 + $0x5f0] sm:$0xff] %v1513_v58 }
 0x21a   : > { %1706 = vst [vmem:[%s3162_s10 + $0x5f8] sm:$0xff] %v1514_v57 }
 0x21b   : > { %s1907_s13 = sshll.u32 %s2293_s22, 9  ;;  %s1736_s14 = sshll.u32 %s3162_s10, 4  ;;  %s1737_s14 = int_to_ptr.vmem [resolvable:$true] %s1736_s14 }
 0x21c   : > { %s1725_s23 = scalar_lea.hbm %s3915_s4, %s1907_s13  ;;  %s2233_s26 = smov 8192  }
 0x21d   : > { %s1738_s25 = sshll.u32 %s1725_s23, 4  ;;  %1912 = sst [smem:[#allocation8]] (%p2311_p6), %s2233_s26  ;;  %s1739_s25 = int_to_ptr.hbm [resolvable:$true] %s1738_s25 }
 0x21e   : > { %s2234_s30 = smov 32768   ;;  %s2235_s6 = smov 8  }
 0x21f   : > { %1913 = sst [smem:[#allocation8 + $0x1]] (%p2311_p6), %s2234_s30  ;;  %s2236_s22 = smov 1024  }
 0x220   : > { %1914 = sst [smem:[#allocation8 + $0x2]] (%p2311_p6), %s2235_s6  ;;  %s2237_s8 = smov 64  }
 0x221   : > { %1915 = sst [smem:[#allocation8 + $0x3]] (%p2311_p6), %s2236_s22  ;;  %s2238_s9 = smov [#allocation7]  }
 0x222   : > { %1916 = sst [smem:[#allocation8 + $0x4]] (%p2311_p6), %s2236_s22  ;;  %s2239_s10 = smov 0  }
 0x223   : > { %1917 = sst [smem:[#allocation8 + $0x5]] (%p2311_p6), %s2237_s8  ;;  %s1766_s23 = scalar_lea.hbm %s3916_s5, %s1907_s13 }
 0x224   : > { %1918 = dma.general (%p2311_p6), %s1737_s14, 24576, %s1739_s25, %s1708_s11, %s2238_s9, [#allocation8], %s2239_s10, 0  }
 0x225   : > { %s1767_s26 = sshll.u32 %s2804_s7, 4  ;;  %s1769_s30 = sshll.u32 %s1766_s23, 4  ;;  %s1768_s26 = int_to_ptr.vmem [resolvable:$true] %s1767_s26  ;;  %s1770_s30 = int_to_ptr.hbm [resolvable:$true] %s1769_s30 }
 0x226   : > { %s2179_s6 = sshra.s32 %s1770_s30, 4  ;;  %s2185_s11 = scalar_lea.hbm %s3916_s5, 2048  ;;  %s2180_s6 = int_to_ptr.hbm [resolvable:$true] %s2179_s6 }
 0x227   : > { %s2181_s22 = scalar_lea.hbm %s2180_s6, 512  ;;  %p2186_p3 = scmp.lt.s32.totalorder %s2180_s6, %s3916_s5 }
 0x228   : > { %p2182_p0 = scmp.ne.s32.totalorder %s2180_s6, %s2181_s22  ;;  %p2187_p4 = scmp.lt.s32.totalorder %s2185_s11, %s2181_s22 }
 0x22a   : > { %p2183_p1 = pnand %p2182_p0, %p2311_p6  ;;  %p2188_p5 = por %p2187_p4, %p2186_p3 }
 0x22c   : > { %p2184_p2 = pneg %p2183_p1 }
 0x22e   : > { %p2189_p7 = pnand %p2188_p5, %p2184_p2 }
 0x230   : > { %2192 = shalt.err (!%p2189_p7)
}
 0x231   : > { %s2240_s7 = smov 1024   ;;  %s2241_s13 = smov 64  }
 0x232   : > { %s4030_s9 = scalar_lea.sflag [#allocation6], %s2720_s15 }
 0x233   : > { %1919 = dma.vmem_to_hbm [thread:$0]  (%p2311_p6), %s1768_s26, 8192, %s1770_s30, %s4030_s9, %s2240_s7, %s2240_s7, %s2241_s13  }
 0x234 PF: > { %p1929_p9 = scmp.ge.s32.totalorder %s2231_s21, 2  ;;  %s1784_s12 = sand.u32 1, %s2219_s18  }
 0x235   : > { %s1785_s10 = scalar_lea.sflag [#allocation4], %s1784_s12 }
 0x236   : > { %p1923_p10 = pnand %p1929_p9, %p2315_p8 }
 0x238   : > { %p1924_p11 = pneg %p1923_p10 }
 0x23a   : > { %2210 = dma.done.wait (%p1924_p11), %s1785_s10, 24576  }
 0x23b   : > { %2212 = vsyncadd (%p1924_p11), %s1785_s10, 4294942720  ;;  %s1795_s16 = scalar_lea.sflag [#allocation6], %s1784_s12 }
 0x23c   : > { %2214 = dma.done.wait (%p1924_p11), %s1795_s16, 8192  }
 0x23d   : > { %2216 = vsyncadd (%p1924_p11), %s1795_s16, 4294959104  ;;  %p19_p6 = scmp.ge.s32.totalorder %s2297_s24, 6   ;;  %s4031_s18 = smov %s2223_s19 }
 0x23e   : > { %s4032_s19 = smov %s2227_s20  ;;  %s4033_s20 = smov %s2309_s27 }
 0x23f   : > { %s4034_s21 = smov %s2297_s24  ;;  %21 = sbr.rel (!%p19_p6) target bundleno = 5 (0x5), region = 124 }
 0x244   :  { %1801 = vsyncpa [#allocation4], 1 }
 0x245   :  { %1803 = vsyncpa [#allocation4 + $0x1], 1 }
 0x246   :  { %1804 = vsyncpa [#allocation6], 1 }
 0x247   :  { %1806 = vsyncpa [#allocation6 + $0x1], 1 }

// kernel: semantic_attention.2
= control target key start
LH: loop header
LB: loop body
LE: loop exit
PB: predicated region body
PF: predicated region fallthrough
CT: control target
= control target key end

     0   :  { %9 = vsyncpa [#allocation3], 0  ;;  %s4900_s0 = inlined_call_operand.hbm [shape: f32[3,256,1024], index: 0, kind: input, shape index: {}]   ;;  %s4901_s1 = inlined_call_operand.vmem [shape: bf16[1024,128], index: 1, kind: input, shape index: {}]   ;;  %s4902_s2 = inlined_call_operand.hbm [shape: f32[1,128], index: 2, kind: input, shape index: {}]   ;;  %s4903_s3 = inlined_call_operand.vmem [shape: bf16[128,1024], index: 3, kind: input, shape index: {}]   ;;  %s4904_s4 = inlined_call_operand.vmem [shape: bf16[256,1024], index: 4, kind: output, shape index: {}]  }
   0x1   :  { %11 = vsyncpa [#allocation3 + $0x1], 0 }
   0x2   :  { %12 = vsyncpa [#allocation5], 0  ;;  %s3784_s15 = smov 0   ;;  %s3786_s16 = smov 0  }
   0x3   :  { %s3788_s17 = smov 0   ;;  %s3790_s18 = smov 0  }
   0x4 LB: > { %s2912_s19 = sadd.s32 4294967295, %s3750_s18   ;;  %s3804_s20 = sadd.s32 1, %s3750_s18   ;;  %s3750_s18 = sphi %s3790_s18, %s4912_s18   ;;  %s3746_s17 = sphi %s3788_s17, %s4911_s17   ;;  %s3742_s16 = sphi %s3786_s16, %s4910_s16   ;;  %s3738_s15 = sphi %s3784_s15, %s4909_s15  }
   0x5   : > { %s22_s21 = ssub.s32 %s3750_s18, %s3804_s20  ;;  %s25_s22 = sadd.s32 1, %s3746_s17 }
   0x6   : > { %p23_p0 = scmp.eq.s32.totalorder %s22_s21, 0  ;;  %p32_p1 = scmp.ne.s32.totalorder %s3746_s17, %s3742_s16 }
   0x7   : > { %p33_p2 = scmp.eq.s32.totalorder %s3750_s18, 0  ;;  %p38_p3 = scmp.ne.s32.totalorder %s3742_s16, %s3738_s15 }
   0x8   : > { %s3814_s23 = scalar_select %p23_p0, %s3746_s17, %s25_s22  }
   0x9   : > { %p3816_p4 = por %p33_p2, %p32_p1  ;;  %p3822_p5 = scmp.eq.s32.totalorder %s2912_s19, 0 }
   0xa   : > { %p2914_p6 = scmp.ge.s32.totalorder %s3750_s18, 1  ;;  %p138_p7 = scmp.lt.s32.totalorder %s3750_s18, 5 }
   0xb   : > { %p3830_p8 = por %p3822_p5, %p38_p3  ;;  %s153_s30 = sshll.u32 %s4902_s2, 4  ;;  %s154_s30 = int_to_ptr.hbm [resolvable:$true] %s153_s30 }
   0xc   : > { %p3834_p9 = pnand %p2914_p6, %p138_p7  ;;  %s3752_s5 = smov [#allocation4]  }
   0xd   : > { %s155_s6 = sshll.u32 %s3752_s5, 4  ;;  %p2916_p12 = scmp.ge.s32.totalorder %s3750_s18, 4  ;;  %s156_s6 = int_to_ptr.vmem [resolvable:$true] %s155_s6 }
   0xe   : > { %p3587_p10 = pneg %p3834_p9 }
   0xf   : > { %165 = sbr.rel (%p2916_p12) target bundleno = 34 (0x22), region = 28 }
  0x10   : > { %p3588_p11 = pnand %p3587_p10, %p3822_p5 }
  0x12   : > { %3590 = dma.hbm_to_vmem [thread:$0]  (!%p3588_p11), %s154_s30, 16, %s156_s6, [#allocation5]  }
  0x14   : > { %s169_s7 = sand.u32 1, %s3746_s17   ;;  %s3442_s8 = sshll.u32 %s3750_s18, 9 }
  0x15   : > { %s3572_s9 = smul.u32 1536, %s169_s7  ;;  %s179_s12 = scalar_lea.hbm %s4900_s0, %s3442_s8 }
  0x16   : > { %s192_s13 = sshll.u32 %s179_s12, 4  ;;  %s3753_s28 = smov 32768   ;;  %s193_s13 = int_to_ptr.hbm [resolvable:$true] %s192_s13 }
  0x17   : > { %s3576_s14 = scalar_select %p3816_p4, [#allocation0], [#allocation8] }
  0x18   : > { %s173_s15 = scalar_lea.vmem [#allocation2], %s3572_s9  ;;  %3577 = sst [smem:[#allocation7]] (%p3816_p4), %s3753_s28 }
  0x19   : > { %s194_s21 = sshll.u32 %s173_s15, 4  ;;  %s184_s22 = sld [smem:[%s3576_s14]]   ;;  %s195_s21 = int_to_ptr.vmem [resolvable:$true] %s194_s21 }
  0x1a   : > { %s3754_s29 = smov 8192   ;;  %s3755_s30 = smov 8  }
  0x1b   : > { %3578 = sst [smem:[#allocation7 + $0x1]] (%p3816_p4), %s3754_s29  ;;  %s3756_s5 = smov 1024  }
  0x1c   : > { %3579 = sst [smem:[#allocation7 + $0x2]] (%p3816_p4), %s3755_s30  ;;  %s3757_s8 = smov 64  }
  0x1d   : > { %3580 = sst [smem:[#allocation7 + $0x3]] (%p3816_p4), %s3756_s5  ;;  %s170_s10 = scalar_lea.sflag [#allocation3], %s169_s7 }
  0x1e   : > { %3581 = sst [smem:[#allocation7 + $0x4]] (%p3816_p4), %s3756_s5  ;;  %s3758_s11 = smov [#allocation6]  }
  0x1f   : > { %s2920_s6 = sshll.u32 %s184_s22, 26  ;;  %3582 = sst [smem:[#allocation7 + $0x5]] (%p3816_p4), %s3757_s8 }
  0x20   : > { %s2921_s9 = sadd.s32 134217728, %s2920_s6 }
  0x21   : > { %3583 = dma.general (%p3816_p4), %s193_s13, 24576, %s195_s21, %s170_s10, %s3758_s11, [#allocation7], %s2921_s9, 0  }
  0x22 PF: > { %219 = sbr.rel (%p3834_p9) target bundleno = 809 (0x329), region = 36  ;;  %s221_s12 = sand.u32 (!%p3834_p9), 1, %s3742_s16  }
  0x23   : > { %s3573_s14 = smul.u32 (!%p3834_p9), 1536, %s221_s12  ;;  %s222_s15 = scalar_lea.sflag (!%p3834_p9), [#allocation3], %s221_s12 }
  0x25   : > { %s3870_s28 = scalar_lea.vmem (!%p3834_p9), [#allocation2], %s3573_s14 }
  0x27   : > { %3729 = dma.done.wait (%p3830_p8), %s222_s15, 24576  }
  0x28   : > { %3731 = vsyncadd (%p3830_p8), %s222_s15, 4294942720 }
  0x29   : > { %3733 = dma.done.wait (%p3822_p5), [#allocation5], 16  }
  0x2a   : > { %3735 = vsyncadd (%p3822_p5), [#allocation5], 4294967280  ;;  %v3451_v0 = vld [vmem:[%s4901_s1 + $0x38] sm:$0xff]  ;;  %v3450_v4 = vld [vmem:[%s4901_s1 + $0x30] sm:$0xff]  ;;  %s2924_s9 = sshll.u32 %s2912_s19, 3 }
  0x2b   : > { %v3459_v1 = vld [vmem:[%s4901_s1 + $0x78] sm:$0xff]  ;;  %1549 = vmatpush.bf16.msra.mxu0 %v3451_v0  ;;  %v3458_v5 = vld [vmem:[%s4901_s1 + $0x70] sm:$0xff]  ;;  %v3449_v8 = vld [vmem:[%s4901_s1 + $0x28] sm:$0xff]  ;;  %p259_p13 = scmp.lt.s32.totalorder %s2924_s9, 31 }
  0x2c   : > { %v3467_v2 = vld [vmem:[%s4901_s1 + $0xb8] sm:$0xff]  ;;  %1618 = vmatpush.bf16.msra.mxu1 %v3459_v1  ;;  %v3466_v6 = vld [vmem:[%s4901_s1 + $0xb0] sm:$0xff]  ;;  %v3457_v9 = vld [vmem:[%s4901_s1 + $0x68] sm:$0xff] }
  0x2d   : > { %v3475_v3 = vld [vmem:[%s4901_s1 + $0xf8] sm:$0xff]  ;;  %1687 = vmatpush.bf16.msra.mxu2 %v3467_v2  ;;  %v3474_v7 = vld [vmem:[%s4901_s1 + $0xf0] sm:$0xff]  ;;  %v3465_v10 = vld [vmem:[%s4901_s1 + $0xa8] sm:$0xff]  ;;  %s4914_s9 = smov (!%p259_p13, %s2924_s9), 31 }
  0x2e   : > { %1756 = vmatpush.bf16.msra.mxu3 %v3475_v3  ;;  %v3473_v11 = vld [vmem:[%s4901_s1 + $0xe8] sm:$0xff]  ;;  %v3448_v12 = vld [vmem:[%s4901_s1 + $0x20] sm:$0xff]  ;;  %v3447_v16 = vld [vmem:[%s4901_s1 + $0x18] sm:$0xff]  ;;  %s3443_s10 = sshll.u32 %s4914_s9, 5 }
  0x2f   : > { %1550 = vmatpush.bf16.msra.mxu0 %v3450_v4  ;;  %v3456_v13 = vld [vmem:[%s4901_s1 + $0x60] sm:$0xff]  ;;  %v3455_v17 = vld [vmem:[%s4901_s1 + $0x58] sm:$0xff]  ;;  %v3446_v20 = vld [vmem:[%s4901_s1 + $0x10] sm:$0xff]  ;;  %s4853_s14 = scalar_lea.vmem %s4904_s4, %s3443_s10 }
  0x30   : > { %1619 = vmatpush.bf16.msra.mxu1 %v3458_v5  ;;  %v3464_v14 = vld [vmem:[%s4901_s1 + $0xa0] sm:$0xff]  ;;  %v3463_v18 = vld [vmem:[%s4901_s1 + $0x98] sm:$0xff]  ;;  %v3454_v21 = vld [vmem:[%s4901_s1 + $0x50] sm:$0xff] }
  0x31   : > { %1688 = vmatpush.bf16.msra.mxu2 %v3466_v6  ;;  %v3472_v15 = vld [vmem:[%s4901_s1 + $0xe0] sm:$0xff]  ;;  %v3471_v19 = vld [vmem:[%s4901_s1 + $0xd8] sm:$0xff]  ;;  %v3462_v22 = vld [vmem:[%s4901_s1 + $0x90] sm:$0xff] }
  0x32   : > { %1757 = vmatpush.bf16.msra.mxu3 %v3474_v7  ;;  %v3470_v23 = vld [vmem:[%s4901_s1 + $0xd0] sm:$0xff]  ;;  %v265_v24 = vld [vmem:[%s3870_s28] sm:$0xff]  ;;  %v266_v25 = vld [vmem:[%s3870_s28 + $0x8] sm:$0xff] }
  0x33   : > { %1551 = vmatpush.bf16.msra.mxu0 %v3449_v8  ;;  %v273_v26 = vld [vmem:[%s3870_s28 + $0x40] sm:$0xff]  ;;  %v274_v27 = vld [vmem:[%s3870_s28 + $0x48] sm:$0xff]  ;;  %v267_v28 = vld [vmem:[%s3870_s28 + $0x10] sm:$0xff]  ;;  %v457_v32 = vpack.c.bf16 %v266_v25, %v265_v24 }
  0x34   : > { %1620 = vmatpush.bf16.msra.mxu1 %v3457_v9  ;;  %v268_v29 = vld [vmem:[%s3870_s28 + $0x18] sm:$0xff]  ;;  %v275_v30 = vld [vmem:[%s3870_s28 + $0x50] sm:$0xff]  ;;  %v461_v33 = vpack.c.bf16 %v274_v27, %v273_v26  ;;  %v3445_v34 = vld [vmem:[%s4901_s1 + $0x8] sm:$0xff] }
  0x35   : > { %1689 = vmatpush.bf16.msra.mxu2 %v3465_v10  ;;  %v276_v31 = vld [vmem:[%s3870_s28 + $0x58] sm:$0xff]  ;;  %v3453_v35 = vld [vmem:[%s4901_s1 + $0x48] sm:$0xff]  ;;  %v458_v36 = vpack.c.bf16 %v268_v29, %v267_v28  ;;  %v781_v40 = vunpack.c.l.b16 %v457_v32  ;;  %v782_v42 = vunpack.c.h.b16 %v457_v32  ;;  %v3444_v44 = vld [vmem:[%s4901_s1] sm:$0xff] }
  0x36   : > { %1758 = vmatpush.bf16.msra.mxu3 %v3473_v11  ;;  %v462_v37 = vpack.c.bf16 %v276_v31, %v275_v30  ;;  %v3461_v38 = vld [vmem:[%s4901_s1 + $0x88] sm:$0xff]  ;;  %v789_v41 = vunpack.c.l.b16 %v461_v33  ;;  %v790_v43 = vunpack.c.h.b16 %v461_v33  ;;  %v3452_v45 = vld [vmem:[%s4901_s1 + $0x40] sm:$0xff]  ;;  %v3499_v52 = vld [vmem:[%s4901_s1 + $0x1b8] sm:$0xff] }
  0x37   : > { %1552 = vmatpush.bf16.msra.mxu0 %v3448_v12  ;;  %v3469_v39 = vld [vmem:[%s4901_s1 + $0xc8] sm:$0xff]  ;;  %v783_v46 = vunpack.c.l.b16 %v458_v36  ;;  %v784_v48 = vunpack.c.h.b16 %v458_v36  ;;  %v3460_v50 = vld [vmem:[%s4901_s1 + $0x80] sm:$0xff]  ;;  %v3483_v53 = vld [vmem:[%s4901_s1 + $0x138] sm:$0xff] }
  0x38   : > { %1621 = vmatpush.bf16.msra.mxu1 %v3456_v13  ;;  %v791_v47 = vunpack.c.l.b16 %v462_v37  ;;  %v792_v49 = vunpack.c.h.b16 %v462_v37  ;;  %v3468_v51 = vld [vmem:[%s4901_s1 + $0xc0] sm:$0xff]  ;;  %v973_v54 = vpack.c.b16 %v789_v41, %v781_v40  ;;  %v974_v55 = vpack.c.b16 %v790_v43, %v782_v42  ;;  %v3507_v58 = vld [vmem:[%s4901_s1 + $0x1f8] sm:$0xff]  ;;  %v3498_v61 = vld [vmem:[%s4901_s1 + $0x1b0] sm:$0xff] }
  0x39   : > { %1690 = vmatpush.bf16.msra.mxu2 %v3464_v14  ;;  %v3491_v59 = vld [vmem:[%s4901_s1 + $0x178] sm:$0xff]  ;;  %v281_v60 = vld [vmem:[%s3870_s28 + $0x80] sm:$0xff]  ;;  %v3482_v62 = vld [vmem:[%s4901_s1 + $0x130] sm:$0xff] }
  0x3a   : > { %1759 = vmatpush.bf16.msra.mxu3 %v3472_v15  ;;  %v975_v56 = vpack.c.b16 %v791_v47, %v783_v46  ;;  %v976_v57 = vpack.c.b16 %v792_v49, %v784_v48  ;;  %v282_v63 = vld [vmem:[%s3870_s28 + $0x88] sm:$0xff]  ;;  %v289_v0 = vld [vmem:[%s3870_s28 + $0xc0] sm:$0xff]  ;;  %v283_v2 = vld [vmem:[%s3870_s28 + $0x90] sm:$0xff] }
  0x3b   : > { %1553 = vmatpush.bf16.msra.mxu0 %v3447_v16  ;;  %v290_v1 = vld [vmem:[%s3870_s28 + $0xc8] sm:$0xff]  ;;  %v284_v3 = vld [vmem:[%s3870_s28 + $0x98] sm:$0xff]  ;;  %v291_v4 = vld [vmem:[%s3870_s28 + $0xd0] sm:$0xff]  ;;  %v465_v8 = vpack.c.bf16 %v282_v63, %v281_v60 }
  0x3c   : > { %1622 = vmatpush.bf16.msra.mxu1 %v3455_v17  ;;  %v292_v5 = vld [vmem:[%s3870_s28 + $0xd8] sm:$0xff]  ;;  %v3506_v6 = vld [vmem:[%s4901_s1 + $0x1f0] sm:$0xff]  ;;  %v469_v9 = vpack.c.bf16 %v290_v1, %v289_v0  ;;  %v466_v10 = vpack.c.bf16 %v284_v3, %v283_v2  ;;  %v297_v24 = vld [vmem:[%s3870_s28 + $0x100] sm:$0xff] }
  0x3d   : > { %1691 = vmatpush.bf16.msra.mxu2 %v3463_v18  ;;  %v3490_v7 = vld [vmem:[%s4901_s1 + $0x170] sm:$0xff]  ;;  %v470_v11 = vpack.c.bf16 %v292_v5, %v291_v4  ;;  %v797_v12 = vunpack.c.l.b16 %v465_v8  ;;  %v798_v14 = vunpack.c.h.b16 %v465_v8  ;;  %v298_v25 = vld [vmem:[%s3870_s28 + $0x108] sm:$0xff]  ;;  %v305_v26 = vld [vmem:[%s3870_s28 + $0x140] sm:$0xff] }
  0x3e   : > { %1760 = vmatpush.bf16.msra.mxu3 %v3471_v19  ;;  %v805_v13 = vunpack.c.l.b16 %v469_v9  ;;  %v806_v15 = vunpack.c.h.b16 %v469_v9  ;;  %v799_v16 = vunpack.c.l.b16 %v466_v10  ;;  %v800_v18 = vunpack.c.h.b16 %v466_v10  ;;  %v306_v27 = vld [vmem:[%s3870_s28 + $0x148] sm:$0xff]  ;;  %v299_v28 = vld [vmem:[%s3870_s28 + $0x110] sm:$0xff]  ;;  %v300_v29 = vld [vmem:[%s3870_s28 + $0x118] sm:$0xff] }
  0x3f   : > { %1554 = vmatpush.bf16.msra.mxu0 %v3446_v20  ;;  %v807_v17 = vunpack.c.l.b16 %v470_v11  ;;  %v808_v19 = vunpack.c.h.b16 %v470_v11  ;;  %v3497_v30 = vld [vmem:[%s4901_s1 + $0x1a8] sm:$0xff]  ;;  %v307_v33 = vld [vmem:[%s3870_s28 + $0x150] sm:$0xff]  ;;  %v473_v36 = vpack.c.bf16 %v298_v25, %v297_v24  ;;  %v477_v37 = vpack.c.bf16 %v306_v27, %v305_v26  ;;  %v3504_v60 = vld [vmem:[%s4901_s1 + $0x1e0] sm:$0xff] }
  0x40   : > { %1623 = vmatpush.bf16.msra.mxu1 %v3454_v21  ;;  %v981_v20 = vpack.c.b16 %v805_v13, %v797_v12  ;;  %v982_v21 = vpack.c.b16 %v806_v15, %v798_v14  ;;  %v3481_v31 = vld [vmem:[%s4901_s1 + $0x128] sm:$0xff]  ;;  %v3488_v63 = vld [vmem:[%s4901_s1 + $0x160] sm:$0xff] }
  0x41   : > { %1692 = vmatpush.bf16.msra.mxu2 %v3462_v22  ;;  %v983_v22 = vpack.c.b16 %v807_v17, %v799_v16  ;;  %v3505_v32 = vld [vmem:[%s4901_s1 + $0x1e8] sm:$0xff]  ;;  %v813_v40 = vunpack.c.l.b16 %v473_v36  ;;  %v821_v41 = vunpack.c.l.b16 %v477_v37  ;;  %v814_v42 = vunpack.c.h.b16 %v473_v36  ;;  %v329_v16 = vld [vmem:[%s3870_s28 + $0x200] sm:$0xff] }
  0x42   : > { %1761 = vmatpush.bf16.msra.mxu3 %v3470_v23  ;;  %v984_v23 = vpack.c.b16 %v808_v19, %v800_v18  ;;  %v822_v43 = vunpack.c.h.b16 %v477_v37  ;;  %v330_v17 = vld [vmem:[%s3870_s28 + $0x208] sm:$0xff]  ;;  %v337_v18 = vld [vmem:[%s3870_s28 + $0x240] sm:$0xff] }
  0x43   : > { %1555 = vmatpush.bf16.msra.mxu0 %v3445_v34  ;;  %v308_v34 = vld [vmem:[%s3870_s28 + $0x158] sm:$0xff]  ;;  %v989_v48 = vpack.c.b16 %v821_v41, %v813_v40  ;;  %v338_v19 = vld [vmem:[%s3870_s28 + $0x248] sm:$0xff]  ;;  %v489_v24 = vpack.c.bf16 %v330_v17, %v329_v16  ;;  %v345_v40 = vld [vmem:[%s3870_s28 + $0x280] sm:$0xff] }
  0x44   : > { %1624 = vmatpush.bf16.msra.mxu1 %v3453_v35  ;;  %v3489_v35 = vld [vmem:[%s4901_s1 + $0x168] sm:$0xff]  ;;  %v990_v49 = vpack.c.b16 %v822_v43, %v814_v42  ;;  %v493_v25 = vpack.c.bf16 %v338_v19, %v337_v18  ;;  %v353_v42 = vld [vmem:[%s3870_s28 + $0x2c0] sm:$0xff] }
  0x45   : > { %1693 = vmatpush.bf16.msra.mxu2 %v3461_v38  ;;  %v474_v38 = vpack.c.bf16 %v300_v29, %v299_v28  ;;  %v845_v28 = vunpack.c.l.b16 %v489_v24  ;;  %v346_v41 = vld [vmem:[%s3870_s28 + $0x288] sm:$0xff] }
  0x46   : > { %1762 = vmatpush.bf16.msra.mxu3 %v3469_v39  ;;  %v478_v39 = vpack.c.bf16 %v308_v34, %v307_v33  ;;  %v853_v29 = vunpack.c.l.b16 %v493_v25  ;;  %v354_v43 = vld [vmem:[%s3870_s28 + $0x2c8] sm:$0xff] }
  0x47   : > { %1556 = vmatpush.bf16.msra.mxu0 %v3444_v44  ;;  %v815_v44 = vunpack.c.l.b16 %v474_v38  ;;  %v816_v46 = vunpack.c.h.b16 %v474_v38 }
  0x48   : > { %1625 = vmatpush.bf16.msra.mxu1 %v3452_v45  ;;  %v823_v45 = vunpack.c.l.b16 %v478_v39  ;;  %v824_v47 = vunpack.c.h.b16 %v478_v39  ;;  %v1005_v36 = vpack.c.b16 %v853_v29, %v845_v28 }
  0x49   : > { %1694 = vmatpush.bf16.msra.mxu2 %v3460_v50 }
  0x4a   : > { %1763 = vmatpush.bf16.msra.mxu3 %v3468_v51  ;;  %1557 = vmatmul.bf16.vlgmr.msra.gmra.mxu0 %v973_v54  ;;  %v991_v50 = vpack.c.b16 %v823_v45, %v815_v44  ;;  %v992_v51 = vpack.c.b16 %v824_v47, %v816_v46  ;;  %v321_v54 = vld [vmem:[%s3870_s28 + $0x1c0] sm:$0xff]  ;;  %v347_v44 = vld [vmem:[%s3870_s28 + $0x290] sm:$0xff]  ;;  %v348_v45 = vld [vmem:[%s3870_s28 + $0x298] sm:$0xff] }
  0x4b   : > { %1825 = vmatpush.bf16.msrb.mxu0 %v3483_v53  ;;  %1626 = vmatmul.bf16.vlgmr.msra.gmra.mxu1 %v974_v55  ;;  %v314_v53 = vld [vmem:[%s3870_s28 + $0x188] sm:$0xff]  ;;  %v3495_v46 = vld [vmem:[%s4901_s1 + $0x198] sm:$0xff] }
  0x4c   : > { %1695 = vmatmul.bf16.vlgmr.msra.gmra.mxu2 %v975_v56  ;;  %1894 = vmatpush.bf16.msrb.mxu1 %v3491_v59  ;;  %v322_v55 = vld [vmem:[%s3870_s28 + $0x1c8] sm:$0xff]  ;;  %v315_v56 = vld [vmem:[%s3870_s28 + $0x190] sm:$0xff]  ;;  %v3480_v59 = vld [vmem:[%s4901_s1 + $0x120] sm:$0xff] }
  0x4d   : > { %1963 = vmatpush.bf16.msrb.mxu2 %v3499_v52  ;;  %1764 = vmatmul.bf16.vlgmr.msra.gmra.mxu3 %v976_v57  ;;  %v313_v52 = vld [vmem:[%s3870_s28 + $0x180] sm:$0xff]  ;;  %v316_v57 = vld [vmem:[%s3870_s28 + $0x198] sm:$0xff]  ;;  %v485_v1 = vpack.c.bf16 %v322_v55, %v321_v54  ;;  %v498_v54 = vpack.c.bf16 %v348_v45, %v347_v44 }
  0x4e   : > { %2032 = vmatpush.bf16.msrb.mxu3 %v3507_v58  ;;  %v3496_v58 = vld [vmem:[%s4901_s1 + $0x1a0] sm:$0xff]  ;;  %v481_v0 = vpack.c.bf16 %v314_v53, %v313_v52  ;;  %v482_v2 = vpack.c.bf16 %v316_v57, %v315_v56  ;;  %v3479_v47 = vld [vmem:[%s4901_s1 + $0x118] sm:$0xff]  ;;  %v497_v52 = vpack.c.bf16 %v346_v41, %v345_v40  ;;  %v501_v53 = vpack.c.bf16 %v354_v43, %v353_v42 }
  0x4f   : > { %1826 = vmatpush.bf16.msrb.mxu0 %v3482_v62  ;;  %v324_v62 = vld [vmem:[%s3870_s28 + $0x1d8] sm:$0xff]  ;;  %v837_v5 = vunpack.c.l.b16 %v485_v1 }
  0x50   : > { %1895 = vmatpush.bf16.msrb.mxu1 %v3490_v7  ;;  %v829_v4 = vunpack.c.l.b16 %v481_v0  ;;  %v838_v7 = vunpack.c.h.b16 %v485_v1  ;;  %v831_v8 = vunpack.c.l.b16 %v482_v2  ;;  %v832_v10 = vunpack.c.h.b16 %v482_v2 }
  0x51   : > { %1964 = vmatpush.bf16.msrb.mxu2 %v3498_v61  ;;  %v323_v61 = vld [vmem:[%s3870_s28 + $0x1d0] sm:$0xff]  ;;  %v861_v56 = vunpack.c.l.b16 %v497_v52  ;;  %v869_v57 = vunpack.c.l.b16 %v501_v53 }
  0x52   : > { %2033 = vmatpush.bf16.msrb.mxu3 %v3506_v6  ;;  %v486_v3 = vpack.c.bf16 %v324_v62, %v323_v61  ;;  %v830_v6 = vunpack.c.h.b16 %v481_v0  ;;  %v997_v12 = vpack.c.b16 %v837_v5, %v829_v4  ;;  %v864_v62 = vunpack.c.h.b16 %v498_v54  ;;  %v361_v4 = vld [vmem:[%s3870_s28 + $0x300] sm:$0xff]  ;;  %v362_v5 = vld [vmem:[%s3870_s28 + $0x308] sm:$0xff] }
  0x53   : > { %1827 = vmatpush.bf16.msrb.mxu0 %v3481_v31  ;;  %v854_v31 = vunpack.c.h.b16 %v493_v25  ;;  %v1013_v0 = vpack.c.b16 %v869_v57, %v861_v56  ;;  %v505_v16 = vpack.c.bf16 %v362_v5, %v361_v4  ;;  %v393_v56 = vld [vmem:[%s3870_s28 + $0x400] sm:$0xff]  ;;  %v394_v57 = vld [vmem:[%s3870_s28 + $0x408] sm:$0xff] }
  0x54   : > { %1896 = vmatpush.bf16.msrb.mxu1 %v3489_v35  ;;  %v839_v9 = vunpack.c.l.b16 %v486_v3  ;;  %v840_v11 = vunpack.c.h.b16 %v486_v3  ;;  %v998_v13 = vpack.c.b16 %v838_v7, %v830_v6  ;;  %v369_v6 = vld [vmem:[%s3870_s28 + $0x340] sm:$0xff]  ;;  %v370_v7 = vld [vmem:[%s3870_s28 + $0x348] sm:$0xff] }
  0x55   : > { %1965 = vmatpush.bf16.msrb.mxu2 %v3497_v30  ;;  %v846_v30 = vunpack.c.h.b16 %v489_v24  ;;  %v509_v17 = vpack.c.bf16 %v370_v7, %v369_v6  ;;  %v3485_v7 = vld [vmem:[%s4901_s1 + $0x148] sm:$0xff] }
  0x56   : > { %2034 = vmatpush.bf16.msrb.mxu3 %v3505_v32  ;;  %v999_v14 = vpack.c.b16 %v839_v9, %v831_v8  ;;  %v1000_v15 = vpack.c.b16 %v840_v11, %v832_v10  ;;  %v363_v8 = vld [vmem:[%s3870_s28 + $0x310] sm:$0xff]  ;;  %v364_v9 = vld [vmem:[%s3870_s28 + $0x318] sm:$0xff] }
  0x57   : > { %1828 = vmatpush.bf16.msrb.mxu0 %v3480_v59  ;;  %v1006_v37 = vpack.c.b16 %v854_v31, %v846_v30  ;;  %v870_v59 = vunpack.c.h.b16 %v501_v53  ;;  %v3494_v10 = vld [vmem:[%s4901_s1 + $0x190] sm:$0xff]  ;;  %v506_v18 = vpack.c.bf16 %v364_v9, %v363_v8 }
  0x58   : > { %1897 = vmatpush.bf16.msrb.mxu1 %v3488_v63  ;;  %v3478_v11 = vld [vmem:[%s4901_s1 + $0x110] sm:$0xff] }
  0x59   : > { %1966 = vmatpush.bf16.msrb.mxu2 %v3496_v58  ;;  %v862_v58 = vunpack.c.h.b16 %v497_v52  ;;  %v879_v24 = vunpack.c.l.b16 %v506_v18 }
  0x5a   : > { %1562 = vmatmul.bf16.gmra.mxu0 %v981_v20  ;;  %2035 = vmatpush.bf16.msrb.mxu3 %v3504_v60  ;;  %v331_v20 = vld [vmem:[%s3870_s28 + $0x210] sm:$0xff]  ;;  %v863_v60 = vunpack.c.l.b16 %v498_v54 }
  0x5b   : > { %1631 = vmatmul.bf16.gmra.mxu1 %v982_v21  ;;  %v332_v21 = vld [vmem:[%s3870_s28 + $0x218] sm:$0xff]  ;;  %1829 = vmatpush.bf16.msrb.mxu0 %v3479_v47  ;;  %v1014_v1 = vpack.c.b16 %v870_v59, %v862_v58  ;;  %v401_v58 = vld [vmem:[%s3870_s28 + $0x440] sm:$0xff]  ;;  %v402_v59 = vld [vmem:[%s3870_s28 + $0x448] sm:$0xff] }
  0x5c   : > { %1700 = vmatmul.bf16.gmra.mxu2 %v983_v22  ;;  %v339_v22 = vld [vmem:[%s3870_s28 + $0x250] sm:$0xff]  ;;  %v490_v26 = vpack.c.bf16 %v332_v21, %v331_v20  ;;  %v877_v20 = vunpack.c.l.b16 %v505_v16  ;;  %v885_v21 = vunpack.c.l.b16 %v509_v17  ;;  %v525_v4 = vpack.c.bf16 %v402_v59, %v401_v58 }
  0x5d   : > { %1769 = vmatmul.bf16.gmra.mxu3 %v984_v23  ;;  %v340_v23 = vld [vmem:[%s3870_s28 + $0x258] sm:$0xff]  ;;  %1967 = vmatpush.bf16.msrb.mxu2 %v3495_v46 }
  0x5e   : > { %v494_v27 = vpack.c.bf16 %v340_v23, %v339_v22  ;;  %v847_v32 = vunpack.c.l.b16 %v490_v26  ;;  %v848_v34 = vunpack.c.h.b16 %v490_v26  ;;  %v878_v22 = vunpack.c.h.b16 %v505_v16  ;;  %v4132_v16 = vld [vmem:[#allocation4] ss:$0 sm:$0xff] }
  0x5f   : > { %1830 = vmatpush.bf16.msrb.mxu0 %v3478_v11  ;;  %v886_v23 = vunpack.c.h.b16 %v509_v17  ;;  %v880_v26 = vunpack.c.h.b16 %v506_v18  ;;  %v1021_v28 = vpack.c.b16 %v885_v21, %v877_v20  ;;  %v917_v9 = vunpack.c.l.b16 %v525_v4 }
  0x60   : > { %v855_v33 = vunpack.c.l.b16 %v494_v27  ;;  %v856_v35 = vunpack.c.h.b16 %v494_v27  ;;  %v918_v11 = vunpack.c.h.b16 %v525_v4 }
  0x61   : > { %1968 = vmatpush.bf16.msrb.mxu2 %v3494_v10  ;;  %v1022_v29 = vpack.c.b16 %v886_v23, %v878_v22 }
  0x62   : > { %v1007_v38 = vpack.c.b16 %v855_v33, %v847_v32  ;;  %v1008_v39 = vpack.c.b16 %v856_v35, %v848_v34  ;;  %v377_v32 = vld [vmem:[%s3870_s28 + $0x380] sm:$0xff]  ;;  %v378_v33 = vld [vmem:[%s3870_s28 + $0x388] sm:$0xff] }
  0x63   : > { %v385_v34 = vld [vmem:[%s3870_s28 + $0x3c0] sm:$0xff]  ;;  %v386_v35 = vld [vmem:[%s3870_s28 + $0x3c8] sm:$0xff]  ;;  %v513_v40 = vpack.c.bf16 %v378_v33, %v377_v32  ;;  %v420_v32 = vld [vmem:[%s3870_s28 + $0x4d8] sm:$0xff] }
  0x64   : > { %v517_v41 = vpack.c.bf16 %v386_v35, %v385_v34 }
  0x65   : > { %v893_v44 = vunpack.c.l.b16 %v513_v40  ;;  %v894_v46 = vunpack.c.h.b16 %v513_v40 }
  0x66   : > { %v901_v45 = vunpack.c.l.b16 %v517_v41  ;;  %v902_v47 = vunpack.c.h.b16 %v517_v41 }
  0x68   : > { %v1029_v52 = vpack.c.b16 %v901_v45, %v893_v44  ;;  %v1030_v53 = vpack.c.b16 %v902_v47, %v894_v46 }
  0x6a   : > { %1567 = vmatmul.bf16.gmra.mxu0 %v989_v48  ;;  %v3503_v48 = vld [vmem:[%s4901_s1 + $0x1d8] sm:$0xff] }
  0x6b   : > { %1636 = vmatmul.bf16.gmra.mxu1 %v990_v49  ;;  %v355_v49 = vld [vmem:[%s3870_s28 + $0x2d0] sm:$0xff]  ;;  %2036 = vmatpush.bf16.msrb.mxu3 %v3503_v48 }
  0x6c   : > { %1705 = vmatmul.bf16.gmra.mxu2 %v991_v50  ;;  %v356_v50 = vld [vmem:[%s3870_s28 + $0x2d8] sm:$0xff] }
  0x6d   : > { %1774 = vmatmul.bf16.gmra.mxu3 %v992_v51  ;;  %v3487_v51 = vld [vmem:[%s4901_s1 + $0x158] sm:$0xff]  ;;  %v502_v55 = vpack.c.bf16 %v356_v50, %v355_v49 }
  0x6e   : > { %1898 = vmatpush.bf16.msrb.mxu1 %v3487_v51 }
  0x6f   : > { %v871_v61 = vunpack.c.l.b16 %v502_v55  ;;  %v872_v63 = vunpack.c.h.b16 %v502_v55 }
  0x71   : > { %v1015_v2 = vpack.c.b16 %v871_v61, %v863_v60  ;;  %v1016_v3 = vpack.c.b16 %v872_v63, %v864_v62  ;;  %v395_v60 = vld [vmem:[%s3870_s28 + $0x410] sm:$0xff]  ;;  %v3493_v61 = vld [vmem:[%s4901_s1 + $0x188] sm:$0xff] }
  0x72   : > { %v3477_v62 = vld [vmem:[%s4901_s1 + $0x108] sm:$0xff]  ;;  %1969 = vmatpush.bf16.msrb.mxu2 %v3493_v61 }
  0x73   : > { %v3501_v63 = vld [vmem:[%s4901_s1 + $0x1c8] sm:$0xff]  ;;  %1831 = vmatpush.bf16.msrb.mxu0 %v3477_v62 }
  0x7a   : > { %1572 = vmatmul.bf16.gmra.mxu0 %v997_v12  ;;  %v3502_v12 = vld [vmem:[%s4901_s1 + $0x1d0] sm:$0xff] }
  0x7b   : > { %1641 = vmatmul.bf16.gmra.mxu1 %v998_v13  ;;  %v371_v13 = vld [vmem:[%s3870_s28 + $0x350] sm:$0xff]  ;;  %2037 = vmatpush.bf16.msrb.mxu3 %v3502_v12 }
  0x7c   : > { %1710 = vmatmul.bf16.gmra.mxu2 %v999_v14  ;;  %v372_v14 = vld [vmem:[%s3870_s28 + $0x358] sm:$0xff] }
  0x7d   : > { %1779 = vmatmul.bf16.gmra.mxu3 %v1000_v15  ;;  %v3486_v15 = vld [vmem:[%s4901_s1 + $0x150] sm:$0xff]  ;;  %v510_v19 = vpack.c.bf16 %v372_v14, %v371_v13 }
  0x7e   : > { %1899 = vmatpush.bf16.msrb.mxu1 %v3486_v15 }
  0x7f   : > { %v887_v25 = vunpack.c.l.b16 %v510_v19  ;;  %v888_v27 = vunpack.c.h.b16 %v510_v19  ;;  %2038 = vmatpush.bf16.msrb.mxu3 %v3501_v63 }
  0x81   : > { %v1023_v30 = vpack.c.b16 %v887_v25, %v879_v24  ;;  %v1024_v31 = vpack.c.b16 %v888_v27, %v880_v26  ;;  %v409_v25 = vld [vmem:[%s3870_s28 + $0x480] sm:$0xff]  ;;  %v410_v26 = vld [vmem:[%s3870_s28 + $0x488] sm:$0xff] }
  0x82   : > { %1900 = vmatpush.bf16.msrb.mxu1 %v3485_v7  ;;  %v417_v27 = vld [vmem:[%s3870_s28 + $0x4c0] sm:$0xff]  ;;  %v529_v33 = vpack.c.bf16 %v410_v26, %v409_v25 }
  0x83   : > { %v433_v7 = vld [vmem:[%s3870_s28 + $0x540] sm:$0xff] }
  0x84   : > { %v925_v44 = vunpack.c.l.b16 %v529_v33  ;;  %v926_v47 = vunpack.c.h.b16 %v529_v33 }
  0x8a   : > { %1577 = vmatmul.bf16.gmra.mxu0 %v1005_v36  ;;  %v379_v36 = vld [vmem:[%s3870_s28 + $0x390] sm:$0xff] }
  0x8b   : > { %1646 = vmatmul.bf16.gmra.mxu1 %v1006_v37  ;;  %v380_v37 = vld [vmem:[%s3870_s28 + $0x398] sm:$0xff] }
  0x8c   : > { %1715 = vmatmul.bf16.gmra.mxu2 %v1007_v38  ;;  %v387_v38 = vld [vmem:[%s3870_s28 + $0x3d0] sm:$0xff]  ;;  %v514_v42 = vpack.c.bf16 %v380_v37, %v379_v36 }
  0x8d   : > { %1784 = vmatmul.bf16.gmra.mxu3 %v1008_v39  ;;  %v388_v39 = vld [vmem:[%s3870_s28 + $0x3d8] sm:$0xff] }
  0x8e   : > { %v518_v43 = vpack.c.bf16 %v388_v39, %v387_v38  ;;  %v895_v48 = vunpack.c.l.b16 %v514_v42  ;;  %v896_v50 = vunpack.c.h.b16 %v514_v42 }
  0x90   : > { %v903_v49 = vunpack.c.l.b16 %v518_v43  ;;  %v904_v51 = vunpack.c.h.b16 %v518_v43 }
  0x92   : > { %v1031_v54 = vpack.c.b16 %v903_v49, %v895_v48  ;;  %v1032_v55 = vpack.c.b16 %v904_v51, %v896_v50  ;;  %v3492_v49 = vld [vmem:[%s4901_s1 + $0x180] sm:$0xff] }
  0x93   : > { %v3476_v50 = vld [vmem:[%s4901_s1 + $0x100] sm:$0xff]  ;;  %1970 = vmatpush.bf16.msrb.mxu2 %v3492_v49 }
  0x94   : > { %v3500_v51 = vld [vmem:[%s4901_s1 + $0x1c0] sm:$0xff]  ;;  %1832 = vmatpush.bf16.msrb.mxu0 %v3476_v50  ;;  %v450_v50 = vld [vmem:[%s3870_s28 + $0x5c8] sm:$0xff] }
  0x95   : > { %2039 = vmatpush.bf16.msrb.mxu3 %v3500_v51  ;;  %v449_v49 = vld [vmem:[%s3870_s28 + $0x5c0] sm:$0xff]  ;;  %v443_v51 = vld [vmem:[%s3870_s28 + $0x590] sm:$0xff] }
  0x9a   : > { %1582 = vmatmul.bf16.gmra.mxu0 %v1013_v0  ;;  %v396_v0 = vld [vmem:[%s3870_s28 + $0x418] sm:$0xff] }
  0x9b   : > { %1651 = vmatmul.bf16.gmra.mxu1 %v1014_v1  ;;  %v403_v1 = vld [vmem:[%s3870_s28 + $0x450] sm:$0xff]  ;;  %v522_v5 = vpack.c.bf16 %v396_v0, %v395_v60 }
  0x9c   : > { %1720 = vmatmul.bf16.gmra.mxu2 %v1015_v2  ;;  %v404_v2 = vld [vmem:[%s3870_s28 + $0x458] sm:$0xff] }
  0x9d   : > { %1789 = vmatmul.bf16.gmra.mxu3 %v1016_v3  ;;  %v521_v3 = vpack.c.bf16 %v394_v57, %v393_v56  ;;  %v526_v6 = vpack.c.bf16 %v404_v2, %v403_v1  ;;  %v911_v12 = vunpack.c.l.b16 %v522_v5  ;;  %v912_v14 = vunpack.c.h.b16 %v522_v5  ;;  %v425_v5 = vld [vmem:[%s3870_s28 + $0x500] sm:$0xff] }
  0x9f   : > { %v909_v8 = vunpack.c.l.b16 %v521_v3  ;;  %v910_v10 = vunpack.c.h.b16 %v521_v3  ;;  %v919_v13 = vunpack.c.l.b16 %v526_v6  ;;  %v920_v15 = vunpack.c.h.b16 %v526_v6  ;;  %v3484_v3 = vld [vmem:[%s4901_s1 + $0x140] sm:$0xff]  ;;  %v426_v6 = vld [vmem:[%s3870_s28 + $0x508] sm:$0xff] }
  0xa0   : > { %1901 = vmatpush.bf16.msrb.mxu1 %v3484_v3 }
  0xa1   : > { %v1037_v17 = vpack.c.b16 %v917_v9, %v909_v8  ;;  %v1038_v18 = vpack.c.b16 %v918_v11, %v910_v10  ;;  %v1039_v21 = vpack.c.b16 %v919_v13, %v911_v12  ;;  %v1040_v22 = vpack.c.b16 %v920_v15, %v912_v14  ;;  %v434_v8 = vld [vmem:[%s3870_s28 + $0x548] sm:$0xff]  ;;  %v427_v9 = vld [vmem:[%s3870_s28 + $0x510] sm:$0xff]  ;;  %v428_v10 = vld [vmem:[%s3870_s28 + $0x518] sm:$0xff] }
  0xa2   : > { %v435_v11 = vld [vmem:[%s3870_s28 + $0x550] sm:$0xff]  ;;  %v436_v12 = vld [vmem:[%s3870_s28 + $0x558] sm:$0xff]  ;;  %v537_v13 = vpack.c.bf16 %v426_v6, %v425_v5 }
  0xa4   : > { %v941_v25 = vunpack.c.l.b16 %v537_v13 }
  0xaa   : > { %1587 = vmatmul.bf16.gmra.mxu0 %v1021_v28  ;;  %v418_v28 = vld [vmem:[%s3870_s28 + $0x4c8] sm:$0xff] }
  0xab   : > { %1656 = vmatmul.bf16.gmra.mxu1 %v1022_v29  ;;  %v411_v29 = vld [vmem:[%s3870_s28 + $0x490] sm:$0xff]  ;;  %v533_v36 = vpack.c.bf16 %v418_v28, %v417_v27  ;;  %v942_v28 = vunpack.c.h.b16 %v537_v13 }
  0xac   : > { %1725 = vmatmul.bf16.gmra.mxu2 %v1023_v30  ;;  %v412_v30 = vld [vmem:[%s3870_s28 + $0x498] sm:$0xff] }
  0xad   : > { %1794 = vmatmul.bf16.gmra.mxu3 %v1024_v31  ;;  %v419_v31 = vld [vmem:[%s3870_s28 + $0x4d0] sm:$0xff]  ;;  %v530_v40 = vpack.c.bf16 %v412_v30, %v411_v29  ;;  %v933_v46 = vunpack.c.l.b16 %v533_v36  ;;  %v934_v48 = vunpack.c.h.b16 %v533_v36 }
  0xae   : > { %v534_v41 = vpack.c.bf16 %v420_v32, %v419_v31 }
  0xaf   : > { %v1045_v58 = vpack.c.b16 %v933_v46, %v925_v44  ;;  %v1046_v59 = vpack.c.b16 %v934_v48, %v926_v47  ;;  %v441_v47 = vld [vmem:[%s3870_s28 + $0x580] sm:$0xff]  ;;  %v442_v48 = vld [vmem:[%s3870_s28 + $0x588] sm:$0xff] }
  0xba   : > { %1592 = vmatmul.bf16.gmra.mxu0 %v1029_v52  ;;  %v927_v52 = vunpack.c.l.b16 %v530_v40 }
  0xbb   : > { %1661 = vmatmul.bf16.gmra.mxu1 %v1030_v53  ;;  %v935_v53 = vunpack.c.l.b16 %v534_v41 }
  0xbc   : > { %1730 = vmatmul.bf16.gmra.mxu2 %v1031_v54  ;;  %v928_v54 = vunpack.c.h.b16 %v530_v40 }
  0xbd   : > { %1799 = vmatmul.bf16.gmra.mxu3 %v1032_v55  ;;  %v936_v55 = vunpack.c.h.b16 %v534_v41  ;;  %v1047_v63 = vpack.c.b16 %v935_v53, %v927_v52  ;;  %v444_v52 = vld [vmem:[%s3870_s28 + $0x598] sm:$0xff]  ;;  %v451_v53 = vld [vmem:[%s3870_s28 + $0x5d0] sm:$0xff] }
  0xbf   : > { %v1048_v0 = vpack.c.b16 %v936_v55, %v928_v54  ;;  %v452_v54 = vld [vmem:[%s3870_s28 + $0x5d8] sm:$0xff]  ;;  %v545_v55 = vpack.c.bf16 %v442_v48, %v441_v47 }
  0xc1   : > { %v957_v3 = vunpack.c.l.b16 %v545_v55  ;;  %v958_v6 = vunpack.c.h.b16 %v545_v55 }
  0xc7   : > { %v1558_v19 = vpop.f32.mrf.mxu0 }
  0xc8   : > { %v1627_v20 = vpop.f32.mrf.mxu1  ;;  %v1559_v23 = vadd.f32 %v4132_v16, %v1558_v19 }
  0xca   : > { %v1628_v24 = vadd.f32 %v1627_v20, %v1559_v23  ;;  %1597 = vmatmul.bf16.gmra.mxu0 %v1037_v17  ;;  %v541_v17 = vpack.c.bf16 %v434_v8, %v433_v7 }
  0xcb   : > { %1666 = vmatmul.bf16.gmra.mxu1 %v1038_v18 }
  0xcc   : > { %1735 = vmatmul.bf16.gmra.mxu2 %v1039_v21  ;;  %v538_v21 = vpack.c.bf16 %v428_v10, %v427_v9  ;;  %v949_v27 = vunpack.c.l.b16 %v541_v17  ;;  %v950_v29 = vunpack.c.h.b16 %v541_v17 }
  0xcd   : > { %1804 = vmatmul.bf16.gmra.mxu3 %v1040_v22  ;;  %v542_v22 = vpack.c.bf16 %v436_v12, %v435_v11 }
  0xce   : > { %v943_v30 = vunpack.c.l.b16 %v538_v21  ;;  %v944_v32 = vunpack.c.h.b16 %v538_v21  ;;  %v1053_v36 = vpack.c.b16 %v949_v27, %v941_v25  ;;  %v270_v27 = vld [vmem:[%s3870_s28 + $0x28] sm:$0xff] }
  0xcf   : > { %v1696_v34 = vpop.f32.mrf.mxu2  ;;  %v1560_v38 = vpop.f32.mrf.mxu0  ;;  %v951_v31 = vunpack.c.l.b16 %v542_v22  ;;  %v952_v33 = vunpack.c.h.b16 %v542_v22 }
  0xd0   : > { %v1765_v35 = vpop.f32.mrf.mxu3  ;;  %v1697_v37 = vadd.f32 %v1696_v34, %v1628_v24  ;;  %v1629_v39 = vpop.f32.mrf.mxu1  ;;  %v1561_v42 = vadd.f32 %v4132_v16, %v1560_v38 }
  0xd1   : > { %v1055_v41 = vpack.c.b16 %v951_v31, %v943_v30  ;;  %v271_v30 = vld [vmem:[%s3870_s28 + $0x30] sm:$0xff]  ;;  %v272_v31 = vld [vmem:[%s3870_s28 + $0x38] sm:$0xff] }
  0xd2   : > { %v4144_v43 = vadd.f32 %v1765_v35, %v1697_v37  ;;  %v1630_v45 = vadd.f32 %v1629_v39, %v1561_v42  ;;  %v1054_v37 = vpack.c.b16 %v950_v29, %v942_v28  ;;  %v1056_v42 = vpack.c.b16 %v952_v33, %v944_v32  ;;  %v277_v28 = vld [vmem:[%s3870_s28 + $0x60] sm:$0xff]  ;;  %v278_v29 = vld [vmem:[%s3870_s28 + $0x68] sm:$0xff]  ;;  %v279_v32 = vld [vmem:[%s3870_s28 + $0x70] sm:$0xff] }
  0xd3   : > { %v280_v33 = vld [vmem:[%s3870_s28 + $0x78] sm:$0xff] }
  0xd7   : > { %v1698_v56 = vpop.f32.mrf.mxu2  ;;  %v1563_v61 = vpop.f32.mrf.mxu0 }
  0xd8   : > { %v1767_v57 = vpop.f32.mrf.mxu3  ;;  %v1699_v60 = vadd.f32 %v1698_v56, %v1630_v45  ;;  %v1632_v62 = vpop.f32.mrf.mxu1  ;;  %v1564_v1 = vadd.f32 %v4132_v16, %v1563_v61 }
  0xda   : > { %v4156_v2 = vadd.f32 %v1767_v57, %v1699_v60  ;;  %v1633_v4 = vadd.f32 %v1632_v62, %v1564_v1  ;;  %1602 = vmatmul.bf16.gmra.mxu0 %v1045_v58  ;;  %v549_v58 = vpack.c.bf16 %v450_v50, %v449_v49  ;;  %v546_v62 = vpack.c.bf16 %v444_v52, %v443_v51 }
  0xdb   : > { %1671 = vmatmul.bf16.gmra.mxu1 %v1046_v59 }
  0xdc   : > { %1740 = vmatmul.bf16.gmra.mxu2 %v1047_v63  ;;  %v550_v63 = vpack.c.bf16 %v452_v54, %v451_v53  ;;  %v965_v5 = vunpack.c.l.b16 %v549_v58  ;;  %v966_v7 = vunpack.c.h.b16 %v549_v58  ;;  %v959_v8 = vunpack.c.l.b16 %v546_v62 }
  0xdd   : > { %1809 = vmatmul.bf16.gmra.mxu3 %v1048_v0  ;;  %v960_v10 = vunpack.c.h.b16 %v546_v62 }
  0xde   : > { %v967_v9 = vunpack.c.l.b16 %v550_v63  ;;  %v968_v11 = vunpack.c.h.b16 %v550_v63 }
  0xdf   : > { %v1701_v14 = vpop.f32.mrf.mxu2  ;;  %v1565_v19 = vpop.f32.mrf.mxu0 }
  0xe0   : > { %v1770_v15 = vpop.f32.mrf.mxu3  ;;  %v1702_v18 = vadd.f32 %v1701_v14, %v1633_v4  ;;  %v1634_v20 = vpop.f32.mrf.mxu1  ;;  %v1566_v23 = vadd.f32 %v4132_v16, %v1565_v19  ;;  %v1061_v14 = vpack.c.b16 %v965_v5, %v957_v3  ;;  %v1064_v21 = vpack.c.b16 %v968_v11, %v960_v10  ;;  %v287_v10 = vld [vmem:[%s3870_s28 + $0xb0] sm:$0xff]  ;;  %v288_v11 = vld [vmem:[%s3870_s28 + $0xb8] sm:$0xff] }
  0xe2   : > { %v4170_v24 = vadd.f32 %v1770_v15, %v1702_v18  ;;  %v1635_v26 = vadd.f32 %v1634_v20, %v1566_v23  ;;  %v1062_v15 = vpack.c.b16 %v966_v7, %v958_v6  ;;  %v1063_v20 = vpack.c.b16 %v967_v9, %v959_v8  ;;  %v285_v6 = vld [vmem:[%s3870_s28 + $0xa0] sm:$0xff]  ;;  %v286_v7 = vld [vmem:[%s3870_s28 + $0xa8] sm:$0xff] }
  0xe3   : > { %v293_v8 = vld [vmem:[%s3870_s28 + $0xe0] sm:$0xff]  ;;  %v294_v9 = vld [vmem:[%s3870_s28 + $0xe8] sm:$0xff] }
  0xe7   : > { %v1703_v34 = vpop.f32.mrf.mxu2  ;;  %v1568_v39 = vpop.f32.mrf.mxu0 }
  0xe8   : > { %v1772_v35 = vpop.f32.mrf.mxu3  ;;  %v1704_v38 = vadd.f32 %v1703_v34, %v1635_v26  ;;  %v1637_v40 = vpop.f32.mrf.mxu1  ;;  %v1569_v44 = vadd.f32 %v4132_v16, %v1568_v39  ;;  %v269_v26 = vld [vmem:[%s3870_s28 + $0x20] sm:$0xff] }
  0xe9   : > { %v459_v34 = vpack.c.bf16 %v270_v27, %v269_v26 }
  0xea   : > { %v4173_v45 = vadd.f32 %v1772_v35, %v1704_v38  ;;  %v1638_v46 = vadd.f32 %v1637_v40, %v1569_v44  ;;  %1607 = vmatmul.bf16.gmra.mxu0 %v1053_v36 }
  0xeb   : > { %1676 = vmatmul.bf16.gmra.mxu1 %v1054_v37  ;;  %v463_v37 = vpack.c.bf16 %v278_v29, %v277_v28  ;;  %v785_v47 = vunpack.c.l.b16 %v459_v34  ;;  %v786_v50 = vunpack.c.h.b16 %v459_v34 }
  0xec   : > { %1745 = vmatmul.bf16.gmra.mxu2 %v1055_v41  ;;  %v460_v41 = vpack.c.bf16 %v272_v31, %v271_v30 }
  0xed   : > { %1814 = vmatmul.bf16.gmra.mxu3 %v1056_v42  ;;  %v464_v42 = vpack.c.bf16 %v280_v33, %v279_v32  ;;  %v793_v49 = vunpack.c.l.b16 %v463_v37  ;;  %v794_v51 = vunpack.c.h.b16 %v463_v37 }
  0xee   : > { %v787_v52 = vunpack.c.l.b16 %v460_v41  ;;  %v788_v54 = vunpack.c.h.b16 %v460_v41 }
  0xef   : > { %v1706_v56 = vpop.f32.mrf.mxu2  ;;  %v1570_v60 = vpop.f32.mrf.mxu0  ;;  %v795_v53 = vunpack.c.l.b16 %v464_v42  ;;  %v796_v55 = vunpack.c.h.b16 %v464_v42  ;;  %v977_v58 = vpack.c.b16 %v793_v49, %v785_v47 }
  0xf0   : > { %v1775_v57 = vpop.f32.mrf.mxu3  ;;  %v1707_v59 = vadd.f32 %v1706_v56, %v1638_v46  ;;  %v1639_v61 = vpop.f32.mrf.mxu1  ;;  %v1571_v0 = vadd.f32 %v4132_v16, %v1570_v60 }
  0xf1   : > { %v979_v63 = vpack.c.b16 %v795_v53, %v787_v52  ;;  %v301_v52 = vld [vmem:[%s3870_s28 + $0x120] sm:$0xff]  ;;  %v302_v53 = vld [vmem:[%s3870_s28 + $0x128] sm:$0xff] }
  0xf2   : > { %v4184_v1 = vadd.f32 %v1775_v57, %v1707_v59  ;;  %v1640_v4 = vadd.f32 %v1639_v61, %v1571_v0  ;;  %v978_v59 = vpack.c.b16 %v794_v51, %v786_v50  ;;  %v980_v0 = vpack.c.b16 %v796_v55, %v788_v54  ;;  %v309_v54 = vld [vmem:[%s3870_s28 + $0x160] sm:$0xff]  ;;  %v310_v55 = vld [vmem:[%s3870_s28 + $0x168] sm:$0xff] }
  0xf7   : > { %v1708_v12 = vpop.f32.mrf.mxu2  ;;  %v1573_v18 = vpop.f32.mrf.mxu0 }
  0xf8   : > { %v1777_v13 = vpop.f32.mrf.mxu3  ;;  %v1709_v17 = vadd.f32 %v1708_v12, %v1640_v4  ;;  %v1642_v19 = vpop.f32.mrf.mxu1  ;;  %v1574_v22 = vadd.f32 %v4132_v16, %v1573_v18  ;;  %v295_v12 = vld [vmem:[%s3870_s28 + $0xf0] sm:$0xff]  ;;  %v471_v18 = vpack.c.bf16 %v294_v9, %v293_v8 }
  0xfa   : > { %v4187_v23 = vadd.f32 %v1777_v13, %v1709_v17  ;;  %v1643_v25 = vadd.f32 %v1642_v19, %v1574_v22  ;;  %1612 = vmatmul.bf16.gmra.mxu0 %v1061_v14  ;;  %v296_v13 = vld [vmem:[%s3870_s28 + $0xf8] sm:$0xff]  ;;  %v467_v14 = vpack.c.bf16 %v286_v7, %v285_v6  ;;  %v468_v22 = vpack.c.bf16 %v288_v11, %v287_v10 }
  0xfb   : > { %1681 = vmatmul.bf16.gmra.mxu1 %v1062_v15  ;;  %v809_v30 = vunpack.c.l.b16 %v471_v18  ;;  %v810_v32 = vunpack.c.h.b16 %v471_v18 }
  0xfc   : > { %1750 = vmatmul.bf16.gmra.mxu2 %v1063_v20  ;;  %v801_v28 = vunpack.c.l.b16 %v467_v14  ;;  %v802_v31 = vunpack.c.h.b16 %v467_v14  ;;  %v803_v33 = vunpack.c.l.b16 %v468_v22 }
  0xfd   : > { %1819 = vmatmul.bf16.gmra.mxu3 %v1064_v21 }
  0xff   : > { %v1711_v35 = vpop.f32.mrf.mxu2  ;;  %v1575_v39 = vpop.f32.mrf.mxu0 }
 0x100   : > { %v1780_v36 = vpop.f32.mrf.mxu3  ;;  %v1712_v38 = vadd.f32 %v1711_v35, %v1643_v25  ;;  %v1644_v40 = vpop.f32.mrf.mxu1  ;;  %v1576_v44 = vadd.f32 %v4132_v16, %v1575_v39  ;;  %v472_v25 = vpack.c.bf16 %v296_v13, %v295_v12  ;;  %v804_v35 = vunpack.c.h.b16 %v468_v22 }
 0x101   : > { %v985_v39 = vpack.c.b16 %v809_v30, %v801_v28 }
 0x102   : > { %v4198_v46 = vadd.f32 %v1780_v36, %v1712_v38  ;;  %v1645_v48 = vadd.f32 %v1644_v40, %v1576_v44  ;;  %v811_v34 = vunpack.c.l.b16 %v472_v25  ;;  %v812_v36 = vunpack.c.h.b16 %v472_v25 }
 0x103   : > { %v986_v40 = vpack.c.b16 %v810_v32, %v802_v31 }
 0x104   : > { %v987_v47 = vpack.c.b16 %v811_v34, %v803_v33 }
 0x107   : > { %v1713_v56 = vpop.f32.mrf.mxu2  ;;  %v1578_v61 = vpop.f32.mrf.mxu0 }
 0x108   : > { %v1782_v57 = vpop.f32.mrf.mxu3  ;;  %v1714_v60 = vadd.f32 %v1713_v56, %v1645_v48  ;;  %v1647_v62 = vpop.f32.mrf.mxu1  ;;  %v1579_v3 = vadd.f32 %v4132_v16, %v1578_v61  ;;  %v988_v48 = vpack.c.b16 %v812_v36, %v804_v35  ;;  %v303_v56 = vld [vmem:[%s3870_s28 + $0x130] sm:$0xff]  ;;  %v317_v35 = vld [vmem:[%s3870_s28 + $0x1a0] sm:$0xff]  ;;  %v318_v36 = vld [vmem:[%s3870_s28 + $0x1a8] sm:$0xff] }
 0x10a   : > { %v4201_v4 = vadd.f32 %v1782_v57, %v1714_v60  ;;  %v1648_v5 = vadd.f32 %v1647_v62, %v1579_v3  ;;  %1833 = vmatmul.bf16.vlgmr.msrb.gmra.mxu0 %v977_v58  ;;  %v304_v57 = vld [vmem:[%s3870_s28 + $0x138] sm:$0xff]  ;;  %v311_v58 = vld [vmem:[%s3870_s28 + $0x170] sm:$0xff]  ;;  %v475_v60 = vpack.c.bf16 %v302_v53, %v301_v52 }
 0x10b   : > { %1902 = vmatmul.bf16.vlgmr.msrb.gmra.mxu1 %v978_v59  ;;  %v312_v59 = vld [vmem:[%s3870_s28 + $0x178] sm:$0xff]  ;;  %v476_v6 = vpack.c.bf16 %v304_v57, %v303_v56 }
 0x10c   : > { %1971 = vmatmul.bf16.vlgmr.msrb.gmra.mxu2 %v979_v63  ;;  %v479_v63 = vpack.c.bf16 %v310_v55, %v309_v54  ;;  %v480_v7 = vpack.c.bf16 %v312_v59, %v311_v58  ;;  %v817_v10 = vunpack.c.l.b16 %v475_v60  ;;  %v818_v13 = vunpack.c.h.b16 %v475_v60 }
 0x10d   : > { %2040 = vmatmul.bf16.vlgmr.msrb.gmra.mxu3 %v980_v0  ;;  %v820_v18 = vunpack.c.h.b16 %v476_v6 }
 0x10e   : > { %v825_v12 = vunpack.c.l.b16 %v479_v63  ;;  %v826_v14 = vunpack.c.h.b16 %v479_v63 }
 0x10f   : > { %v1716_v15 = vpop.f32.mrf.mxu2  ;;  %v1580_v20 = vpop.f32.mrf.mxu0 }
 0x110   : > { %v1785_v17 = vpop.f32.mrf.mxu3  ;;  %v1717_v19 = vadd.f32 %v1716_v15, %v1648_v5  ;;  %v1649_v21 = vpop.f32.mrf.mxu1  ;;  %v1581_v26 = vadd.f32 %v4132_v16, %v1580_v20  ;;  %v819_v15 = vunpack.c.l.b16 %v476_v6  ;;  %v993_v22 = vpack.c.b16 %v825_v12, %v817_v10 }
 0x111   : > { %v994_v25 = vpack.c.b16 %v826_v14, %v818_v13 }
 0x112   : > { %v4212_v27 = vadd.f32 %v1785_v17, %v1717_v19  ;;  %v1650_v29 = vadd.f32 %v1649_v21, %v1581_v26  ;;  %v827_v17 = vunpack.c.l.b16 %v480_v7  ;;  %v828_v19 = vunpack.c.h.b16 %v480_v7 }
 0x114   : > { %v995_v30 = vpack.c.b16 %v827_v17, %v819_v15  ;;  %v996_v31 = vpack.c.b16 %v828_v19, %v820_v18 }
 0x117   : > { %v1718_v37 = vpop.f32.mrf.mxu2  ;;  %v1583_v42 = vpop.f32.mrf.mxu0 }
 0x118   : > { %v1787_v38 = vpop.f32.mrf.mxu3  ;;  %v1719_v41 = vadd.f32 %v1718_v37, %v1650_v29  ;;  %v1652_v44 = vpop.f32.mrf.mxu1  ;;  %v1584_v49 = vadd.f32 %v4132_v16, %v1583_v42  ;;  %v325_v37 = vld [vmem:[%s3870_s28 + $0x1e0] sm:$0xff]  ;;  %v328_v42 = vld [vmem:[%s3870_s28 + $0x1f8] sm:$0xff] }
 0x11a   : > { %v4215_v50 = vadd.f32 %v1787_v38, %v1719_v41  ;;  %v1653_v51 = vadd.f32 %v1652_v44, %v1584_v49  ;;  %1838 = vmatmul.bf16.gmra.mxu0 %v985_v39  ;;  %v326_v38 = vld [vmem:[%s3870_s28 + $0x1e8] sm:$0xff]  ;;  %v319_v39 = vld [vmem:[%s3870_s28 + $0x1b0] sm:$0xff]  ;;  %v483_v44 = vpack.c.bf16 %v318_v36, %v317_v35 }
 0x11b   : > { %1907 = vmatmul.bf16.gmra.mxu1 %v986_v40  ;;  %v320_v40 = vld [vmem:[%s3870_s28 + $0x1b8] sm:$0xff]  ;;  %v327_v41 = vld [vmem:[%s3870_s28 + $0x1f0] sm:$0xff]  ;;  %v487_v49 = vpack.c.bf16 %v326_v38, %v325_v37 }
 0x11c   : > { %1976 = vmatmul.bf16.gmra.mxu2 %v987_v47  ;;  %v484_v54 = vpack.c.bf16 %v320_v40, %v319_v39  ;;  %v488_v55 = vpack.c.bf16 %v328_v42, %v327_v41  ;;  %v833_v58 = vunpack.c.l.b16 %v483_v44 }
 0x11d   : > { %2045 = vmatmul.bf16.gmra.mxu3 %v988_v48  ;;  %v841_v60 = vunpack.c.l.b16 %v487_v49 }
 0x11e   : > { %v835_v63 = vunpack.c.l.b16 %v484_v54 }
 0x11f   : > { %v1721_v61 = vpop.f32.mrf.mxu2  ;;  %v1585_v3 = vpop.f32.mrf.mxu0 }
 0x120   : > { %v1790_v62 = vpop.f32.mrf.mxu3  ;;  %v1722_v0 = vadd.f32 %v1721_v61, %v1653_v51  ;;  %v1654_v5 = vpop.f32.mrf.mxu1  ;;  %v1586_v8 = vadd.f32 %v4132_v16, %v1585_v3  ;;  %v834_v61 = vunpack.c.h.b16 %v483_v44  ;;  %v836_v3 = vunpack.c.h.b16 %v484_v54 }
 0x122   : > { %v4226_v9 = vadd.f32 %v1790_v62, %v1722_v0  ;;  %v1655_v11 = vadd.f32 %v1654_v5, %v1586_v8  ;;  %v842_v62 = vunpack.c.h.b16 %v487_v49  ;;  %v843_v0 = vunpack.c.l.b16 %v488_v55 }
 0x123   : > { %v844_v5 = vunpack.c.h.b16 %v488_v55  ;;  %v1001_v8 = vpack.c.b16 %v841_v60, %v833_v58 }
 0x124   : > { %v1002_v10 = vpack.c.b16 %v842_v62, %v834_v61  ;;  %v1003_v14 = vpack.c.b16 %v843_v0, %v835_v63 }
 0x125   : > { %v1004_v15 = vpack.c.b16 %v844_v5, %v836_v3 }
 0x127   : > { %v1723_v20 = vpop.f32.mrf.mxu2  ;;  %v1588_v28 = vpop.f32.mrf.mxu0 }
 0x128   : > { %v1792_v21 = vpop.f32.mrf.mxu3  ;;  %v1724_v26 = vadd.f32 %v1723_v20, %v1655_v11  ;;  %v1657_v29 = vpop.f32.mrf.mxu1  ;;  %v1589_v32 = vadd.f32 %v4132_v16, %v1588_v28  ;;  %v333_v20 = vld [vmem:[%s3870_s28 + $0x220] sm:$0xff]  ;;  %v336_v28 = vld [vmem:[%s3870_s28 + $0x238] sm:$0xff] }
 0x12a   : > { %v4229_v33 = vadd.f32 %v1792_v21, %v1724_v26  ;;  %v1658_v34 = vadd.f32 %v1657_v29, %v1589_v32  ;;  %1843 = vmatmul.bf16.gmra.mxu0 %v993_v22  ;;  %v334_v21 = vld [vmem:[%s3870_s28 + $0x228] sm:$0xff]  ;;  %v341_v22 = vld [vmem:[%s3870_s28 + $0x260] sm:$0xff]  ;;  %v335_v26 = vld [vmem:[%s3870_s28 + $0x230] sm:$0xff] }
 0x12b   : > { %1912 = vmatmul.bf16.gmra.mxu1 %v994_v25  ;;  %v342_v25 = vld [vmem:[%s3870_s28 + $0x268] sm:$0xff]  ;;  %v343_v29 = vld [vmem:[%s3870_s28 + $0x270] sm:$0xff]  ;;  %v492_v39 = vpack.c.bf16 %v336_v28, %v335_v26 }
 0x12c   : > { %1981 = vmatmul.bf16.gmra.mxu2 %v995_v30  ;;  %v344_v30 = vld [vmem:[%s3870_s28 + $0x278] sm:$0xff]  ;;  %v495_v35 = vpack.c.bf16 %v342_v25, %v341_v22  ;;  %v359_v22 = vld [vmem:[%s3870_s28 + $0x2f0] sm:$0xff] }
 0x12d   : > { %2050 = vmatmul.bf16.gmra.mxu3 %v996_v31  ;;  %v491_v31 = vpack.c.bf16 %v334_v21, %v333_v20  ;;  %v496_v40 = vpack.c.bf16 %v344_v30, %v343_v29  ;;  %v852_v54 = vunpack.c.h.b16 %v492_v39  ;;  %v3419_v21 = vld [vmem:[%s4903_s3 + $0x1e8] sm:$0xf0]  ;;  %v360_v25 = vld [vmem:[%s3870_s28 + $0x2f8] sm:$0xff] }
 0x12f   : > { %v1726_v47 = vpop.f32.mrf.mxu2  ;;  %v1590_v52 = vpop.f32.mrf.mxu0  ;;  %v849_v44 = vunpack.c.l.b16 %v491_v31  ;;  %v850_v49 = vunpack.c.h.b16 %v491_v31  ;;  %v860_v55 = vunpack.c.h.b16 %v496_v40 }
 0x130   : > { %v1795_v48 = vpop.f32.mrf.mxu3  ;;  %v1727_v51 = vadd.f32 %v1726_v47, %v1658_v34  ;;  %v1659_v53 = vpop.f32.mrf.mxu1  ;;  %v1591_v56 = vadd.f32 %v4132_v16, %v1590_v52  ;;  %v851_v52 = vunpack.c.l.b16 %v492_v39 }
 0x131   : > { %v1012_v3 = vpack.c.b16 %v860_v55, %v852_v54  ;;  %v3411_v55 = vld [vmem:[%s4903_s3 + $0x1e0] sm:$0xf0] }
 0x132   : > { %v4240_v57 = vadd.f32 %v1795_v48, %v1727_v51  ;;  %v1660_v59 = vadd.f32 %v1659_v53, %v1591_v56  ;;  %v857_v48 = vunpack.c.l.b16 %v495_v35  ;;  %v858_v51 = vunpack.c.h.b16 %v495_v35 }
 0x133   : > { %v859_v53 = vunpack.c.l.b16 %v496_v40 }
 0x134   : > { %v1010_v60 = vpack.c.b16 %v858_v51, %v850_v49  ;;  %v3564_v49 = vld [vmem:[%s4903_s3 + $0x1c4] sm:$0xf] }
 0x135   : > { %v1011_v0 = vpack.c.b16 %v859_v53, %v851_v52 }
 0x137   : > { %v1728_v6 = vpop.f32.mrf.mxu2  ;;  %v1593_v12 = vpop.f32.mrf.mxu0 }
 0x138   : > { %v1797_v7 = vpop.f32.mrf.mxu3  ;;  %v1729_v11 = vadd.f32 %v1728_v6, %v1660_v59  ;;  %v1662_v13 = vpop.f32.mrf.mxu1  ;;  %v1594_v17 = vadd.f32 %v4132_v16, %v1593_v12  ;;  %v1009_v59 = vpack.c.b16 %v857_v48, %v849_v44  ;;  %v349_v6 = vld [vmem:[%s3870_s28 + $0x2a0] sm:$0xff] }
 0x139   : > { %v3568_v48 = vld [vmem:[%s4903_s3 + $0x1dc] sm:$0xf0] }
 0x13a   : > { %v4243_v18 = vadd.f32 %v1797_v7, %v1729_v11  ;;  %v1663_v19 = vadd.f32 %v1662_v13, %v1594_v17  ;;  %1848 = vmatmul.bf16.gmra.mxu0 %v1001_v8  ;;  %v350_v8 = vld [vmem:[%s3870_s28 + $0x2a8] sm:$0xff]  ;;  %v351_v17 = vld [vmem:[%s3870_s28 + $0x2b0] sm:$0xff] }
 0x13b   : > { %1917 = vmatmul.bf16.gmra.mxu1 %v1002_v10  ;;  %v357_v10 = vld [vmem:[%s3870_s28 + $0x2e0] sm:$0xff]  ;;  %v358_v11 = vld [vmem:[%s3870_s28 + $0x2e8] sm:$0xff]  ;;  %v499_v28 = vpack.c.bf16 %v350_v8, %v349_v6 }
 0x13c   : > { %1986 = vmatmul.bf16.gmra.mxu2 %v1003_v14  ;;  %v3417_v13 = vld [vmem:[%s4903_s3 + $0x1c8] sm:$0xf]  ;;  %v503_v29 = vpack.c.bf16 %v358_v11, %v357_v10 }
 0x13d   : > { %2055 = vmatmul.bf16.gmra.mxu3 %v1004_v15  ;;  %v3569_v14 = vld [vmem:[%s4903_s3 + $0x1e4] sm:$0xf0]  ;;  %v3565_v15 = vld [vmem:[%s4903_s3 + $0x1cc] sm:$0xf]  ;;  %v865_v40 = vunpack.c.l.b16 %v499_v28  ;;  %v866_v44 = vunpack.c.h.b16 %v499_v28 }
 0x13e   : > { %v3418_v20 = vor.u32 %v3569_v14, %v3417_v13  ;;  %v3422_v26 = vor.u32 %v3565_v15, %v3419_v21  ;;  %v874_v52 = vunpack.c.h.b16 %v503_v29  ;;  %v365_v14 = vld [vmem:[%s3870_s28 + $0x320] sm:$0xff]  ;;  %v366_v15 = vld [vmem:[%s3870_s28 + $0x328] sm:$0xff]  ;;  %v368_v21 = vld [vmem:[%s3870_s28 + $0x338] sm:$0xff] }
 0x13f   : > { %v1731_v32 = vpop.f32.mrf.mxu2  ;;  %v1595_v37 = vpop.f32.mrf.mxu0 }
 0x140   : > { %v1800_v34 = vpop.f32.mrf.mxu3  ;;  %v1732_v36 = vadd.f32 %v1731_v32, %v1663_v19  ;;  %v1664_v38 = vpop.f32.mrf.mxu1  ;;  %v1596_v41 = vadd.f32 %v4132_v16, %v1595_v37  ;;  %v352_v19 = vld [vmem:[%s3870_s28 + $0x2b8] sm:$0xff]  ;;  %2595 = vmatpush.bf16.msra.mxu2 %v3418_v20  ;;  %2624 = vmatpush.bf16.msra.mxu3 %v3422_v26  ;;  %v504_v37 = vpack.c.bf16 %v360_v25, %v359_v22  ;;  %v367_v20 = vld [vmem:[%s3870_s28 + $0x330] sm:$0xff] }
 0x141   : > { %v500_v32 = vpack.c.bf16 %v352_v19, %v351_v17  ;;  %v373_v17 = vld [vmem:[%s3870_s28 + $0x360] sm:$0xff]  ;;  %v374_v19 = vld [vmem:[%s3870_s28 + $0x368] sm:$0xff]  ;;  %v375_v22 = vld [vmem:[%s3870_s28 + $0x370] sm:$0xff]  ;;  %v507_v26 = vpack.c.bf16 %v366_v15, %v365_v14 }
 0x142   : > { %v4254_v42 = vadd.f32 %v1800_v34, %v1732_v36  ;;  %v1665_v47 = vadd.f32 %v1664_v38, %v1596_v41  ;;  %v873_v41 = vunpack.c.l.b16 %v503_v29  ;;  %v376_v25 = vld [vmem:[%s3870_s28 + $0x378] sm:$0xff]  ;;  %v3377_v14 = vld [vmem:[%s4903_s3 + $0x180] sm:$0xf] }
 0x143   : > { %v867_v53 = vunpack.c.l.b16 %v500_v32  ;;  %v3560_v15 = vld [vmem:[%s4903_s3 + $0x19c] sm:$0xf0] }
 0x147   : > { %v1733_v56 = vpop.f32.mrf.mxu2  ;;  %v1598_v62 = vpop.f32.mrf.mxu0 }
 0x148   : > { %v1802_v58 = vpop.f32.mrf.mxu3  ;;  %v1734_v61 = vadd.f32 %v1733_v56, %v1665_v47  ;;  %v1667_v63 = vpop.f32.mrf.mxu1  ;;  %v1599_v5 = vadd.f32 %v4132_v16, %v1598_v62  ;;  %v3409_v47 = vld [vmem:[%s4903_s3 + $0x1c0] sm:$0xf]  ;;  %v875_v56 = vunpack.c.l.b16 %v504_v37 }
 0x149   : > { %v3410_v54 = vor.u32 %v3568_v48, %v3409_v47 }
 0x14a   : > { %v4258_v7 = vadd.f32 %v1802_v58, %v1734_v61  ;;  %v1668_v12 = vadd.f32 %v1667_v63, %v1599_v5  ;;  %1853 = vmatmul.bf16.gmra.mxu0 %v1009_v59  ;;  %v868_v58 = vunpack.c.h.b16 %v500_v32  ;;  %v876_v59 = vunpack.c.h.b16 %v504_v37 }
 0x14b   : > { %1922 = vmatmul.bf16.gmra.mxu1 %v1010_v60  ;;  %v3414_v60 = vor.u32 %v3564_v49, %v3411_v55  ;;  %2537 = vmatpush.bf16.msra.mxu0 %v3410_v54  ;;  %v1017_v63 = vpack.c.b16 %v873_v41, %v865_v40  ;;  %v1019_v8 = vpack.c.b16 %v875_v56, %v867_v53  ;;  %v881_v40 = vunpack.c.l.b16 %v507_v26  ;;  %v3557_v53 = vld [vmem:[%s4903_s3 + $0x18c] sm:$0xf] }
 0x14c   : > { %1991 = vmatmul.bf16.gmra.mxu2 %v1011_v0  ;;  %v1018_v0 = vpack.c.b16 %v874_v52, %v866_v44  ;;  %v1020_v10 = vpack.c.b16 %v876_v59, %v868_v58  ;;  %v882_v41 = vunpack.c.h.b16 %v507_v26  ;;  %v3561_v52 = vld [vmem:[%s4903_s3 + $0x1a4] sm:$0xf0]  ;;  %v3387_v59 = vld [vmem:[%s4903_s3 + $0x1a8] sm:$0xf0]  ;;  %v389_v26 = vld [vmem:[%s3870_s28 + $0x3e0] sm:$0xff] }
 0x14d   : > { %2060 = vmatmul.bf16.gmra.mxu3 %v1012_v3  ;;  %2566 = vmatpush.bf16.msra.mxu1 %v3414_v60  ;;  %v3390_v60 = vor.u32 %v3557_v53, %v3387_v59 }
 0x14f   : > { %v1736_v30 = vpop.f32.mrf.mxu2  ;;  %v1600_v35 = vpop.f32.mrf.mxu0  ;;  %2625 = vmatpush.bf16.msra.mxu3 %v3390_v60 }
 0x150   : > { %v1805_v31 = vpop.f32.mrf.mxu3  ;;  %v1737_v34 = vadd.f32 %v1736_v30, %v1668_v12  ;;  %v1669_v36 = vpop.f32.mrf.mxu1  ;;  %v1601_v38 = vadd.f32 %v4132_v16, %v1600_v35  ;;  %v511_v30 = vpack.c.bf16 %v374_v19, %v373_v17  ;;  %v3556_v17 = vld [vmem:[%s4903_s3 + $0x184] sm:$0xf] }
 0x152   : > { %v4280_v39 = vadd.f32 %v1805_v31, %v1737_v34  ;;  %v1670_v51 = vadd.f32 %v1669_v36, %v1601_v38  ;;  %v508_v31 = vpack.c.bf16 %v368_v21, %v367_v20  ;;  %v512_v36 = vpack.c.bf16 %v376_v25, %v375_v22  ;;  %v381_v20 = vld [vmem:[%s3870_s28 + $0x3a0] sm:$0xff]  ;;  %v382_v21 = vld [vmem:[%s3870_s28 + $0x3a8] sm:$0xff] }
 0x153   : > { %v889_v47 = vunpack.c.l.b16 %v511_v30  ;;  %v890_v48 = vunpack.c.h.b16 %v511_v30  ;;  %v3378_v22 = vor.u32 %v3560_v15, %v3377_v14  ;;  %v3379_v25 = vld [vmem:[%s4903_s3 + $0x1a0] sm:$0xf0]  ;;  %v3681_v14 = vld [vmem:[#allocation4] ss:$0 sm:$0xff] }
 0x154   : > { %v883_v49 = vunpack.c.l.b16 %v508_v31  ;;  %v891_v54 = vunpack.c.l.b16 %v512_v36  ;;  %v884_v55 = vunpack.c.h.b16 %v508_v31  ;;  %v892_v56 = vunpack.c.h.b16 %v512_v36  ;;  %v384_v31 = vld [vmem:[%s3870_s28 + $0x3b8] sm:$0xff] }
 0x155   : > { %v3382_v30 = vor.u32 %v3556_v17, %v3379_v25  ;;  %2538 = vmatpush.bf16.msra.mxu0 %v3378_v22  ;;  %v406_v25 = vld [vmem:[%s3870_s28 + $0x468] sm:$0xff] }
 0x157   : > { %v1738_v61 = vpop.f32.mrf.mxu2  ;;  %v1603_v5 = vpop.f32.mrf.mxu0  ;;  %2567 = vmatpush.bf16.msra.mxu1 %v3382_v30  ;;  %v3553_v30 = vld [vmem:[%s4903_s3 + $0x164] sm:$0xf0] }
 0x158   : > { %v1807_v62 = vpop.f32.mrf.mxu3  ;;  %v1739_v3 = vadd.f32 %v1738_v61, %v1670_v51  ;;  %v1672_v6 = vpop.f32.mrf.mxu1  ;;  %v1604_v11 = vadd.f32 %v4132_v16, %v1603_v5  ;;  %v3385_v51 = vld [vmem:[%s4903_s3 + $0x188] sm:$0xf] }
 0x159   : > { %v3386_v58 = vor.u32 %v3561_v52, %v3385_v51 }
 0x15a   : > { %v4295_v12 = vadd.f32 %v1807_v62, %v1739_v3  ;;  %v1673_v13 = vadd.f32 %v1672_v6, %v1604_v11  ;;  %1858 = vmatmul.bf16.gmra.mxu0 %v1017_v63  ;;  %v1025_v63 = vpack.c.b16 %v889_v47, %v881_v40 }
 0x15b   : > { %1927 = vmatmul.bf16.gmra.mxu1 %v1018_v0  ;;  %2596 = vmatpush.bf16.msra.mxu2 %v3386_v58  ;;  %v1026_v0 = vpack.c.b16 %v890_v48, %v882_v41 }
 0x15c   : > { %1996 = vmatmul.bf16.gmra.mxu2 %v1019_v8  ;;  %v1027_v8 = vpack.c.b16 %v891_v54, %v883_v49 }
 0x15d   : > { %2065 = vmatmul.bf16.gmra.mxu3 %v1020_v10  ;;  %v1028_v10 = vpack.c.b16 %v892_v56, %v884_v55 }
 0x15f   : > { %v1741_v28 = vpop.f32.mrf.mxu2  ;;  %v1605_v34 = vpop.f32.mrf.mxu0 }
 0x160   : > { %v1810_v29 = vpop.f32.mrf.mxu3  ;;  %v1742_v32 = vadd.f32 %v1741_v28, %v1673_v13  ;;  %v1674_v35 = vpop.f32.mrf.mxu1  ;;  %v1606_v37 = vadd.f32 %v4132_v16, %v1605_v34  ;;  %v390_v28 = vld [vmem:[%s3870_s28 + $0x3e8] sm:$0xff]  ;;  %v392_v34 = vld [vmem:[%s3870_s28 + $0x3f8] sm:$0xff] }
 0x161   : > { %v519_v40 = vpack.c.bf16 %v390_v28, %v389_v26  ;;  %v399_v26 = vld [vmem:[%s3870_s28 + $0x430] sm:$0xff]  ;;  %v400_v28 = vld [vmem:[%s3870_s28 + $0x438] sm:$0xff] }
 0x162   : > { %v4306_v38 = vadd.f32 %v1810_v29, %v1742_v32  ;;  %v1675_v44 = vadd.f32 %v1674_v35, %v1606_v37  ;;  %v383_v29 = vld [vmem:[%s3870_s28 + $0x3b0] sm:$0xff]  ;;  %v515_v35 = vpack.c.bf16 %v382_v21, %v381_v20  ;;  %v398_v20 = vld [vmem:[%s3870_s28 + $0x428] sm:$0xff]  ;;  %v405_v21 = vld [vmem:[%s3870_s28 + $0x460] sm:$0xff] }
 0x163   : > { %v391_v32 = vld [vmem:[%s3870_s28 + $0x3f0] sm:$0xff]  ;;  %v516_v48 = vpack.c.bf16 %v384_v31, %v383_v29  ;;  %v905_v55 = vunpack.c.l.b16 %v519_v40  ;;  %v906_v58 = vunpack.c.h.b16 %v519_v40  ;;  %v3353_v29 = vld [vmem:[%s4903_s3 + $0x148] sm:$0xf]  ;;  %v3549_v31 = vld [vmem:[%s4903_s3 + $0x14c] sm:$0xf] }
 0x164   : > { %v520_v49 = vpack.c.bf16 %v392_v34, %v391_v32  ;;  %v897_v53 = vunpack.c.l.b16 %v515_v35  ;;  %v898_v56 = vunpack.c.h.b16 %v515_v35  ;;  %v407_v32 = vld [vmem:[%s3870_s28 + $0x470] sm:$0xff]  ;;  %v408_v34 = vld [vmem:[%s3870_s28 + $0x478] sm:$0xff]  ;;  %v3354_v35 = vor.u32 %v3553_v30, %v3353_v29 }
 0x165   : > { %v899_v59 = vunpack.c.l.b16 %v516_v48 }
 0x166   : > { %v907_v60 = vunpack.c.l.b16 %v520_v49  ;;  %2597 = vmatpush.bf16.msra.mxu2 %v3354_v35  ;;  %v414_v35 = vld [vmem:[%s3870_s28 + $0x4a8] sm:$0xff] }
 0x167   : > { %v1743_v61 = vpop.f32.mrf.mxu2  ;;  %v1608_v5 = vpop.f32.mrf.mxu0 }
 0x168   : > { %v1812_v62 = vpop.f32.mrf.mxu3  ;;  %v1744_v3 = vadd.f32 %v1743_v61, %v1675_v44  ;;  %v1677_v6 = vpop.f32.mrf.mxu1  ;;  %v1609_v11 = vadd.f32 %v4132_v16, %v1608_v5  ;;  %v900_v61 = vunpack.c.h.b16 %v516_v48  ;;  %v1034_v5 = vpack.c.b16 %v906_v58, %v898_v56 }
 0x16a   : > { %v4321_v13 = vadd.f32 %v1812_v62, %v1744_v3  ;;  %v1678_v19 = vadd.f32 %v1677_v6, %v1609_v11  ;;  %1863 = vmatmul.bf16.gmra.mxu0 %v1025_v63  ;;  %v908_v62 = vunpack.c.h.b16 %v520_v49  ;;  %v1033_v3 = vpack.c.b16 %v905_v55, %v897_v53 }
 0x16b   : > { %1932 = vmatmul.bf16.gmra.mxu1 %v1026_v0  ;;  %v524_v53 = vpack.c.bf16 %v400_v28, %v399_v26 }
 0x16c   : > { %2001 = vmatmul.bf16.gmra.mxu2 %v1027_v8  ;;  %v1036_v11 = vpack.c.b16 %v908_v62, %v900_v61 }
 0x16d   : > { %2070 = vmatmul.bf16.gmra.mxu3 %v1028_v10  ;;  %v1035_v10 = vpack.c.b16 %v907_v60, %v899_v59 }
 0x16f   : > { %v1746_v36 = vpop.f32.mrf.mxu2  ;;  %v1610_v44 = vpop.f32.mrf.mxu0 }
 0x170   : > { %v1815_v37 = vpop.f32.mrf.mxu3  ;;  %v1747_v41 = vadd.f32 %v1746_v36, %v1678_v19  ;;  %v1679_v47 = vpop.f32.mrf.mxu1  ;;  %v1611_v51 = vadd.f32 %v4132_v16, %v1610_v44  ;;  %v397_v19 = vld [vmem:[%s3870_s28 + $0x420] sm:$0xff]  ;;  %v3355_v36 = vld [vmem:[%s4903_s3 + $0x168] sm:$0xf0] }
 0x171   : > { %v3358_v40 = vor.u32 %v3549_v31, %v3355_v36  ;;  %v421_v36 = vld [vmem:[%s3870_s28 + $0x4e0] sm:$0xff] }
 0x172   : > { %v4344_v52 = vadd.f32 %v1815_v37, %v1747_v41  ;;  %v1680_v54 = vadd.f32 %v1679_v47, %v1611_v51  ;;  %v523_v37 = vpack.c.bf16 %v398_v20, %v397_v19  ;;  %v527_v47 = vpack.c.bf16 %v406_v25, %v405_v21 }
 0x173   : > { %2626 = vmatpush.bf16.msra.mxu3 %v3358_v40  ;;  %v415_v40 = vld [vmem:[%s3870_s28 + $0x4b0] sm:$0xff] }
 0x174   : > { %v913_v58 = vunpack.c.l.b16 %v523_v37  ;;  %v921_v60 = vunpack.c.l.b16 %v527_v47  ;;  %v914_v61 = vunpack.c.h.b16 %v523_v37  ;;  %v922_v62 = vunpack.c.h.b16 %v527_v47  ;;  %v422_v37 = vld [vmem:[%s3870_s28 + $0x4e8] sm:$0xff]  ;;  %v424_v47 = vld [vmem:[%s3870_s28 + $0x4f8] sm:$0xff] }
 0x176   : > { %v1041_v20 = vpack.c.b16 %v921_v60, %v913_v58  ;;  %v1042_v21 = vpack.c.b16 %v922_v62, %v914_v61 }
 0x177   : > { %v1748_v63 = vpop.f32.mrf.mxu2  ;;  %v1613_v6 = vpop.f32.mrf.mxu0 }
 0x178   : > { %v1817_v0 = vpop.f32.mrf.mxu3  ;;  %v1749_v16 = vadd.f32 %v1748_v63, %v1680_v54  ;;  %v1682_v8 = vpop.f32.mrf.mxu1  ;;  %v1614_v15 = vadd.f32 %v3681_v14, %v1613_v6  ;;  %v528_v54 = vpack.c.bf16 %v408_v34, %v407_v32  ;;  %v915_v63 = vunpack.c.l.b16 %v524_v53  ;;  %v3552_v6 = vld [vmem:[%s4903_s3 + $0x15c] sm:$0xf0] }
 0x179   : > { %v413_v34 = vld [vmem:[%s3870_s28 + $0x4a0] sm:$0xff] }
 0x17a   : > { %v4346_v17 = vadd.f32 %v1817_v0, %v1749_v16  ;;  %v1683_v22 = vadd.f32 %v1682_v8, %v1614_v15  ;;  %1868 = vmatmul.bf16.gmra.mxu0 %v1033_v3  ;;  %v923_v0 = vunpack.c.l.b16 %v528_v54  ;;  %v916_v3 = vunpack.c.h.b16 %v524_v53  ;;  %v3345_v16 = vld [vmem:[%s4903_s3 + $0x140] sm:$0xf]  ;;  %v3548_v8 = vld [vmem:[%s4903_s3 + $0x144] sm:$0xf] }
 0x17b   : > { %1937 = vmatmul.bf16.gmra.mxu1 %v1034_v5  ;;  %v924_v5 = vunpack.c.h.b16 %v528_v54  ;;  %v535_v53 = vpack.c.bf16 %v422_v37, %v421_v36  ;;  %v437_v36 = vld [vmem:[%s3870_s28 + $0x560] sm:$0xff] }
 0x17c   : > { %2006 = vmatmul.bf16.gmra.mxu2 %v1035_v10  ;;  %v3346_v10 = vor.u32 %v3552_v6, %v3345_v16  ;;  %v1043_v28 = vpack.c.b16 %v923_v0, %v915_v63 }
 0x17d   : > { %2075 = vmatmul.bf16.gmra.mxu3 %v1036_v11  ;;  %v3347_v11 = vld [vmem:[%s4903_s3 + $0x160] sm:$0xf0]  ;;  %v1044_v29 = vpack.c.b16 %v924_v5, %v916_v3  ;;  %v937_v62 = vunpack.c.l.b16 %v535_v53  ;;  %v938_v0 = vunpack.c.h.b16 %v535_v53 }
 0x17e   : > { %2539 = vmatpush.bf16.msra.mxu0 %v3346_v10  ;;  %v3545_v10 = vld [vmem:[%s4903_s3 + $0x124] sm:$0xf0] }
 0x17f   : > { %v1751_v41 = vpop.f32.mrf.mxu2  ;;  %v1615_v49 = vpop.f32.mrf.mxu0 }
 0x180   : > { %v1820_v44 = vpop.f32.mrf.mxu3  ;;  %v1752_v48 = vadd.f32 %v1751_v41, %v1683_v22  ;;  %v1684_v51 = vpop.f32.mrf.mxu1  ;;  %v1616_v55 = vadd.f32 %v3681_v14, %v1615_v49  ;;  %v3350_v14 = vor.u32 %v3548_v8, %v3347_v11  ;;  %v416_v41 = vld [vmem:[%s3870_s28 + $0x4b8] sm:$0xff]  ;;  %v3321_v8 = vld [vmem:[%s4903_s3 + $0x108] sm:$0xf]  ;;  %v3541_v11 = vld [vmem:[%s4903_s3 + $0x10c] sm:$0xf] }
 0x181   : > { %v532_v58 = vpack.c.bf16 %v416_v41, %v415_v40  ;;  %v438_v40 = vld [vmem:[%s3870_s28 + $0x568] sm:$0xff]  ;;  %v431_v41 = vld [vmem:[%s3870_s28 + $0x530] sm:$0xff] }
 0x182   : > { %v4368_v56 = vadd.f32 %v1820_v44, %v1752_v48  ;;  %v1685_v59 = vadd.f32 %v1684_v51, %v1616_v55  ;;  %2568 = vmatpush.bf16.msra.mxu1 %v3350_v14  ;;  %v423_v44 = vld [vmem:[%s3870_s28 + $0x4f0] sm:$0xff]  ;;  %v531_v51 = vpack.c.bf16 %v414_v35, %v413_v34  ;;  %v3322_v14 = vor.u32 %v3545_v10, %v3321_v8  ;;  %v429_v34 = vld [vmem:[%s3870_s28 + $0x520] sm:$0xff]  ;;  %v430_v35 = vld [vmem:[%s3870_s28 + $0x528] sm:$0xff] }
 0x183   : > { %v931_v3 = vunpack.c.l.b16 %v532_v58  ;;  %v932_v16 = vunpack.c.h.b16 %v532_v58 }
 0x184   : > { %v929_v61 = vunpack.c.l.b16 %v531_v51  ;;  %v930_v63 = vunpack.c.h.b16 %v531_v51  ;;  %2598 = vmatpush.bf16.msra.mxu2 %v3322_v14  ;;  %v440_v51 = vld [vmem:[%s3870_s28 + $0x578] sm:$0xff] }
 0x187   : > { %v1753_v15 = vpop.f32.mrf.mxu2  ;;  %v1834_v25 = vpop.f32.mrf.mxu0 }
 0x188   : > { %v1822_v19 = vpop.f32.mrf.mxu3  ;;  %v1754_v22 = vadd.f32 %v1753_v15, %v1685_v59  ;;  %v1903_v26 = vpop.f32.mrf.mxu1  ;;  %v1835_v30 = vadd.f32 %v1834_v25, %v4144_v43  ;;  %v536_v59 = vpack.c.bf16 %v424_v47, %v423_v44  ;;  %v3323_v15 = vld [vmem:[%s4903_s3 + $0x128] sm:$0xf0]  ;;  %v1050_v25 = vpack.c.b16 %v938_v0, %v930_v63  ;;  %v432_v44 = vld [vmem:[%s3870_s28 + $0x538] sm:$0xff]  ;;  %v3313_v47 = vld [vmem:[%s4903_s3 + $0x100] sm:$0xf] }
 0x189   : > { %v543_v63 = vpack.c.bf16 %v438_v40, %v437_v36 }
 0x18a   : > { %v4383_v31 = vadd.f32 %v1822_v19, %v1754_v22  ;;  %v1904_v32 = vadd.f32 %v1903_v26, %v1835_v30  ;;  %1873 = vmatmul.bf16.gmra.mxu0 %v1041_v20  ;;  %v939_v5 = vunpack.c.l.b16 %v536_v59  ;;  %v940_v6 = vunpack.c.h.b16 %v536_v59 }
 0x18b   : > { %1942 = vmatmul.bf16.gmra.mxu1 %v1042_v21  ;;  %v3326_v19 = vor.u32 %v3541_v11, %v3323_v15  ;;  %v1049_v22 = vpack.c.b16 %v937_v62, %v929_v61  ;;  %v539_v62 = vpack.c.bf16 %v430_v35, %v429_v34  ;;  %v953_v11 = vunpack.c.l.b16 %v543_v63 }
 0x18c   : > { %2011 = vmatmul.bf16.gmra.mxu2 %v1043_v28  ;;  %v1052_v30 = vpack.c.b16 %v940_v6, %v932_v16  ;;  %v540_v16 = vpack.c.bf16 %v432_v44, %v431_v41  ;;  %v954_v15 = vunpack.c.h.b16 %v543_v63  ;;  %v445_v41 = vld [vmem:[%s3870_s28 + $0x5a0] sm:$0xff]  ;;  %v446_v44 = vld [vmem:[%s3870_s28 + $0x5a8] sm:$0xff] }
 0x18d   : > { %2080 = vmatmul.bf16.gmra.mxu3 %v1044_v29  ;;  %v1051_v29 = vpack.c.b16 %v939_v5, %v931_v3  ;;  %v945_v10 = vunpack.c.l.b16 %v539_v62  ;;  %v946_v14 = vunpack.c.h.b16 %v539_v62  ;;  %v3291_v62 = vld [vmem:[%s4903_s3 + $0xe8] sm:$0xf0] }
 0x18e   : > { %2627 = vmatpush.bf16.msra.mxu3 %v3326_v19  ;;  %v947_v19 = vunpack.c.l.b16 %v540_v16 }
 0x18f   : > { %v1972_v48 = vpop.f32.mrf.mxu2  ;;  %v4393_v54 = vpop.f32.mrf.mxu0 }
 0x190   : > { %v2041_v49 = vpop.f32.mrf.mxu3  ;;  %v1973_v43 = vadd.f32 %v1972_v48, %v1904_v32  ;;  %v4395_v55 = vpop.f32.mrf.mxu1  ;;  %v3540_v48 = vld [vmem:[%s4903_s3 + $0x104] sm:$0xf] }
 0x192   : > { %v4397_v60 = vadd.f32 %v2041_v49, %v1973_v43  ;;  %v439_v49 = vld [vmem:[%s3870_s28 + $0x570] sm:$0xff]  ;;  %v3315_v43 = vld [vmem:[%s4903_s3 + $0x120] sm:$0xf0] }
 0x193   : > { %v3318_v58 = vor.u32 %v3540_v48, %v3315_v43  ;;  %v544_v6 = vpack.c.bf16 %v440_v51, %v439_v49  ;;  %v454_v48 = vld [vmem:[%s3870_s28 + $0x5e8] sm:$0xff]  ;;  %v447_v49 = vld [vmem:[%s3870_s28 + $0x5b0] sm:$0xff]  ;;  %v448_v51 = vld [vmem:[%s3870_s28 + $0x5b8] sm:$0xff] }
 0x194   : > { %v3533_v43 = vld [vmem:[%s4903_s3 + $0xcc] sm:$0xf]  ;;  %3633 = vtanh.f32 %v4397_v60 }
 0x195   : > { %2569 = vmatpush.bf16.msra.mxu1 %v3318_v58  ;;  %v455_v58 = vld [vmem:[%s3870_s28 + $0x5f0] sm:$0xff]  ;;  %v3294_v63 = vor.u32 %v3533_v43, %v3291_v62 }
 0x197   : > { %v4411_v20 = vpop.f32.mrf.mxu2  ;;  %v1839_v26 = vpop.f32.mrf.mxu0  ;;  %2628 = vmatpush.bf16.msra.mxu3 %v3294_v63 }
 0x198   : > { %v4413_v21 = vpop.f32.mrf.mxu3  ;;  %v1908_v28 = vpop.f32.mrf.mxu1  ;;  %v1840_v32 = vadd.f32 %v1839_v26, %v4170_v24  ;;  %v3544_v24 = vld [vmem:[%s4903_s3 + $0x11c] sm:$0xf0]  ;;  %v956_v26 = vunpack.c.h.b16 %v544_v6 }
 0x199   : > { %v3314_v53 = vor.u32 %v3544_v24, %v3313_v47  ;;  %v453_v47 = vld [vmem:[%s3870_s28 + $0x5e0] sm:$0xff] }
 0x19a   : > { %v1909_v37 = vadd.f32 %v1908_v28, %v1840_v32  ;;  %1878 = vmatmul.bf16.gmra.mxu0 %v1049_v22  ;;  %v955_v22 = vunpack.c.l.b16 %v544_v6  ;;  %v1058_v32 = vpack.c.b16 %v954_v15, %v946_v14  ;;  %v547_v6 = vpack.c.bf16 %v446_v44, %v445_v41 }
 0x19b   : > { %1947 = vmatmul.bf16.gmra.mxu1 %v1050_v25  ;;  %2540 = vmatpush.bf16.msra.mxu0 %v3314_v53  ;;  %v948_v25 = vunpack.c.h.b16 %v540_v16  ;;  %v3289_v53 = vld [vmem:[%s4903_s3 + $0xc8] sm:$0xf] }
 0x19c   : > { %2016 = vmatmul.bf16.gmra.mxu2 %v1051_v29  ;;  %v1059_v36 = vpack.c.b16 %v955_v22, %v947_v19  ;;  %v548_v19 = vpack.c.bf16 %v448_v51, %v447_v49 }
 0x19d   : > { %2085 = vmatmul.bf16.gmra.mxu3 %v1052_v30  ;;  %v1057_v30 = vpack.c.b16 %v953_v11, %v945_v10  ;;  %v551_v10 = vpack.c.bf16 %v454_v48, %v453_v47 }
 0x19f   : > { %v1977_v59 = vpop.f32.mrf.mxu2  ;;  %v4436_v3 = vpop.f32.mrf.mxu0 }
 0x1a0   : > { %v2046_v61 = vpop.f32.mrf.mxu3  ;;  %v1978_v0 = vadd.f32 %v1977_v59, %v1909_v37  ;;  %v4438_v5 = vpop.f32.mrf.mxu1  ;;  %v1060_v37 = vpack.c.b16 %v956_v26, %v948_v25  ;;  %v456_v59 = vld [vmem:[%s3870_s28 + $0x5f8] sm:$0xff]  ;;  %v961_v26 = vunpack.c.l.b16 %v547_v6 }
 0x1a1   : > { %v552_v22 = vpack.c.bf16 %v456_v59, %v455_v58  ;;  %v3281_v58 = vld [vmem:[%s4903_s3 + $0xc0] sm:$0xf] }
 0x1a2   : > { %v4440_v8 = vadd.f32 %v2046_v61, %v1978_v0  ;;  %v3536_v59 = vld [vmem:[%s4903_s3 + $0xdc] sm:$0xf0] }
 0x1a3   : > { %v3282_v62 = vor.u32 %v3536_v59, %v3281_v58 }
 0x1a5   : > { %2541 = vmatpush.bf16.msra.mxu0 %v3282_v62 }
 0x1a7   : > { %v4442_v28 = vpop.f32.mrf.mxu2  ;;  %v1844_v34 = vpop.f32.mrf.mxu0 }
 0x1a8   : > { %v4444_v29 = vpop.f32.mrf.mxu3  ;;  %v1913_v35 = vpop.f32.mrf.mxu1  ;;  %v1845_v40 = vadd.f32 %v1844_v34, %v4184_v1  ;;  %v3537_v1 = vld [vmem:[%s4903_s3 + $0xe4] sm:$0xf0]  ;;  %v970_v34 = vunpack.c.h.b16 %v551_v10 }
 0x1a9   : > { %v3290_v61 = vor.u32 %v3537_v1, %v3289_v53 }
 0x1aa   : > { %v1914_v24 = vadd.f32 %v1913_v35, %v1845_v40  ;;  %1883 = vmatmul.bf16.gmra.mxu0 %v1057_v30  ;;  %v969_v30 = vunpack.c.l.b16 %v551_v10  ;;  %v963_v35 = vunpack.c.l.b16 %v548_v19  ;;  %v972_v40 = vunpack.c.h.b16 %v552_v22 }
 0x1ab   : > { %1952 = vmatmul.bf16.gmra.mxu1 %v1058_v32  ;;  %2599 = vmatpush.bf16.msra.mxu2 %v3290_v61  ;;  %v962_v32 = vunpack.c.h.b16 %v547_v6  ;;  %v3532_v61 = vld [vmem:[%s4903_s3 + $0xc4] sm:$0xf] }
 0x1ac   : > { %2021 = vmatmul.bf16.gmra.mxu2 %v1059_v36  ;;  %v971_v36 = vunpack.c.l.b16 %v552_v22  ;;  %v1065_v47 = vpack.c.b16 %v969_v30, %v961_v26 }
 0x1ad   : > { %2090 = vmatmul.bf16.gmra.mxu3 %v1060_v37  ;;  %v964_v37 = vunpack.c.h.b16 %v548_v19 }
 0x1ae   : > { %v1067_v51 = vpack.c.b16 %v971_v36, %v963_v35  ;;  %v3257_v36 = vld [vmem:[%s4903_s3 + $0x88] sm:$0xf] }
 0x1af   : > { %v1982_v0 = vpop.f32.mrf.mxu2  ;;  %v4467_v14 = vpop.f32.mrf.mxu0  ;;  %v1068_v53 = vpack.c.b16 %v972_v40, %v964_v37  ;;  %v3529_v37 = vld [vmem:[%s4903_s3 + $0xa4] sm:$0xf0]  ;;  %v3525_v40 = vld [vmem:[%s4903_s3 + $0x8c] sm:$0xf] }
 0x1b0   : > { %v2051_v16 = vpop.f32.mrf.mxu3  ;;  %v1983_v11 = vadd.f32 %v1982_v0, %v1914_v24  ;;  %v4469_v15 = vpop.f32.mrf.mxu1  ;;  %v1066_v24 = vpack.c.b16 %v970_v34, %v962_v32 }
 0x1b2   : > { %v4471_v25 = vadd.f32 %v2051_v16, %v1983_v11 }
 0x1b7   : > { %v4473_v41 = vpop.f32.mrf.mxu2  ;;  %v1849_v48 = vpop.f32.mrf.mxu0 }
 0x1b8   : > { %v4475_v44 = vpop.f32.mrf.mxu3  ;;  %v1918_v49 = vpop.f32.mrf.mxu1  ;;  %v1850_v1 = vadd.f32 %v1849_v48, %v4198_v46  ;;  %v3283_v46 = vld [vmem:[%s4903_s3 + $0xe0] sm:$0xf0] }
 0x1b9   : > { %v3286_v63 = vor.u32 %v3532_v61, %v3283_v46  ;;  %v3524_v46 = vld [vmem:[%s4903_s3 + $0x84] sm:$0xf] }
 0x1ba   : > { %v1919_v43 = vadd.f32 %v1918_v49, %v1850_v1  ;;  %1888 = vmatmul.bf16.gmra.mxu0 %v1065_v47  ;;  %v3258_v47 = vor.u32 %v3529_v37, %v3257_v36 }
 0x1bb   : > { %1957 = vmatmul.bf16.gmra.mxu1 %v1066_v24  ;;  %v3259_v24 = vld [vmem:[%s4903_s3 + $0xa8] sm:$0xf0] }
 0x1bc   : > { %2026 = vmatmul.bf16.gmra.mxu2 %v1067_v51  ;;  %2570 = vmatpush.bf16.msra.mxu1 %v3286_v63  ;;  %v3262_v48 = vor.u32 %v3525_v40, %v3259_v24  ;;  %v1842_v24 = vadd.f32 %v4436_v3, %v4173_v45  ;;  %v3225_v45 = vld [vmem:[%s4903_s3 + $0x48] sm:$0xf] }
 0x1bd   : > { %2095 = vmatmul.bf16.gmra.mxu3 %v1068_v53  ;;  %2600 = vmatpush.bf16.msra.mxu2 %v3258_v47  ;;  %v3521_v3 = vld [vmem:[%s4903_s3 + $0x64] sm:$0xf0] }
 0x1be   : > { %2629 = vmatpush.bf16.msra.mxu3 %v3262_v48 }
 0x1bf   : > { %v1987_v0 = vpop.f32.mrf.mxu2  ;;  %v4490_v10 = vpop.f32.mrf.mxu0 }
 0x1c0   : > { %v2056_v16 = vpop.f32.mrf.mxu3  ;;  %v1988_v6 = vadd.f32 %v1987_v0, %v1919_v43  ;;  %v4492_v11 = vpop.f32.mrf.mxu1 }
 0x1c2   : > { %v4494_v19 = vadd.f32 %v2056_v16, %v1988_v6 }
 0x1c7   : > { %v4496_v22 = vpop.f32.mrf.mxu2  ;;  %v1854_v30 = vpop.f32.mrf.mxu0 }
 0x1c8   : > { %v4498_v26 = vpop.f32.mrf.mxu3  ;;  %v1923_v32 = vpop.f32.mrf.mxu1  ;;  %v1855_v34 = vadd.f32 %v1854_v30, %v4212_v27  ;;  %v1837_v27 = vadd.f32 %v4393_v54, %v4156_v2  ;;  %v3249_v2 = vld [vmem:[%s4903_s3 + $0x80] sm:$0xf] }
 0x1c9   : > { %v3528_v54 = vld [vmem:[%s4903_s3 + $0x9c] sm:$0xf0] }
 0x1ca   : > { %v1924_v35 = vadd.f32 %v1923_v32, %v1855_v34  ;;  %v1906_v58 = vadd.f32 %v4395_v55, %v1837_v27  ;;  %v3250_v55 = vor.u32 %v3528_v54, %v3249_v2  ;;  %v3634_v34 = vpop.eup %3633 }
 0x1cc   : > { %v1975_v62 = vadd.f32 %v4411_v20, %v1906_v58  ;;  %2542 = vmatpush.bf16.msra.mxu0 %v3250_v55 }
 0x1ce   : > { %v2044_v63 = vadd.f32 %v4413_v21, %v1975_v62 }
 0x1cf   : > { %v1992_v49 = vpop.f32.mrf.mxu2  ;;  %v1856_v1 = vpop.f32.mrf.mxu0 }
 0x1d0   : > { %v2061_v51 = vpop.f32.mrf.mxu3  ;;  %v1993_v53 = vadd.f32 %v1992_v49, %v1924_v35  ;;  %v1925_v43 = vpop.f32.mrf.mxu1  ;;  %v1857_v61 = vadd.f32 %v1856_v1, %v4215_v50  ;;  %v3251_v50 = vld [vmem:[%s4903_s3 + $0xa0] sm:$0xf0]  ;;  %v1911_v1 = vadd.f32 %v4438_v5, %v1842_v24  ;;  %v3517_v5 = vld [vmem:[%s4903_s3 + $0x4c] sm:$0xf] }
 0x1d1   : > { %v3254_v60 = vor.u32 %v3524_v46, %v3251_v50 }
 0x1d2   : > { %v2062_v59 = vadd.f32 %v2061_v51, %v1993_v53  ;;  %v1926_v20 = vadd.f32 %v1925_v43, %v1857_v61 }
 0x1d3   : > { %2571 = vmatpush.bf16.msra.mxu1 %v3254_v60 }
 0x1d4   : > { %3635 = vtanh.f32 %v2062_v59  ;;  %v1980_v59 = vadd.f32 %v4442_v28, %v1911_v1 }
 0x1d5   : > { %3637 = vtanh.f32 %v2044_v63 }
 0x1d6   : > { %v2049_v2 = vadd.f32 %v4444_v29, %v1980_v59  ;;  %v3520_v29 = vld [vmem:[%s4903_s3 + $0x5c] sm:$0xf0] }
 0x1d7   : > { %v1994_v0 = vpop.f32.mrf.mxu2  ;;  %v1859_v30 = vpop.f32.mrf.mxu0 }
 0x1d8   : > { %v2063_v16 = vpop.f32.mrf.mxu3  ;;  %v1995_v6 = vadd.f32 %v1994_v0, %v1926_v20  ;;  %v1928_v32 = vpop.f32.mrf.mxu1  ;;  %v1860_v35 = vadd.f32 %v1859_v30, %v4226_v9 }
 0x1da   : > { %v3636_v36 = vpop.eup %3635  ;;  %v2064_v37 = vadd.f32 %v2063_v16, %v1995_v6  ;;  %v1929_v47 = vadd.f32 %v1928_v32, %v1860_v35  ;;  %v3217_v32 = vld [vmem:[%s4903_s3 + $0x40] sm:$0xf]  ;;  %v3219_v35 = vld [vmem:[%s4903_s3 + $0x60] sm:$0xf0] }
 0x1db   : > { %v4533_v40 = vadd.f32 %v3636_v36, %v3634_v34  ;;  %v3638_v53 = vpop.eup %3637  ;;  %v3516_v34 = vld [vmem:[%s4903_s3 + $0x44] sm:$0xf]  ;;  %v1847_v36 = vadd.f32 %v4467_v14, %v4187_v23 }
 0x1dc   : > { %3639 = vtanh.f32 %v2064_v37  ;;  %v3222_v37 = vor.u32 %v3516_v34, %v3219_v35  ;;  %v3512_v35 = vld [vmem:[%s4903_s3 + $0x1c] sm:$0xf0] }
 0x1dd   : > { %3641 = vtanh.f32 %v4440_v8  ;;  %v3227_v8 = vld [vmem:[%s4903_s3 + $0x68] sm:$0xf0] }
 0x1de   : > { %v3230_v28 = vor.u32 %v3517_v5, %v3227_v8  ;;  %2572 = vmatpush.bf16.msra.mxu1 %v3222_v37 }
 0x1df   : > { %v1997_v21 = vpop.f32.mrf.mxu2  ;;  %v1861_v49 = vpop.f32.mrf.mxu0 }
 0x1e0   : > { %v2066_v27 = vpop.f32.mrf.mxu3  ;;  %v1998_v48 = vadd.f32 %v1997_v21, %v1929_v47  ;;  %v1930_v51 = vpop.f32.mrf.mxu1  ;;  %v1862_v58 = vadd.f32 %v1861_v49, %v4229_v33  ;;  %v3226_v33 = vor.u32 %v3521_v3, %v3225_v45  ;;  %2630 = vmatpush.bf16.msra.mxu3 %v3230_v28 }
 0x1e2   : > { %v3640_v43 = vpop.eup %3639  ;;  %v2067_v9 = vadd.f32 %v2066_v27, %v1998_v48  ;;  %v1931_v62 = vadd.f32 %v1930_v51, %v1862_v58  ;;  %2601 = vmatpush.bf16.msra.mxu2 %v3226_v33  ;;  %v1916_v51 = vadd.f32 %v4469_v15, %v1847_v36 }
 0x1e3   : > { %v4541_v61 = vadd.f32 %v3640_v43, %v3638_v53  ;;  %v3642_v20 = vpop.eup %3641 }
 0x1e4   : > { %3643 = vtanh.f32 %v2067_v9  ;;  %v1985_v9 = vadd.f32 %v4473_v41, %v1916_v51 }
 0x1e5   : > { %3645 = vtanh.f32 %v2049_v2  ;;  %v3513_v2 = vld [vmem:[%s4903_s3 + $0x24] sm:$0xf0] }
 0x1e6   : > { %v2054_v58 = vadd.f32 %v4475_v44, %v1985_v9  ;;  %v3193_v44 = vld [vmem:[%s4903_s3 + $0x8] sm:$0xf] }
 0x1e7   : > { %v1999_v54 = vpop.f32.mrf.mxu2  ;;  %v1864_v50 = vpop.f32.mrf.mxu0 }
 0x1e8   : > { %v2068_v46 = vpop.f32.mrf.mxu3  ;;  %v2000_v55 = vadd.f32 %v1999_v54, %v1931_v62  ;;  %v1933_v60 = vpop.f32.mrf.mxu1  ;;  %v1865_v63 = vadd.f32 %v1864_v50, %v4240_v57  ;;  %v3218_v57 = vor.u32 %v3520_v29, %v3217_v32  ;;  %v1852_v62 = vadd.f32 %v4490_v10, %v4201_v4 }
 0x1e9   : > { %v3194_v54 = vor.u32 %v3513_v2, %v3193_v44  ;;  %v3567_v44 = vld [vmem:[%s4903_s3 + $0x1dc] sm:$0xf] }
 0x1ea   : > { %v3644_v0 = vpop.eup %3643  ;;  %v2069_v16 = vadd.f32 %v2068_v46, %v2000_v55  ;;  %v1934_v30 = vadd.f32 %v1933_v60, %v1865_v63  ;;  %2543 = vmatpush.bf16.msra.mxu0 %v3218_v57  ;;  %v3195_v46 = vld [vmem:[%s4903_s3 + $0x28] sm:$0xf0]  ;;  %v3185_v57 = vld [vmem:[%s4903_s3] sm:$0xf] }
 0x1eb   : > { %v4557_v6 = vadd.f32 %v3644_v0, %v3642_v20  ;;  %v3646_v49 = vpop.eup %3645  ;;  %2602 = vmatpush.bf16.msra.mxu2 %v3194_v54  ;;  %v1921_v0 = vadd.f32 %v4492_v11, %v1852_v62  ;;  %v3508_v11 = vld [vmem:[%s4903_s3 + $0x4] sm:$0xf]  ;;  %v3571_v62 = vld [vmem:[%s4903_s3 + $0x1f4] sm:$0xf0] }
 0x1ec   : > { %3647 = vtanh.f32 %v2069_v16 }
 0x1ed   : > { %3649 = vtanh.f32 %v4471_v25  ;;  %v1990_v29 = vadd.f32 %v4496_v22, %v1921_v0 }
 0x1ef   : > { %v2002_v47 = vpop.f32.mrf.mxu2  ;;  %v1866_v27 = vpop.f32.mrf.mxu0  ;;  %v2059_v37 = vadd.f32 %v4498_v26, %v1990_v29 }
 0x1f0   : > { %v2071_v24 = vpop.f32.mrf.mxu3  ;;  %v2003_v21 = vadd.f32 %v2002_v47, %v1934_v30  ;;  %v1935_v48 = vpop.f32.mrf.mxu1  ;;  %v1867_v43 = vadd.f32 %v1866_v27, %v4243_v18 }
 0x1f2   : > { %v3648_v53 = vpop.eup %3647  ;;  %v2072_v1 = vadd.f32 %v2071_v24, %v2003_v21  ;;  %v1936_v14 = vadd.f32 %v1935_v48, %v1867_v43 }
 0x1f3   : > { %v4577_v23 = vadd.f32 %v3648_v53, %v3646_v49  ;;  %v3650_v15 = vpop.eup %3649 }
 0x1f4   : > { %3651 = vtanh.f32 %v2072_v1 }
 0x1f5   : > { %3653 = vtanh.f32 %v2054_v58 }
 0x1f7   : > { %v2004_v59 = vpop.f32.mrf.mxu2  ;;  %v1869_v5 = vpop.f32.mrf.mxu0 }
 0x1f8   : > { %v2073_v45 = vpop.f32.mrf.mxu3  ;;  %v2005_v3 = vadd.f32 %v2004_v59, %v1936_v14  ;;  %v1938_v33 = vpop.f32.mrf.mxu1  ;;  %v1870_v8 = vadd.f32 %v1869_v5, %v4254_v42  ;;  %v3509_v42 = vld [vmem:[%s4903_s3 + $0xc] sm:$0xf] }
 0x1f9   : > { %v3198_v4 = vor.u32 %v3509_v42, %v3195_v46  ;;  %v3435_v46 = vld [vmem:[%s4903_s3 + $0x1f8] sm:$0xf0] }
 0x1fa   : > { %v3652_v28 = vpop.eup %3651  ;;  %v2074_v18 = vadd.f32 %v2073_v45, %v2005_v3  ;;  %v1939_v41 = vadd.f32 %v1938_v33, %v1870_v8 }
 0x1fb   : > { %v4581_v25 = vadd.f32 %v3652_v28, %v3650_v15  ;;  %v3654_v63 = vpop.eup %3653  ;;  %2631 = vmatpush.bf16.msra.mxu3 %v3198_v4 }
 0x1fc   : > { %3655 = vtanh.f32 %v2074_v18 }
 0x1fd   : > { %3657 = vtanh.f32 %v4494_v19  ;;  %v3187_v19 = vld [vmem:[%s4903_s3 + $0x20] sm:$0xf0] }
 0x1fe   : > { %v3190_v22 = vor.u32 %v3508_v11, %v3187_v19  ;;  %v3559_v11 = vld [vmem:[%s4903_s3 + $0x19c] sm:$0xf] }
 0x1ff   : > { %v2007_v55 = vpop.f32.mrf.mxu2  ;;  %v1871_v60 = vpop.f32.mrf.mxu0 }
 0x200   : > { %v2076_v50 = vpop.f32.mrf.mxu3  ;;  %v2008_v10 = vadd.f32 %v2007_v55, %v1939_v41  ;;  %v1940_v20 = vpop.f32.mrf.mxu1  ;;  %v1872_v32 = vadd.f32 %v1871_v60, %v4258_v7  ;;  %v3186_v7 = vor.u32 %v3512_v35, %v3185_v57  ;;  %2573 = vmatpush.bf16.msra.mxu1 %v3190_v22  ;;  %v3433_v41 = vld [vmem:[%s4903_s3 + $0x1d8] sm:$0xf]  ;;  %v3438_v55 = vor.u32 %v3567_v44, %v3435_v46 }
 0x201   : > { %v3434_v54 = vor.u32 %v3571_v62, %v3433_v41  ;;  %v3563_v35 = vld [vmem:[%s4903_s3 + $0x1b4] sm:$0xf0]  ;;  %v3371_v41 = vld [vmem:[%s4903_s3 + $0x178] sm:$0xf0] }
 0x202   : > { %v3656_v16 = vpop.eup %3655  ;;  %v2077_v30 = vadd.f32 %v2076_v50, %v2008_v10  ;;  %v1941_v36 = vadd.f32 %v1940_v20, %v1872_v32  ;;  %2544 = vmatpush.bf16.msra.mxu0 %v3186_v7  ;;  %2740 = vmatpush.bf16.msrb.mxu3 %v3438_v55  ;;  %v3425_v20 = vld [vmem:[%s4903_s3 + $0x1d0] sm:$0xf]  ;;  %v3403_v7 = vld [vmem:[%s4903_s3 + $0x1b8] sm:$0xf0] }
 0x203   : > { %v4601_v34 = vadd.f32 %v3656_v16, %v3654_v63  ;;  %v3658_v49 = vpop.eup %3657  ;;  %2711 = vmatpush.bf16.msrb.mxu2 %v3434_v54  ;;  %v3570_v63 = vld [vmem:[%s4903_s3 + $0x1ec] sm:$0xf0] }
 0x204   : > { %3659 = vtanh.f32 %v2077_v30  ;;  %v3426_v16 = vor.u32 %v3570_v63, %v3425_v20  ;;  %v3566_v30 = vld [vmem:[%s4903_s3 + $0x1d4] sm:$0xf]  ;;  %v3361_v54 = vld [vmem:[%s4903_s3 + $0x150] sm:$0xf]  ;;  %v3547_v63 = vld [vmem:[%s4903_s3 + $0x134] sm:$0xf0] }
 0x205   : > { %3661 = vtanh.f32 %v2059_v37 }
 0x206   : > { %2653 = vmatpush.bf16.msrb.mxu0 %v3426_v16  ;;  %v3339_v16 = vld [vmem:[%s4903_s3 + $0x138] sm:$0xf0] }
 0x207   : > { %v2009_v47 = vpop.f32.mrf.mxu2  ;;  %v1874_v27 = vpop.f32.mrf.mxu0 }
 0x208   : > { %v2078_v24 = vpop.f32.mrf.mxu3  ;;  %v2010_v21 = vadd.f32 %v2009_v47, %v1941_v36  ;;  %v1943_v48 = vpop.f32.mrf.mxu1  ;;  %v1875_v1 = vadd.f32 %v1874_v27, %v4280_v39  ;;  %v3406_v47 = vor.u32 %v3559_v11, %v3403_v7 }
 0x20a   : > { %v3660_v51 = vpop.eup %3659  ;;  %v2079_v53 = vadd.f32 %v2078_v24, %v2010_v21  ;;  %v1944_v9 = vadd.f32 %v1943_v48, %v1875_v1  ;;  %2741 = vmatpush.bf16.msrb.mxu3 %v3406_v47 }
 0x20b   : > { %v4617_v43 = vadd.f32 %v3660_v51, %v3658_v49  ;;  %v3662_v3 = vpop.eup %3661 }
 0x20c   : > { %3663 = vtanh.f32 %v2079_v53 }
 0x20f   : > { %v2012_v14 = vpop.f32.mrf.mxu2  ;;  %v1876_v26 = vpop.f32.mrf.mxu0 }
 0x210   : > { %v2081_v58 = vpop.f32.mrf.mxu3  ;;  %v2013_v59 = vadd.f32 %v2012_v14, %v1944_v9  ;;  %v1945_v45 = vpop.f32.mrf.mxu1  ;;  %v1877_v15 = vadd.f32 %v1876_v26, %v4295_v12 }
 0x212   : > { %v3664_v5 = vpop.eup %3663  ;;  %v2082_v33 = vadd.f32 %v2081_v58, %v2013_v59  ;;  %v1946_v28 = vadd.f32 %v1945_v45, %v1877_v15  ;;  %v3393_v58 = vld [vmem:[%s4903_s3 + $0x190] sm:$0xf]  ;;  %v3555_v15 = vld [vmem:[%s4903_s3 + $0x174] sm:$0xf0] }
 0x213   : > { %v4620_v8 = vadd.f32 %v3664_v5, %v3662_v3  ;;  %v3395_v5 = vld [vmem:[%s4903_s3 + $0x1b0] sm:$0xf0] }
 0x214   : > { %3665 = vtanh.f32 %v2082_v33  ;;  %v3369_v33 = vld [vmem:[%s4903_s3 + $0x158] sm:$0xf] }
 0x217   : > { %v2014_v39 = vpop.f32.mrf.mxu2  ;;  %v1879_v12 = vpop.f32.mrf.mxu0 }
 0x218   : > { %v2083_v18 = vpop.f32.mrf.mxu3  ;;  %v2015_v2 = vadd.f32 %v2014_v39, %v1946_v28  ;;  %v1948_v42 = vpop.f32.mrf.mxu1  ;;  %v1880_v10 = vadd.f32 %v1879_v12, %v4306_v38  ;;  %v3427_v38 = vld [vmem:[%s4903_s3 + $0x1f0] sm:$0xf0]  ;;  %v3370_v39 = vor.u32 %v3555_v15, %v3369_v33  ;;  %v3273_v15 = vld [vmem:[%s4903_s3 + $0x98] sm:$0xf] }
 0x219   : > { %v3430_v57 = vor.u32 %v3566_v30, %v3427_v38  ;;  %v3299_v33 = vld [vmem:[%s4903_s3 + $0xf0] sm:$0xf0] }
 0x21a   : > { %v3666_v50 = vpop.eup %3665  ;;  %v2084_v4 = vadd.f32 %v2083_v18, %v2015_v2  ;;  %v1949_v0 = vadd.f32 %v1948_v42, %v1880_v10  ;;  %v3551_v18 = vld [vmem:[%s4903_s3 + $0x15c] sm:$0xf] }
 0x21b   : > { %v2126_v60 = vadd.f32 %v3666_v50, %v4533_v40  ;;  %v3401_v40 = vld [vmem:[%s4903_s3 + $0x198] sm:$0xf]  ;;  %2682 = vmatpush.bf16.msrb.mxu1 %v3430_v57  ;;  %v3374_v12 = vor.u32 %v3551_v18, %v3371_v41  ;;  %v3550_v50 = vld [vmem:[%s4903_s3 + $0x154] sm:$0xf] }
 0x21c   : > { %3667 = vtanh.f32 %v2084_v4  ;;  %v3402_v37 = vor.u32 %v3563_v35, %v3401_v40  ;;  %v3337_v4 = vld [vmem:[%s4903_s3 + $0x118] sm:$0xf] }
 0x21d   : > { %v2141_v49 = vmul.f32 0.33333334, %v2126_v60  ;;  %2742 = vmatpush.bf16.msrb.mxu3 %v3374_v12  ;;  %v3338_v40 = vor.u32 %v3547_v63, %v3337_v4  ;;  %v3523_v4 = vld [vmem:[%s4903_s3 + $0x74] sm:$0xf0] }
 0x21e   : > { %2712 = vmatpush.bf16.msrb.mxu2 %v3402_v37 }
 0x21f   : > { %v2017_v32 = vpop.f32.mrf.mxu2  ;;  %v1881_v22 = vpop.f32.mrf.mxu0 }
 0x220   : > { %v2086_v29 = vpop.f32.mrf.mxu3  ;;  %v2018_v19 = vadd.f32 %v2017_v32, %v1949_v0  ;;  %v1950_v36 = vpop.f32.mrf.mxu1  ;;  %v1882_v27 = vadd.f32 %v1881_v22, %v4321_v13  ;;  %v3562_v13 = vld [vmem:[%s4903_s3 + $0x1ac] sm:$0xf0]  ;;  %v3543_v0 = vld [vmem:[%s4903_s3 + $0x11c] sm:$0xf] }
 0x221   : > { %v3394_v3 = vor.u32 %v3562_v13, %v3393_v58  ;;  %v3342_v32 = vor.u32 %v3543_v0, %v3339_v16  ;;  %v3546_v22 = vld [vmem:[%s4903_s3 + $0x12c] sm:$0xf0] }
 0x222   : > { %v3668_v24 = vpop.eup %3667  ;;  %v2087_v21 = vadd.f32 %v2086_v29, %v2018_v19  ;;  %v1951_v53 = vadd.f32 %v1950_v36, %v1882_v27  ;;  %2713 = vmatpush.bf16.msrb.mxu2 %v3370_v39  ;;  %v3329_v19 = vld [vmem:[%s4903_s3 + $0x110] sm:$0xf]  ;;  %v3542_v36 = vld [vmem:[%s4903_s3 + $0x114] sm:$0xf] }
 0x223   : > { %v2128_v48 = vadd.f32 %v3668_v24, %v4541_v61  ;;  %v3558_v61 = vld [vmem:[%s4903_s3 + $0x194] sm:$0xf]  ;;  %2654 = vmatpush.bf16.msrb.mxu0 %v3394_v3  ;;  %2743 = vmatpush.bf16.msrb.mxu3 %v3342_v32  ;;  %v3233_v0 = vld [vmem:[%s4903_s3 + $0x50] sm:$0xf] }
 0x224   : > { %3669 = vtanh.f32 %v2087_v21  ;;  %v3398_v28 = vor.u32 %v3558_v61, %v3395_v5  ;;  %v3307_v61 = vld [vmem:[%s4903_s3 + $0xf8] sm:$0xf0]  ;;  %v3534_v5 = vld [vmem:[%s4903_s3 + $0xd4] sm:$0xf]  ;;  %v3522_v16 = vld [vmem:[%s4903_s3 + $0x6c] sm:$0xf0] }
 0x225   : > { %v2142_v51 = vmul.f32 0.33333334, %v2128_v48  ;;  %v3302_v41 = vor.u32 %v3534_v5, %v3299_v33 }
 0x226   : > { %2683 = vmatpush.bf16.msrb.mxu1 %v3398_v28  ;;  %2714 = vmatpush.bf16.msrb.mxu2 %v3338_v40 }
 0x227   : > { %v4662_v1 = vpack.c.bf16 %v2142_v51, %v2141_v49  ;;  %v2019_v9 = vpop.f32.mrf.mxu2  ;;  %v1884_v26 = vpop.f32.mrf.mxu0  ;;  %v3305_v51 = vld [vmem:[%s4903_s3 + $0xd8] sm:$0xf] }
 0x228   : > { %v2088_v14 = vpop.f32.mrf.mxu3  ;;  %v2020_v59 = vadd.f32 %v2019_v9, %v1951_v53  ;;  %v1953_v45 = vpop.f32.mrf.mxu1  ;;  %v1885_v2 = vadd.f32 %v1884_v26, %v4344_v52  ;;  %v3554_v52 = vld [vmem:[%s4903_s3 + $0x16c] sm:$0xf0]  ;;  %v3539_v53 = vld [vmem:[%s4903_s3 + $0xf4] sm:$0xf0]  ;;  %v3535_v9 = vld [vmem:[%s4903_s3 + $0xdc] sm:$0xf] }
 0x229   : > { %2545 = vmatmul.bf16.vlgmr.msra.gmra.mxu0 %v4662_v1  ;;  %2574 = vmatmul.bf16.vlgmr.msra.gmra.mxu1 %v4662_v1  ;;  %v3362_v55 = vor.u32 %v3554_v52, %v3361_v54  ;;  %v3306_v13 = vor.u32 %v3539_v53, %v3305_v51  ;;  %v3538_v26 = vld [vmem:[%s4903_s3 + $0xec] sm:$0xf0] }
 0x22a   : > { %v3670_v62 = vpop.eup %3669  ;;  %v2089_v44 = vadd.f32 %v2088_v14, %v2020_v59  ;;  %2603 = vmatmul.bf16.vlgmr.msra.gmra.mxu2 %v4662_v1  ;;  %2632 = vmatmul.bf16.vlgmr.msra.gmra.mxu3 %v4662_v1  ;;  %v1954_v46 = vadd.f32 %v1953_v45, %v1885_v2  ;;  %v3297_v59 = vld [vmem:[%s4903_s3 + $0xd0] sm:$0xf]  ;;  %v3310_v45 = vor.u32 %v3535_v9, %v3307_v61  ;;  %v3275_v2 = vld [vmem:[%s4903_s3 + $0xb8] sm:$0xf0] }
 0x22b   : > { %v2130_v42 = vadd.f32 %v3670_v62, %v4557_v6  ;;  %v3363_v6 = vld [vmem:[%s4903_s3 + $0x170] sm:$0xf0]  ;;  %2655 = vmatpush.bf16.msrb.mxu0 %v3362_v55  ;;  %v3298_v3 = vor.u32 %v3538_v26, %v3297_v59  ;;  %v3531_v62 = vld [vmem:[%s4903_s3 + $0xb4] sm:$0xf0]  ;;  %2715 = vmatpush.bf16.msrb.mxu2 %v3306_v13  ;;  %v3265_v54 = vld [vmem:[%s4903_s3 + $0x90] sm:$0xf] }
 0x22c   : > { %3671 = vtanh.f32 %v2089_v44  ;;  %v3366_v20 = vor.u32 %v3550_v50, %v3363_v6  ;;  %v3527_v44 = vld [vmem:[%s4903_s3 + $0x9c] sm:$0xf]  ;;  %2744 = vmatpush.bf16.msrb.mxu3 %v3310_v45  ;;  %v3530_v52 = vld [vmem:[%s4903_s3 + $0xac] sm:$0xf0]  ;;  %v3267_v50 = vld [vmem:[%s4903_s3 + $0xb0] sm:$0xf0] }
 0x22d   : > { %v2143_v37 = vmul.f32 0.33333334, %v2130_v42  ;;  %v3274_v42 = vor.u32 %v3531_v62, %v3273_v15  ;;  %v3266_v55 = vor.u32 %v3530_v52, %v3265_v54  ;;  %v3241_v6 = vld [vmem:[%s4903_s3 + $0x58] sm:$0xf] }
 0x22e   : > { %2684 = vmatpush.bf16.msrb.mxu1 %v3366_v20  ;;  %v3243_v20 = vld [vmem:[%s4903_s3 + $0x78] sm:$0xf0]  ;;  %v3242_v32 = vor.u32 %v3523_v4, %v3241_v6 }
 0x22f   : > { %v2022_v10 = vpop.f32.mrf.mxu2  ;;  %v1886_v38 = vpop.f32.mrf.mxu0  ;;  %2716 = vmatpush.bf16.msrb.mxu2 %v3274_v42 }
 0x230   : > { %v2091_v60 = vpop.f32.mrf.mxu3  ;;  %v2023_v30 = vadd.f32 %v2022_v10, %v1954_v46  ;;  %v1955_v29 = vpop.f32.mrf.mxu1  ;;  %v1887_v11 = vadd.f32 %v1886_v38, %v4346_v17  ;;  %v3330_v17 = vor.u32 %v3546_v22, %v3329_v19  ;;  %v3526_v46 = vld [vmem:[%s4903_s3 + $0x94] sm:$0xf]  ;;  %v3234_v22 = vor.u32 %v3522_v16, %v3233_v0 }
 0x231   : > { %v3270_v10 = vor.u32 %v3526_v46, %v3267_v50 }
 0x232   : > { %v3672_v57 = vpop.eup %3671  ;;  %v2092_v35 = vadd.f32 %v2091_v60, %v2023_v30  ;;  %v1956_v24 = vadd.f32 %v1955_v29, %v1887_v11  ;;  %2656 = vmatpush.bf16.msrb.mxu0 %v3330_v17  ;;  %v3519_v60 = vld [vmem:[%s4903_s3 + $0x5c] sm:$0xf]  ;;  %v3518_v30 = vld [vmem:[%s4903_s3 + $0x54] sm:$0xf]  ;;  %v3515_v11 = vld [vmem:[%s4903_s3 + $0x34] sm:$0xf0] }
 0x233   : > { %v2132_v7 = vadd.f32 %v3672_v57, %v4577_v23  ;;  %v3331_v23 = vld [vmem:[%s4903_s3 + $0x130] sm:$0xf0]  ;;  %v3246_v29 = vor.u32 %v3519_v60, %v3243_v20  ;;  %v3201_v17 = vld [vmem:[%s4903_s3 + $0x10] sm:$0xf]  ;;  %2717 = vmatpush.bf16.msrb.mxu2 %v3242_v32 }
 0x234   : > { %3673 = vtanh.f32 %v2092_v35  ;;  %v3334_v21 = vor.u32 %v3542_v36, %v3331_v23  ;;  %v3235_v57 = vld [vmem:[%s4903_s3 + $0x70] sm:$0xf0]  ;;  %v3209_v35 = vld [vmem:[%s4903_s3 + $0x18] sm:$0xf]  ;;  %v3514_v23 = vld [vmem:[%s4903_s3 + $0x2c] sm:$0xf0] }
 0x235   : > { %v2144_v47 = vmul.f32 0.33333334, %v2132_v7  ;;  %v3238_v36 = vor.u32 %v3518_v30, %v3235_v57  ;;  %v3210_v9 = vor.u32 %v3515_v11, %v3209_v35 }
 0x236   : > { %2685 = vmatpush.bf16.msrb.mxu1 %v3334_v21  ;;  %2657 = vmatpush.bf16.msrb.mxu0 %v3298_v3  ;;  %v3203_v21 = vld [vmem:[%s4903_s3 + $0x30] sm:$0xf0] }
 0x237   : > { %v4732_v27 = vpack.c.bf16 %v2144_v47, %v2143_v37  ;;  %v2024_v48 = vpop.f32.mrf.mxu2  ;;  %v1889_v58 = vpop.f32.mrf.mxu0  ;;  %v3511_v37 = vld [vmem:[%s4903_s3 + $0x1c] sm:$0xf]  ;;  %2718 = vmatpush.bf16.msrb.mxu2 %v3210_v9 }
 0x238   : > { %v2093_v49 = vpop.f32.mrf.mxu3  ;;  %v2025_v14 = vadd.f32 %v2024_v48, %v1956_v24  ;;  %v1890_v18 = vadd.f32 %v1889_v58, %v4368_v56  ;;  %v1958_v56 = vpop.f32.mrf.mxu1  ;;  %v3211_v47 = vld [vmem:[%s4903_s3 + $0x38] sm:$0xf0]  ;;  %v3510_v24 = vld [vmem:[%s4903_s3 + $0x14] sm:$0xf]  ;;  %v3202_v58 = vor.u32 %v3514_v23, %v3201_v17 }
 0x239   : > { %2550 = vmatmul.bf16.gmra.mxu0 %v4732_v27  ;;  %2579 = vmatmul.bf16.gmra.mxu1 %v4732_v27  ;;  %v3206_v13 = vor.u32 %v3510_v24, %v3203_v21 }
 0x23a   : > { %v3674_v28 = vpop.eup %3673  ;;  %v2094_v39 = vadd.f32 %v2093_v49, %v2025_v14  ;;  %2608 = vmatmul.bf16.gmra.mxu2 %v4732_v27  ;;  %2637 = vmatmul.bf16.gmra.mxu3 %v4732_v27  ;;  %v1959_v63 = vadd.f32 %v1958_v56, %v1890_v18  ;;  %v3214_v14 = vor.u32 %v3511_v37, %v3211_v47 }
 0x23b   : > { %v2134_v12 = vadd.f32 %v3674_v28, %v4581_v25  ;;  %2686 = vmatpush.bf16.msrb.mxu1 %v3302_v41  ;;  %v3278_v25 = vor.u32 %v3527_v44, %v3275_v2  ;;  %2658 = vmatpush.bf16.msrb.mxu0 %v3266_v55 }
 0x23c   : > { %3675 = vtanh.f32 %v2094_v39 }
 0x23d   : > { %2745 = vmatpush.bf16.msrb.mxu3 %v3278_v25  ;;  %v2145_v61 = vmul.f32 0.33333334, %v2134_v12 }
 0x23f   : > { %v2027_v38 = vpop.f32.mrf.mxu2  ;;  %v1891_v19 = vpop.f32.mrf.mxu0  ;;  %2687 = vmatpush.bf16.msrb.mxu1 %v3270_v10  ;;  %2659 = vmatpush.bf16.msrb.mxu0 %v3234_v22 }
 0x240   : > { %v2096_v40 = vpop.f32.mrf.mxu3  ;;  %v2028_v7 = vadd.f32 %v2027_v38, %v1959_v63  ;;  %v1892_v51 = vadd.f32 %v1891_v19, %v4383_v31  ;;  %v1960_v26 = vpop.f32.mrf.mxu1 }
 0x241   : > { %2746 = vmatpush.bf16.msrb.mxu3 %v3246_v29 }
 0x242   : > { %v3676_v48 = vpop.eup %3675  ;;  %v2097_v49 = vadd.f32 %v2096_v40, %v2028_v7  ;;  %v1961_v45 = vadd.f32 %v1960_v26, %v1892_v51 }
 0x243   : > { %v2136_v53 = vadd.f32 %v3676_v48, %v4601_v34  ;;  %2688 = vmatpush.bf16.msrb.mxu1 %v3238_v36  ;;  %2660 = vmatpush.bf16.msrb.mxu0 %v3202_v58 }
 0x244   : > { %3677 = vtanh.f32 %v2097_v49 }
 0x245   : > { %v2146_v59 = vmul.f32 0.33333334, %v2136_v53  ;;  %2747 = vmatpush.bf16.msrb.mxu3 %v3214_v14 }
 0x247   : > { %v2151_v3 = vpack.c.bf16 %v2146_v59, %v2145_v61  ;;  %v2029_v5 = vpop.f32.mrf.mxu2  ;;  %2689 = vmatpush.bf16.msrb.mxu1 %v3206_v13 }
 0x248   : > { %v2030_v31 = vadd.f32 %v2029_v5, %v1961_v45  ;;  %v2098_v34 = vpop.f32.mrf.mxu3 }
 0x249   : > { %2555 = vmatmul.bf16.gmra.mxu0 %v2151_v3  ;;  %2584 = vmatmul.bf16.gmra.mxu1 %v2151_v3 }
 0x24a   : > { %v3678_v33 = vpop.eup %3677  ;;  %v2099_v15 = vadd.f32 %v2098_v34, %v2030_v31  ;;  %2613 = vmatmul.bf16.gmra.mxu2 %v2151_v3  ;;  %2642 = vmatmul.bf16.gmra.mxu3 %v2151_v3 }
 0x24b   : > { %v2138_v28 = vadd.f32 %v3678_v33, %v4617_v43 }
 0x24c   : > { %3679 = vtanh.f32 %v2099_v15 }
 0x24d   : > { %v2147_v41 = vmul.f32 0.33333334, %v2138_v28 }
 0x252   : > { %v3680_v39 = vpop.eup %3679 }
 0x253   : > { %v2140_v18 = vadd.f32 %v3680_v39, %v4620_v8 }
 0x255   : > { %v2148_v62 = vmul.f32 0.33333334, %v2140_v18 }
 0x257   : > { %v2152_v44 = vpack.c.bf16 %v2148_v62, %v2147_v41 }
 0x259   : > { %2560 = vmatmul.bf16.gmra.mxu0 %v2152_v44  ;;  %2589 = vmatmul.bf16.gmra.mxu1 %v2152_v44 }
 0x25a   : > { %2618 = vmatmul.bf16.gmra.mxu2 %v2152_v44  ;;  %2647 = vmatmul.bf16.gmra.mxu3 %v2152_v44 }
 0x269   : > { %2661 = vmatmul.bf16.vlgmr.msrb.gmra.mxu0 %v4662_v1  ;;  %2690 = vmatmul.bf16.vlgmr.msrb.gmra.mxu1 %v4662_v1 }
 0x26a   : > { %2719 = vmatmul.bf16.vlgmr.msrb.gmra.mxu2 %v4662_v1  ;;  %2748 = vmatmul.bf16.vlgmr.msrb.gmra.mxu3 %v4662_v1 }
 0x279   : > { %2666 = vmatmul.bf16.gmra.mxu0 %v4732_v27  ;;  %2695 = vmatmul.bf16.gmra.mxu1 %v4732_v27 }
 0x27a   : > { %2724 = vmatmul.bf16.gmra.mxu2 %v4732_v27  ;;  %2753 = vmatmul.bf16.gmra.mxu3 %v4732_v27 }
 0x289   : > { %2671 = vmatmul.bf16.gmra.mxu0 %v2151_v3  ;;  %2700 = vmatmul.bf16.gmra.mxu1 %v2151_v3 }
 0x28a   : > { %2729 = vmatmul.bf16.gmra.mxu2 %v2151_v3  ;;  %2758 = vmatmul.bf16.gmra.mxu3 %v2151_v3 }
 0x299   : > { %2676 = vmatmul.bf16.gmra.mxu0 %v2152_v44  ;;  %2705 = vmatmul.bf16.gmra.mxu1 %v2152_v44 }
 0x29a   : > { %2734 = vmatmul.bf16.gmra.mxu2 %v2152_v44  ;;  %2763 = vmatmul.bf16.gmra.mxu3 %v2152_v44 }
 0x2a6   : > { %v2546_v43 = vpop.f32.mrf.mxu0  ;;  %v2575_v8 = vpop.f32.mrf.mxu1 }
 0x2a7   : > { %v2769_v1 = vpack.c.bf16 %v2575_v8, %v2546_v43 }
 0x2a9   : > { %2801 = vst [vmem:[%s4853_s14] sm:$0xff] %v2769_v1 }
 0x2ad   : > { %v2604_v27 = vpop.f32.mrf.mxu2  ;;  %v2633_v2 = vpop.f32.mrf.mxu3 }
 0x2ae   : > { %v2770_v12 = vpack.c.bf16 %v2633_v2, %v2604_v27  ;;  %v2548_v56 = vpop.f32.mrf.mxu0  ;;  %v2577_v42 = vpop.f32.mrf.mxu1 }
 0x2af   : > { %v2773_v54 = vpack.c.bf16 %v2577_v42, %v2548_v56 }
 0x2b0   : > { %2802 = vst [vmem:[%s4853_s14 + $0x8] sm:$0xff] %v2770_v12 }
 0x2b1   : > { %2805 = vst [vmem:[%s4853_s14 + $0x20] sm:$0xff] %v2773_v54 }
 0x2b5   : > { %v2606_v52 = vpop.f32.mrf.mxu2  ;;  %v2635_v46 = vpop.f32.mrf.mxu3 }
 0x2b6   : > { %v2774_v25 = vpack.c.bf16 %v2635_v46, %v2606_v52  ;;  %v2551_v55 = vpop.f32.mrf.mxu0  ;;  %v2580_v50 = vpop.f32.mrf.mxu1 }
 0x2b7   : > { %v2777_v6 = vpack.c.bf16 %v2580_v50, %v2551_v55 }
 0x2b8   : > { %2806 = vst [vmem:[%s4853_s14 + $0x28] sm:$0xff] %v2774_v25 }
 0x2b9   : > { %2809 = vst [vmem:[%s4853_s14 + $0x40] sm:$0xff] %v2777_v6 }
 0x2bd   : > { %v2609_v4 = vpop.f32.mrf.mxu2  ;;  %v2638_v10 = vpop.f32.mrf.mxu3 }
 0x2be   : > { %v2778_v60 = vpack.c.bf16 %v2638_v10, %v2609_v4  ;;  %v2553_v20 = vpop.f32.mrf.mxu0  ;;  %v2582_v63 = vpop.f32.mrf.mxu1 }
 0x2bf   : > { %v2781_v0 = vpack.c.bf16 %v2582_v63, %v2553_v20 }
 0x2c0   : > { %2810 = vst [vmem:[%s4853_s14 + $0x48] sm:$0xff] %v2778_v60 }
 0x2c1   : > { %2813 = vst [vmem:[%s4853_s14 + $0x60] sm:$0xff] %v2781_v0 }
 0x2c5   : > { %v2611_v16 = vpop.f32.mrf.mxu2  ;;  %v2640_v30 = vpop.f32.mrf.mxu3 }
 0x2c6   : > { %v2782_v38 = vpack.c.bf16 %v2640_v30, %v2611_v16  ;;  %v2556_v40 = vpop.f32.mrf.mxu0  ;;  %v2585_v32 = vpop.f32.mrf.mxu1 }
 0x2c7   : > { %v2785_v29 = vpack.c.bf16 %v2585_v32, %v2556_v40 }
 0x2c8   : > { %2814 = vst [vmem:[%s4853_s14 + $0x68] sm:$0xff] %v2782_v38 }
 0x2c9   : > { %2817 = vst [vmem:[%s4853_s14 + $0x80] sm:$0xff] %v2785_v29 }
 0x2cd   : > { %v2614_v57 = vpop.f32.mrf.mxu2  ;;  %v2643_v35 = vpop.f32.mrf.mxu3 }
 0x2ce   : > { %v2786_v11 = vpack.c.bf16 %v2643_v35, %v2614_v57  ;;  %v2558_v7 = vpop.f32.mrf.mxu0  ;;  %v2587_v19 = vpop.f32.mrf.mxu1 }
 0x2cf   : > { %v2789_v22 = vpack.c.bf16 %v2587_v19, %v2558_v7 }
 0x2d0   : > { %2818 = vst [vmem:[%s4853_s14 + $0x88] sm:$0xff] %v2786_v11 }
 0x2d1   : > { %2821 = vst [vmem:[%s4853_s14 + $0xa0] sm:$0xff] %v2789_v22 }
 0x2d5   : > { %v2616_v36 = vpop.f32.mrf.mxu2  ;;  %v2645_v37 = vpop.f32.mrf.mxu3 }
 0x2d6   : > { %v2790_v47 = vpack.c.bf16 %v2645_v37, %v2616_v36  ;;  %v2561_v17 = vpop.f32.mrf.mxu0  ;;  %v2590_v23 = vpop.f32.mrf.mxu1 }
 0x2d7   : > { %v2793_v24 = vpack.c.bf16 %v2590_v23, %v2561_v17 }
 0x2d8   : > { %2822 = vst [vmem:[%s4853_s14 + $0xa8] sm:$0xff] %v2790_v47 }
 0x2d9   : > { %2825 = vst [vmem:[%s4853_s14 + $0xc0] sm:$0xff] %v2793_v24 }
 0x2dd   : > { %v2619_v21 = vpop.f32.mrf.mxu2  ;;  %v2648_v48 = vpop.f32.mrf.mxu3 }
 0x2de   : > { %v2794_v49 = vpack.c.bf16 %v2648_v48, %v2619_v21  ;;  %v2563_v51 = vpop.f32.mrf.mxu0  ;;  %v2592_v53 = vpop.f32.mrf.mxu1 }
 0x2df   : > { %v2797_v9 = vpack.c.bf16 %v2592_v53, %v2563_v51 }
 0x2e0   : > { %2826 = vst [vmem:[%s4853_s14 + $0xc8] sm:$0xff] %v2794_v49 }
 0x2e1   : > { %2829 = vst [vmem:[%s4853_s14 + $0xe0] sm:$0xff] %v2797_v9 }
 0x2e5   : > { %v2621_v14 = vpop.f32.mrf.mxu2  ;;  %v2650_v58 = vpop.f32.mrf.mxu3 }
 0x2e6   : > { %v2798_v13 = vpack.c.bf16 %v2650_v58, %v2621_v14  ;;  %v2662_v61 = vpop.f32.mrf.mxu0  ;;  %v2691_v59 = vpop.f32.mrf.mxu1 }
 0x2e7   : > { %v2771_v26 = vpack.c.bf16 %v2691_v59, %v2662_v61 }
 0x2e8   : > { %2830 = vst [vmem:[%s4853_s14 + $0xe8] sm:$0xff] %v2798_v13 }
 0x2e9   : > { %2803 = vst [vmem:[%s4853_s14 + $0x10] sm:$0xff] %v2771_v26 }
 0x2ed   : > { %v2720_v45 = vpop.f32.mrf.mxu2  ;;  %v2749_v3 = vpop.f32.mrf.mxu3 }
 0x2ee   : > { %v2772_v5 = vpack.c.bf16 %v2749_v3, %v2720_v45  ;;  %v2664_v31 = vpop.f32.mrf.mxu0  ;;  %v2693_v34 = vpop.f32.mrf.mxu1 }
 0x2ef   : > { %v2775_v33 = vpack.c.bf16 %v2693_v34, %v2664_v31 }
 0x2f0   : > { %2804 = vst [vmem:[%s4853_s14 + $0x18] sm:$0xff] %v2772_v5 }
 0x2f1   : > { %2807 = vst [vmem:[%s4853_s14 + $0x30] sm:$0xff] %v2775_v33 }
 0x2f5   : > { %v2722_v15 = vpop.f32.mrf.mxu2  ;;  %v2751_v28 = vpop.f32.mrf.mxu3 }
 0x2f6   : > { %v2776_v39 = vpack.c.bf16 %v2751_v28, %v2722_v15  ;;  %v2667_v18 = vpop.f32.mrf.mxu0  ;;  %v2696_v41 = vpop.f32.mrf.mxu1 }
 0x2f7   : > { %v2779_v62 = vpack.c.bf16 %v2696_v41, %v2667_v18 }
 0x2f8   : > { %2808 = vst [vmem:[%s4853_s14 + $0x38] sm:$0xff] %v2776_v39 }
 0x2f9   : > { %2811 = vst [vmem:[%s4853_s14 + $0x50] sm:$0xff] %v2779_v62 }
 0x2fd   : > { %v2725_v44 = vpop.f32.mrf.mxu2  ;;  %v2754_v43 = vpop.f32.mrf.mxu3 }
 0x2fe   : > { %v2780_v8 = vpack.c.bf16 %v2754_v43, %v2725_v44  ;;  %v2669_v1 = vpop.f32.mrf.mxu0  ;;  %v2698_v27 = vpop.f32.mrf.mxu1 }
 0x2ff   : > { %v2783_v2 = vpack.c.bf16 %v2698_v27, %v2669_v1 }
 0x300   : > { %2812 = vst [vmem:[%s4853_s14 + $0x58] sm:$0xff] %v2780_v8 }
 0x301   : > { %2815 = vst [vmem:[%s4853_s14 + $0x70] sm:$0xff] %v2783_v2 }
 0x305   : > { %v2727_v12 = vpop.f32.mrf.mxu2  ;;  %v2756_v56 = vpop.f32.mrf.mxu3 }
 0x306   : > { %v2784_v42 = vpack.c.bf16 %v2756_v56, %v2727_v12  ;;  %v2672_v54 = vpop.f32.mrf.mxu0  ;;  %v2701_v52 = vpop.f32.mrf.mxu1 }
 0x307   : > { %v2787_v46 = vpack.c.bf16 %v2701_v52, %v2672_v54 }
 0x308   : > { %2816 = vst [vmem:[%s4853_s14 + $0x78] sm:$0xff] %v2784_v42 }
 0x309   : > { %2819 = vst [vmem:[%s4853_s14 + $0x90] sm:$0xff] %v2787_v46 }
 0x30d   : > { %v2730_v25 = vpop.f32.mrf.mxu2  ;;  %v2759_v55 = vpop.f32.mrf.mxu3 }
 0x30e   : > { %v2788_v50 = vpack.c.bf16 %v2759_v55, %v2730_v25  ;;  %v2674_v6 = vpop.f32.mrf.mxu0  ;;  %v2703_v4 = vpop.f32.mrf.mxu1 }
 0x30f   : > { %v2791_v10 = vpack.c.bf16 %v2703_v4, %v2674_v6 }
 0x310   : > { %2820 = vst [vmem:[%s4853_s14 + $0x98] sm:$0xff] %v2788_v50 }
 0x311   : > { %2823 = vst [vmem:[%s4853_s14 + $0xb0] sm:$0xff] %v2791_v10 }
 0x315   : > { %v2732_v60 = vpop.f32.mrf.mxu2  ;;  %v2761_v20 = vpop.f32.mrf.mxu3 }
 0x316   : > { %v2792_v63 = vpack.c.bf16 %v2761_v20, %v2732_v60  ;;  %v2677_v0 = vpop.f32.mrf.mxu0  ;;  %v2706_v16 = vpop.f32.mrf.mxu1 }
 0x317   : > { %v2795_v30 = vpack.c.bf16 %v2706_v16, %v2677_v0 }
 0x318   : > { %2824 = vst [vmem:[%s4853_s14 + $0xb8] sm:$0xff] %v2792_v63 }
 0x319   : > { %2827 = vst [vmem:[%s4853_s14 + $0xd0] sm:$0xff] %v2795_v30 }
 0x31d   : > { %v2735_v38 = vpop.f32.mrf.mxu2  ;;  %v2764_v40 = vpop.f32.mrf.mxu3 }
 0x31e   : > { %v2796_v32 = vpack.c.bf16 %v2764_v40, %v2735_v38  ;;  %v2679_v29 = vpop.f32.mrf.mxu0  ;;  %v2708_v57 = vpop.f32.mrf.mxu1 }
 0x31f   : > { %v2799_v35 = vpack.c.bf16 %v2708_v57, %v2679_v29 }
 0x320   : > { %2828 = vst [vmem:[%s4853_s14 + $0xd8] sm:$0xff] %v2796_v32 }
 0x321   : > { %2831 = vst [vmem:[%s4853_s14 + $0xf0] sm:$0xff] %v2799_v35 }
 0x325   : > { %v2737_v11 = vpop.f32.mrf.mxu2  ;;  %v2766_v7 = vpop.f32.mrf.mxu3 }
 0x326   : > { %v2800_v19 = vpack.c.bf16 %v2766_v7, %v2737_v11 }
 0x328   : > { %2832 = vst [vmem:[%s4853_s14 + $0xf8] sm:$0xff] %v2800_v19 }
 0x329 PF: > { %p15_p0 = scmp.ge.s32.totalorder %s3804_s20, 6   ;;  %s4909_s15 = smov %s3742_s16 }
 0x32a   : > { %s4910_s16 = smov %s3746_s17  ;;  %s4911_s17 = smov %s3814_s23 }
 0x32b   : > { %s4912_s18 = smov %s3804_s20  ;;  %17 = sbr.rel (!%p15_p0) target bundleno = 4 (0x4), region = 85 }
 0x330   :  { %2857 = vsyncpa [#allocation3], 1 }
 0x331   :  { %2859 = vsyncpa [#allocation3 + $0x1], 1 }
 0x332   :  { %2860 = vsyncpa [#allocation5], 1 }

</bundles_post_ra>
